<compile_context>
chip_gen: v6e
topology: v6e:2x2x1
jax: 0.10.0
libtpu: 0.0.40
codegen_flags: <defaults>
</compile_context>

<pallas_src>
import jax
import jax.numpy as jnp
from jax.experimental import pallas as pl
from jax.experimental.pallas import tpu as pltpu

# ----------------------------------------------------------------------------
# Model dimensions (from the PyTorch __init__).
# ----------------------------------------------------------------------------
IN0 = 318            # features consumed by fc1
EXTRA = 34           # features concatenated before fc17
H = 1024             # hidden width (fc1..fc4, fc15, fc16)
N_HIDDEN = 6         # number of 1024-wide hidden layers
K17 = H + EXTRA      # fc17 fan-in  (1058)
N17 = 100            # fc17 fan-out
N18 = 2              # fc18 fan-out

# Padded (TPU-friendly) dimensions.
MP = 8               # batch rows padded to one sublane tile
K17P = H + 128       # 1152 = hidden activations + extra features + zero pad
NP = 128             # lane-dense padded width for fc17 / fc18 outputs

NUM_STEPS = N_HIDDEN + 2   # 6 hidden layers + fc17 + fc18
_BN_EPS = 1e-5


# ----------------------------------------------------------------------------
# Fused whole-network kernel.
#
# Grid = (NUM_STEPS,), "arbitrary" (each layer depends on the previous one).
# h_ref (VMEM scratch, [8, 1152] f32) layout:
#   cols    0..1023 : current hidden activation (layer outputs overwrite this)
#   cols 1024..1057 : x[:, 318:352]  (preserved for the fc17 concat)
#   cols 1058..1151 : zeros
# Step 6 (fc17) reuses cols 0..127 of the scratch for its 128-wide output;
# step 7 (fc18) consumes it and writes the final [8, 128] output block.
# ----------------------------------------------------------------------------
def _fused_net_kernel(x_ref, whid_ref, shid_ref, bhid_ref,
                      w17_ref, s17_ref, b17_ref, w18_ref, b18_ref,
                      o_ref, h_ref):
    l = pl.program_id(0)

    @pl.when(l == 0)
    def _():
        h_ref[...] = x_ref[...]                      # load padded input once

    @pl.when(l < N_HIDDEN)
    def _():
        h = h_ref[:, :H].astype(jnp.bfloat16)
        y = jnp.dot(h, whid_ref[...], preferred_element_type=jnp.float32)
        h_ref[:, :H] = jnp.maximum(y * shid_ref[...] + bhid_ref[...], 0.0)

    @pl.when(l == N_HIDDEN)                          # fc17 (+bn17+relu), uses concat
    def _():
        h = h_ref[...].astype(jnp.bfloat16)          # [8, 1152]
        y = jnp.dot(h, w17_ref[...], preferred_element_type=jnp.float32)
        h_ref[:, :NP] = jnp.maximum(y * s17_ref[...] + b17_ref[...], 0.0)

    @pl.when(l == N_HIDDEN + 1)                      # fc18 (plain affine)
    def _():
        h = h_ref[:, :NP].astype(jnp.bfloat16)
        y = jnp.dot(h, w18_ref[...], preferred_element_type=jnp.float32)
        o_ref[...] = y + b18_ref[...]


def trans_gang_player_forward(packed, x):
    """x: [B, 352] -> [B, 2]. `packed` comes from pack_params (padded, bf16)."""
    B = x.shape[0]
    # Only the (tiny) activation is padded per call; all weights were padded
    # once in pack_params.
    x_pad = jnp.zeros((MP, K17P), jnp.float32)
    x_pad = x_pad.at[:B, :IN0].set(x[:, :IN0].astype(jnp.float32))
    x_pad = x_pad.at[:B, H:H + EXTRA].set(x[:, IN0:IN0 + EXTRA].astype(jnp.float32))

    clamp = N_HIDDEN - 1  # hidden-weight block index saturates for fc17/fc18 steps
    out = pl.pallas_call(
        _fused_net_kernel,
        out_shape=jax.ShapeDtypeStruct((MP, NP), jnp.float32),
        grid_spec=pltpu.PrefetchScalarGridSpec(
            num_scalar_prefetch=0,
            grid=(NUM_STEPS,),
            in_specs=[
                pl.BlockSpec((MP, K17P), lambda l: (0, 0)),                    # x (padded)
                pl.BlockSpec((None, H, H),
                             lambda l: (jnp.minimum(l, clamp), 0, 0)),         # hidden W[l]
                pl.BlockSpec((None, 1, H),
                             lambda l: (jnp.minimum(l, clamp), 0, 0)),         # hidden scale[l]
                pl.BlockSpec((None, 1, H),
                             lambda l: (jnp.minimum(l, clamp), 0, 0)),         # hidden shift[l]
                pl.BlockSpec((K17P, NP), lambda l: (0, 0)),                    # fc17 W
                pl.BlockSpec((1, NP), lambda l: (0, 0)),                       # fc17 scale
                pl.BlockSpec((1, NP), lambda l: (0, 0)),                       # fc17 shift
                pl.BlockSpec((NP, NP), lambda l: (0, 0)),                      # fc18 W
                pl.BlockSpec((1, NP), lambda l: (0, 0)),                       # fc18 bias
            ],
            out_specs=pl.BlockSpec((MP, NP), lambda l: (0, 0)),
            scratch_shapes=[pltpu.VMEM((MP, K17P), jnp.float32)],
        ),
        compiler_params=pltpu.CompilerParams(
            dimension_semantics=("arbitrary",),
            vmem_limit_bytes=32 * 1024 * 1024,
        ),
    )(x_pad, packed["whid"], packed["shid"], packed["bhid"],
      packed["w17"], packed["s17"], packed["b17"],
      packed["w18"], packed["b18"])
    return out[:B, :N18]


# ----------------------------------------------------------------------------
# Deterministic synthetic parameters (shapes from __init__) + one-time packing.
# ----------------------------------------------------------------------------
def _init_fc_bn(key, fan_in, fan_out):
    k_w, k_b, k_g, k_bt, k_m, k_v = jax.random.split(key, 6)
    w = jax.random.normal(k_w, (fan_in, fan_out), jnp.float32) * 0.05
    b = jax.random.normal(k_b, (fan_out,), jnp.float32) * 0.05
    gamma = jax.random.uniform(k_g, (fan_out,), jnp.float32, 0.5, 1.5)
    beta = jax.random.normal(k_bt, (fan_out,), jnp.float32) * 0.1
    mean = jax.random.normal(k_m, (fan_out,), jnp.float32) * 0.1
    var = jax.random.uniform(k_v, (fan_out,), jnp.float32, 0.5, 1.5)
    scale = gamma / jnp.sqrt(var + _BN_EPS)          # BN eval-mode scale
    shift = (b - mean) * scale + beta                # Linear bias + BN shift, folded
    return {"w": w, "scale": scale, "shift": shift}


def init_params(key):
    keys = jax.random.split(key, 9)
    params = {}
    dims = [(IN0, H)] + [(H, H)] * (N_HIDDEN - 1)    # fc1..fc4, fc15, fc16
    params["hidden"] = [_init_fc_bn(keys[i], ki, ko) for i, (ki, ko) in enumerate(dims)]
    params["fc17"] = _init_fc_bn(keys[6], K17, N17)  # fc17 + bn17
    k_w, k_b = jax.random.split(keys[7], 2)
    params["fc18"] = {
        "w": jax.random.normal(k_w, (N17, N18), jnp.float32) * 0.05,
        "b": jax.random.normal(k_b, (N18,), jnp.float32) * 0.05,
    }
    return params


def pack_params(params):
    """One-time: pad to TPU tiles, stack the hidden layers, cast weights to bf16."""
    whid = jnp.zeros((N_HIDDEN, H, H), jnp.float32)
    shid = jnp.zeros((N_HIDDEN, 1, H), jnp.float32)
    bhid = jnp.zeros((N_HIDDEN, 1, H), jnp.float32)
    for i, layer in enumerate(params["hidden"]):
        k = layer["w"].shape[0]                      # 318 for layer 0, else 1024
        whid = whid.at[i, :k, :].set(layer["w"])
        shid = shid.at[i, 0, :].set(layer["scale"])
        bhid = bhid.at[i, 0, :].set(layer["shift"])
    w17 = jnp.zeros((K17P, NP), jnp.float32).at[:K17, :N17].set(params["fc17"]["w"])
    s17 = jnp.zeros((1, NP), jnp.float32).at[0, :N17].set(params["fc17"]["scale"])
    b17 = jnp.zeros((1, NP), jnp.float32).at[0, :N17].set(params["fc17"]["shift"])
    w18 = jnp.zeros((NP, NP), jnp.float32).at[:N17, :N18].set(params["fc18"]["w"])
    b18 = jnp.zeros((1, NP), jnp.float32).at[0, :N18].set(params["fc18"]["b"])
    return {
        "whid": whid.astype(jnp.bfloat16),
        "shid": shid,
        "bhid": bhid,
        "w17": w17.astype(jnp.bfloat16),
        "s17": s17,
        "b17": b17,
        "w18": w18.astype(jnp.bfloat16),
        "b18": b18,
    }


# ----------------------------------------------------------------------------
# Pure-JAX reference (mirrors the kernel's bf16 weight streaming).
# ----------------------------------------------------------------------------
def trans_gang_player_reference(params, x):
    def lin(h, w, scale, shift, relu):
        y = jnp.dot(h.astype(jnp.bfloat16), w.astype(jnp.bfloat16),
                    preferred_element_type=jnp.float32)
        y = y * scale + shift
        return jnp.maximum(y, 0.0) if relu else y

    h = x[:, :IN0].astype(jnp.float32)
    for layer in params["hidden"]:
        h = lin(h, layer["w"], layer["scale"], layer["shift"], True)
    h = jnp.concatenate([h, x[:, IN0:].astype(jnp.float32)], axis=1)
    h = lin(h, params["fc17"]["w"], params["fc17"]["scale"],
            params["fc17"]["shift"], True)
    y = jnp.dot(h.astype(jnp.bfloat16), params["fc18"]["w"].astype(jnp.bfloat16),
                preferred_element_type=jnp.float32)
    return y + params["fc18"]["b"]


if __name__ == "__main__":
    key = jax.random.PRNGKey(0)
    k_param, k_x = jax.random.split(key)
    params = init_params(k_param)
    packed = jax.tree_util.tree_map(jax.block_until_ready, pack_params(params))

    batch = 4
    x = jax.random.normal(k_x, (batch, IN0 + EXTRA), jnp.float32)  # [4, 352]

    fwd = jax.jit(trans_gang_player_forward)
    out = jax.block_until_ready(fwd(packed, x))
    assert out.shape == (batch, N18) and out.dtype == jnp.float32

    ref = jax.block_until_ready(trans_gang_player_reference(params, x))
    assert jnp.allclose(out, ref, atol=1e-2, rtol=1e-2), (out, ref)

    print("KERNEL_OK")
</pallas_src>

<mosaic_0001>
module attributes {stable_mosaic.version = 11 : i64} {
  func.func @_fused_net_kernel(%arg0: i32, %arg1: memref<8x1152xf32, #tpu.memory_space<vmem>>, %arg2: memref<1x1024x1024xbf16, #tpu.memory_space<vmem>>, %arg3: memref<1x1x1024xf32, #tpu.memory_space<vmem>>, %arg4: memref<1x1x1024xf32, #tpu.memory_space<vmem>>, %arg5: memref<1152x128xbf16, #tpu.memory_space<vmem>>, %arg6: memref<1x128xf32, #tpu.memory_space<vmem>>, %arg7: memref<1x128xf32, #tpu.memory_space<vmem>>, %arg8: memref<128x128xbf16, #tpu.memory_space<vmem>>, %arg9: memref<1x128xf32, #tpu.memory_space<vmem>>, %arg10: memref<8x128xf32, #tpu.memory_space<vmem>>, %arg11: memref<8x1152xf32, #tpu.memory_space<vmem>>) attributes {dimension_semantics = [#tpu.dimension_semantics<arbitrary>], iteration_bounds = array<i64: 8>, scalar_prefetch = 0 : i64, scratch_operands = 1 : i64, tpu.core_type = #tpu.core_type<tc>, window_params = [{pipeline_mode = #tpu.pipeline_mode<synchronous>, transform_indices = @transform_0, window_bounds = array<i64: 8, 1152>}, {transform_indices = @transform_1, window_bounds = array<i64: 1, 1024, 1024>}, {transform_indices = @transform_2, window_bounds = array<i64: 1, 1, 1024>}, {transform_indices = @transform_3, window_bounds = array<i64: 1, 1, 1024>}, {pipeline_mode = #tpu.pipeline_mode<synchronous>, transform_indices = @transform_4, window_bounds = array<i64: 1152, 128>}, {pipeline_mode = #tpu.pipeline_mode<synchronous>, transform_indices = @transform_5, window_bounds = array<i64: 1, 128>}, {pipeline_mode = #tpu.pipeline_mode<synchronous>, transform_indices = @transform_6, window_bounds = array<i64: 1, 128>}, {pipeline_mode = #tpu.pipeline_mode<synchronous>, transform_indices = @transform_7, window_bounds = array<i64: 128, 128>}, {pipeline_mode = #tpu.pipeline_mode<synchronous>, transform_indices = @transform_8, window_bounds = array<i64: 1, 128>}, {pipeline_mode = #tpu.pipeline_mode<synchronous>, transform_indices = @transform_9, window_bounds = array<i64: 8, 128>}]} {
    %c0_i32 = arith.constant 0 : i32
    %0 = arith.cmpi eq, %arg0, %c0_i32 : i32
    %1 = arith.extui %0 : i1 to i32
    %c0_i32_0 = arith.constant 0 : i32
    %2 = arith.cmpi ne, %1, %c0_i32_0 : i32
    scf.if %2 {
      %c0 = arith.constant 0 : index
      %c0_5 = arith.constant 0 : index
      %12 = vector.load %arg1[%c0, %c0_5] : memref<8x1152xf32, #tpu.memory_space<vmem>>, vector<8x1152xf32>
      %c0_6 = arith.constant 0 : index
      %c0_7 = arith.constant 0 : index
      %13 = vector.load %arg11[%c0_6, %c0_7] : memref<8x1152xf32, #tpu.memory_space<vmem>>, vector<8x1152xf32>
      tpu.vector_store %arg11[%c0_6, %c0_7], %12 {strides = array<i32>} : memref<8x1152xf32, #tpu.memory_space<vmem>>, vector<8x1152xf32>,
    } else {
    }
    %c6_i32 = arith.constant 6 : i32
    %3 = arith.cmpi slt, %arg0, %c6_i32 : i32
    %4 = arith.extui %3 : i1 to i32
    %c0_i32_1 = arith.constant 0 : i32
    %5 = arith.cmpi ne, %4, %c0_i32_1 : i32
    scf.if %5 {
      %c0 = arith.constant 0 : index
      %c0_5 = arith.constant 0 : index
      %12 = vector.load %arg11[%c0, %c0_5] : memref<8x1152xf32, #tpu.memory_space<vmem>>, vector<8x1024xf32>
      %13 = arith.truncf %12 : vector<8x1024xf32> to vector<8x1024xbf16>
      %c0_6 = arith.constant 0 : index
      %c0_7 = arith.constant 0 : index
      %c0_8 = arith.constant 0 : index
      %14 = vector.load %arg2[%c0_6, %c0_7, %c0_8] : memref<1x1024x1024xbf16, #tpu.memory_space<vmem>>, vector<1x1024x1024xbf16>
      %15 = vector.shape_cast %14 : vector<1x1024x1024xbf16> to vector<1024x1024xbf16>
      %cst = arith.constant dense<0.000000e+00> : vector<8x1024xf32>
      %16 = tpu.matmul %13, %15, %cst {dimension_numbers = #tpu.dot_dimension_numbers<[1], [0], [0], [1], [0, 0, 1, 1], [], []>} : vector<8x1024xbf16>, vector<1024x1024xbf16>, vector<8x1024xf32> -> vector<8x1024xf32>
      %c0_9 = arith.constant 0 : index
      %c0_10 = arith.constant 0 : index
      %c0_11 = arith.constant 0 : index
      %17 = vector.load %arg3[%c0_9, %c0_10, %c0_11] : memref<1x1x1024xf32, #tpu.memory_space<vmem>>, vector<1x1x1024xf32>
      %18 = vector.shape_cast %17 : vector<1x1x1024xf32> to vector<1x1024xf32>
      %19 = vector.broadcast %18 : vector<1x1024xf32> to vector<8x1024xf32>
      %20 = arith.mulf %16, %19 : vector<8x1024xf32>
      %c0_12 = arith.constant 0 : index
      %c0_13 = arith.constant 0 : index
      %c0_14 = arith.constant 0 : index
      %21 = vector.load %arg4[%c0_12, %c0_13, %c0_14] : memref<1x1x1024xf32, #tpu.memory_space<vmem>>, vector<1x1x1024xf32>
      %22 = vector.shape_cast %21 : vector<1x1x1024xf32> to vector<1x1024xf32>
      %23 = vector.broadcast %22 : vector<1x1024xf32> to vector<8x1024xf32>
      %24 = arith.addf %20, %23 : vector<8x1024xf32>
      %cst_15 = arith.constant 0.000000e+00 : f32
      %25 = vector.broadcast %cst_15 : f32 to vector<8x1024xf32>
      %26 = arith.maximumf %24, %25 : vector<8x1024xf32>
      %c0_16 = arith.constant 0 : index
      %c0_17 = arith.constant 0 : index
      %27 = vector.load %arg11[%c0_16, %c0_17] : memref<8x1152xf32, #tpu.memory_space<vmem>>, vector<8x1024xf32>
      tpu.vector_store %arg11[%c0_16, %c0_17], %26 {strides = array<i32>} : memref<8x1152xf32, #tpu.memory_space<vmem>>, vector<8x1024xf32>,
    } else {
    }
    %c6_i32_2 = arith.constant 6 : i32
    %6 = arith.cmpi eq, %arg0, %c6_i32_2 : i32
    %7 = arith.extui %6 : i1 to i32
    %c0_i32_3 = arith.constant 0 : i32
    %8 = arith.cmpi ne, %7, %c0_i32_3 : i32
    scf.if %8 {
      %c0 = arith.constant 0 : index
      %c0_5 = arith.constant 0 : index
      %12 = vector.load %arg11[%c0, %c0_5] : memref<8x1152xf32, #tpu.memory_space<vmem>>, vector<8x1152xf32>
      %13 = arith.truncf %12 : vector<8x1152xf32> to vector<8x1152xbf16>
      %c0_6 = arith.constant 0 : index
      %c0_7 = arith.constant 0 : index
      %14 = vector.load %arg5[%c0_6, %c0_7] : memref<1152x128xbf16, #tpu.memory_space<vmem>>, vector<1152x128xbf16>
      %cst = arith.constant dense<0.000000e+00> : vector<8x128xf32>
      %15 = tpu.matmul %13, %14, %cst {dimension_numbers = #tpu.dot_dimension_numbers<[1], [0], [0], [1], [0, 0, 1, 1], [], []>} : vector<8x1152xbf16>, vector<1152x128xbf16>, vector<8x128xf32> -> vector<8x128xf32>
      %c0_8 = arith.constant 0 : index
      %c0_9 = arith.constant 0 : index
      %16 = vector.load %arg6[%c0_8, %c0_9] : memref<1x128xf32, #tpu.memory_space<vmem>>, vector<1x128xf32>
      %17 = vector.broadcast %16 : vector<1x128xf32> to vector<8x128xf32>
      %18 = arith.mulf %15, %17 : vector<8x128xf32>
      %c0_10 = arith.constant 0 : index
      %c0_11 = arith.constant 0 : index
      %19 = vector.load %arg7[%c0_10, %c0_11] : memref<1x128xf32, #tpu.memory_space<vmem>>, vector<1x128xf32>
      %20 = vector.broadcast %19 : vector<1x128xf32> to vector<8x128xf32>
      %21 = arith.addf %18, %20 : vector<8x128xf32>
      %cst_12 = arith.constant 0.000000e+00 : f32
      %22 = vector.broadcast %cst_12 : f32 to vector<8x128xf32>
      %23 = arith.maximumf %21, %22 : vector<8x128xf32>
      %c0_13 = arith.constant 0 : index
      %c0_14 = arith.constant 0 : index
      %24 = vector.load %arg11[%c0_13, %c0_14] : memref<8x1152xf32, #tpu.memory_space<vmem>>, vector<8x128xf32>
      tpu.vector_store %arg11[%c0_13, %c0_14], %23 {strides = array<i32>} : memref<8x1152xf32, #tpu.memory_space<vmem>>, vector<8x128xf32>,
    } else {
    }
    %c7_i32 = arith.constant 7 : i32
    %9 = arith.cmpi eq, %arg0, %c7_i32 : i32
    %10 = arith.extui %9 : i1 to i32
    %c0_i32_4 = arith.constant 0 : i32
    %11 = arith.cmpi ne, %10, %c0_i32_4 : i32
    scf.if %11 {
      %c0 = arith.constant 0 : index
      %c0_5 = arith.constant 0 : index
      %12 = vector.load %arg11[%c0, %c0_5] : memref<8x1152xf32, #tpu.memory_space<vmem>>, vector<8x128xf32>
      %13 = arith.truncf %12 : vector<8x128xf32> to vector<8x128xbf16>
      %c0_6 = arith.constant 0 : index
      %c0_7 = arith.constant 0 : index
      %14 = vector.load %arg8[%c0_6, %c0_7] : memref<128x128xbf16, #tpu.memory_space<vmem>>, vector<128x128xbf16>
      %cst = arith.constant dense<0.000000e+00> : vector<8x128xf32>
      %15 = tpu.matmul %13, %14, %cst {dimension_numbers = #tpu.dot_dimension_numbers<[1], [0], [0], [1], [0, 0, 1, 1], [], []>} : vector<8x128xbf16>, vector<128x128xbf16>, vector<8x128xf32> -> vector<8x128xf32>
      %c0_8 = arith.constant 0 : index
      %c0_9 = arith.constant 0 : index
      %16 = vector.load %arg9[%c0_8, %c0_9] : memref<1x128xf32, #tpu.memory_space<vmem>>, vector<1x128xf32>
      %17 = vector.broadcast %16 : vector<1x128xf32> to vector<8x128xf32>
      %18 = arith.addf %15, %17 : vector<8x128xf32>
      %c0_10 = arith.constant 0 : index
      %c0_11 = arith.constant 0 : index
      %19 = vector.load %arg10[%c0_10, %c0_11] : memref<8x128xf32, #tpu.memory_space<vmem>>, vector<8x128xf32>
      tpu.vector_store %arg10[%c0_10, %c0_11], %18 {strides = array<i32>} : memref<8x128xf32, #tpu.memory_space<vmem>>, vector<8x128xf32>,
    } else {
    }
    return
  }
  func.func @transform_0(%arg0: i32) -> (i32, i32) {
    %c0_i32 = arith.constant 0 : i32
    %c0_i32_0 = arith.constant 0 : i32
    %c0_i32_1 = arith.constant 0 : i32
    return %c0_i32, %c0_i32_0 : i32, i32
  }
  func.func @transform_1(%arg0: i32) -> (i32, i32, i32) {
    %c5_i32 = arith.constant 5 : i32
    %0 = arith.minsi %arg0, %c5_i32 : i32
    %c0_i32 = arith.constant 0 : i32
    %c0_i32_0 = arith.constant 0 : i32
    %c0_i32_1 = arith.constant 0 : i32
    return %0, %c0_i32, %c0_i32_0 : i32, i32, i32
  }
  func.func @transform_2(%arg0: i32) -> (i32, i32, i32) {
    %c5_i32 = arith.constant 5 : i32
    %0 = arith.minsi %arg0, %c5_i32 : i32
    %c0_i32 = arith.constant 0 : i32
    %c0_i32_0 = arith.constant 0 : i32
    %c0_i32_1 = arith.constant 0 : i32
    return %0, %c0_i32, %c0_i32_0 : i32, i32, i32
  }
  func.func @transform_3(%arg0: i32) -> (i32, i32, i32) {
    %c5_i32 = arith.constant 5 : i32
    %0 = arith.minsi %arg0, %c5_i32 : i32
    %c0_i32 = arith.constant 0 : i32
    %c0_i32_0 = arith.constant 0 : i32
    %c0_i32_1 = arith.constant 0 : i32
    return %0, %c0_i32, %c0_i32_0 : i32, i32, i32
  }
  func.func @transform_4(%arg0: i32) -> (i32, i32) {
    %c0_i32 = arith.constant 0 : i32
    %c0_i32_0 = arith.constant 0 : i32
    %c0_i32_1 = arith.constant 0 : i32
    return %c0_i32, %c0_i32_0 : i32, i32
  }
  func.func @transform_5(%arg0: i32) -> (i32, i32) {
    %c0_i32 = arith.constant 0 : i32
    %c0_i32_0 = arith.constant 0 : i32
    %c0_i32_1 = arith.constant 0 : i32
    return %c0_i32, %c0_i32_0 : i32, i32
  }
  func.func @transform_6(%arg0: i32) -> (i32, i32) {
    %c0_i32 = arith.constant 0 : i32
    %c0_i32_0 = arith.constant 0 : i32
    %c0_i32_1 = arith.constant 0 : i32
    return %c0_i32, %c0_i32_0 : i32, i32
  }
  func.func @transform_7(%arg0: i32) -> (i32, i32) {
    %c0_i32 = arith.constant 0 : i32
    %c0_i32_0 = arith.constant 0 : i32
    %c0_i32_1 = arith.constant 0 : i32
    return %c0_i32, %c0_i32_0 : i32, i32
  }
  func.func @transform_8(%arg0: i32) -> (i32, i32) {
    %c0_i32 = arith.constant 0 : i32
    %c0_i32_0 = arith.constant 0 : i32
    %c0_i32_1 = arith.constant 0 : i32
    return %c0_i32, %c0_i32_0 : i32, i32
  }
  func.func @transform_9(%arg0: i32) -> (i32, i32) {
    %c0_i32 = arith.constant 0 : i32
    %c0_i32_0 = arith.constant 0 : i32
    %c0_i32_1 = arith.constant 0 : i32
    return %c0_i32, %c0_i32_0 : i32, i32
  }
}

</mosaic_0001>

<bundles_post_ra>
// kernel: trans_gang_player_forward.1
= control target key start
LH: loop header
LB: loop body
LE: loop exit
PB: predicated region body
PF: predicated region fallthrough
CT: control target
= control target key end

     0   :  { %s7658_s0 = inlined_call_operand.vmem [shape: f32[8,1152], index: 0, kind: input, shape index: {}]   ;;  %s7659_s1 = inlined_call_operand.hbm [shape: bf16[6,1024,1024], index: 1, kind: input, shape index: {}]   ;;  %s7660_s2 = inlined_call_operand.hbm [shape: f32[6,1,1024], index: 2, kind: input, shape index: {}]   ;;  %s7661_s3 = inlined_call_operand.hbm [shape: f32[6,1,1024], index: 3, kind: input, shape index: {}]   ;;  %s7662_s4 = inlined_call_operand.hbm [shape: bf16[1152,128], index: 4, kind: input, shape index: {}]   ;;  %s7663_s5 = inlined_call_operand.hbm [shape: f32[1,128], index: 5, kind: input, shape index: {}]   ;;  %s7664_s6 = inlined_call_operand.hbm [shape: f32[1,128], index: 6, kind: input, shape index: {}]   ;;  %s7665_s7 = inlined_call_operand.hbm [shape: bf16[128,128], index: 7, kind: input, shape index: {}]   ;;  %s7666_s8 = inlined_call_operand.hbm [shape: f32[1,128], index: 8, kind: input, shape index: {}]   ;;  %s7667_s9 = inlined_call_operand.vmem [shape: f32[8,128], index: 9, kind: output, shape index: {}]  }
   0x1   :  { %7686 = sst [smem:[#allocation24_spill]] %s7662_s4 }
   0x2   :  { %7687 = sst [smem:[#allocation25_spill]] %s7664_s6 }
   0x3   :  { %14 = vsyncpa [#allocation4], 0 }
   0x4   :  { %16 = vsyncpa [#allocation4 + $0x1], 0 }
   0x5   :  { %17 = vsyncpa [#allocation6], 0 }
   0x6   :  { %19 = vsyncpa [#allocation6 + $0x1], 0 }
   0x7   :  { %20 = vsyncpa [#allocation9], 0 }
   0x8   :  { %21 = vsyncpa [#allocation12], 0 }
   0x9   :  { %22 = vsyncpa [#allocation15], 0  ;;  %s6751_s30 = smov 0   ;;  %s6753_s10 = smov 0  }
   0xa   :  { %s6755_s11 = smov 0   ;;  %s6757_s12 = smov 0  }
   0xb LB: > { %7688 = sst [smem:[#allocation21_spill]] %s6679_s11  ;;  %s6685_s13 = smov [#allocation8]   ;;  %s6683_s12 = sphi %s6757_s12, %s7716_s12   ;;  %s6679_s11 = sphi %s6755_s11, %s7718_s11   ;;  %s6675_s10 = sphi %s6753_s10, %s7720_s10   ;;  %s6671_s30 = sphi %s6751_s30, %s7719_s30  }
   0xc   : > { %s285_s14 = sshll.u32 %s6685_s13, 4  ;;  %s6772_s15 = sadd.s32 4294967295, %s6683_s12   ;;  %s286_s14 = int_to_ptr.vmem [resolvable:$true] %s285_s14 }
   0xd   : > { %p5454_p0 = scmp.ge.s32.totalorder %s6683_s12, 1  ;;  %p7672_p1 = scmp.eq.s32.totalorder %s6772_s15, 0 }
   0xe   : > { %p270_p2 = scmp.lt.s32.totalorder %s6683_s12, 9  ;;  %s6686_s17 = smov [#allocation11]  }
   0xf   : > { %s310_s18 = sshll.u32 %s6686_s17, 4  ;;  %s6430_s21 = scalar_lea.vmem %s286_s14, 9216  ;;  %s311_s18 = int_to_ptr.vmem [resolvable:$true] %s310_s18 }
  0x10   : > { %p6778_p4 = pnand %p5454_p0, %p270_p2  ;;  %p6431_p8 = scmp.ne.s32.totalorder %s286_s14, %s6430_s21 }
  0x11   : > { %p6438_p11 = scmp.lt.s32.totalorder %s286_s14, %s286_s14  ;;  %p6439_p12 = scmp.lt.s32.totalorder %s6430_s21, %s6430_s21 }
  0x12   : > { %s7689_s16 = scalar_select %p6778_p4, 1, 0 }
  0x13   : > { %p6255_p5 = pneg %p6778_p4  ;;  %p6440_p13 = por %p6439_p12, %p6438_p11 }
  0x15   : > { %p6786_p6 = pnand %p6255_p5, %p7672_p1 }
  0x17   : > { %s7690_s19 = scalar_select %p6786_p6, 1, 0 }
  0x18   : > { %p6792_p7 = pneg %p6786_p6 }
  0x1a   : > { %s7691_s20 = scalar_select %p6792_p7, 1, 0 }
  0x1b   : > { %p6433_p9 = pnand %p6431_p8, %p6792_p7 }
  0x1d   : > { %p6434_p10 = pneg %p6433_p9 }
  0x1f   : > { %p6441_p0 = pnand %p6440_p13, %p6434_p10 }
  0x21   : > { %6444 = shalt.err (!%p6441_p0)
}
  0x22   : > { %s7668_s22 = smov 64   ;;  %s7669_s23 = smov 4  }
  0x23   : > { %s7692_s4 = sld [smem:[#allocation24_spill]]  ;;  %s6456_s26 = scalar_lea.vmem %s311_s18, 16 }
  0x24   : > { %p6457_p2 = scmp.ne.s32.totalorder %s311_s18, %s6456_s26  ;;  %s6463_s27 = scalar_lea.vmem %s311_s18, 32 }
  0x25   : > { %p6464_p9 = scmp.lt.s32.totalorder %s311_s18, %s311_s18  ;;  %p6465_p10 = scmp.lt.s32.totalorder %s6463_s27, %s6456_s26 }
  0x26   : > { %p6459_p5 = pnand %p6457_p2, %p6792_p7 }
  0x27   : > { %p6466_p11 = por %p6465_p10, %p6464_p9 }
  0x28   : > { %p6460_p8 = pneg %p6459_p5 }
  0x29   : > { %6258 = dma.hbm_to_vmem [thread:$0]  (!%p6786_p6), %s7692_s4, 9216, %s286_s14, [#allocation9], %s7668_s22, %s7668_s22, %s7669_s23  }
  0x2a   : > { %p6467_p12 = pnand %p6466_p11, %p6460_p8 }
  0x2c   : > { %6470 = shalt.err (!%p6467_p12)
}
  0x2d   : > { %s7693_s6 = sld [smem:[#allocation25_spill]]  ;;  %s6814_s13 = sadd.s32 1, %s6683_s12  }
  0x2e   : > { %7694 = sst [smem:[#allocation22_spill]] %s6814_s13  ;;  %p53_p13 = scmp.lt.s32.totalorder %s6683_s12, 5 }
  0x2f   : > { %p55_p0 = scmp.lt.s32.totalorder %s6814_s13, 5  ;;  %s60_s14 = sadd.s32 1, %s6679_s11 }
  0x30   : > { %s6820_s17 = scalar_select %p53_p13, %s6683_s12, 5 }
  0x31   : > { %s56_s21 = scalar_select %p55_p0, %s6814_s13, 5 }
  0x32   : > { %p67_p2 = scmp.ne.s32.totalorder %s6679_s11, %s6675_s10  ;;  %p68_p5 = scmp.eq.s32.totalorder %s6683_s12, 0 }
  0x33   : > { %6264 = dma.hbm_to_vmem [thread:$0]  (!%p6786_p6), %s7693_s6, 16, %s311_s18, [#allocation12]  }
  0x34   : > { %s57_s24 = ssub.s32 %s6820_s17, %s56_s21  ;;  %p73_p8 = scmp.ne.s32.totalorder %s6675_s10, %s6671_s30 }
  0x35   : > { %p58_p9 = scmp.eq.s32.totalorder %s57_s24, 0  ;;  %p69_p10 = por %p68_p5, %p67_p2 }
  0x36   : > { %p6831_p11 = por %p7672_p1, %p73_p8  ;;  %p6286_p12 = scmp.lt.s32.totalorder %s6683_s12, 8 }
  0x37   : > { %s6837_s25 = scalar_select %p58_p9, %s6679_s11, %s60_s14  }
  0x38   : > { %s7695_s18 = scalar_select %p6831_p11, 1, 0 }
  0x39   : > { %7696 = sst [smem:[#allocation23_spill]] %s6837_s25  ;;  %s6840_s26 = sand.u32 1, %s6679_s11  }
  0x3a   : > { %p6842_p13 = pnand %p6286_p12, %p69_p10  ;;  %s368_s30 = sand.u32 1, %s6683_s12  }
  0x3b   : > { %s7671_s28 = sshll.u32 %s6840_s26, 3  ;;  %s7670_s29 = sshll.u32 %s6820_s17, 7 }
  0x3c   : > { %s7697_s27 = scalar_select %p6842_p13, 1, 0 }
  0x3d   : > { %s6854_s22 = scalar_lea.hbm %s7660_s2, %s7670_s29  ;;  %s372_s14 = scalar_lea.vmem [#allocation5], %s7671_s28 }
  0x3e   : > { %s382_s23 = sshll.u32 %s372_s14, 4  ;;  %s6858_s4 = scalar_lea.sflag [#allocation6], %s368_s30  ;;  %s383_s23 = int_to_ptr.vmem [resolvable:$true] %s382_s23 }
  0x3f   : > { %s6471_s6 = scalar_lea.hbm %s6854_s22, 128  ;;  %p6864_p2 = pneg %p6842_p13 }
  0x40   : > { %p6472_p0 = scmp.ne.s32.totalorder %s6854_s22, %s6471_s6  ;;  %s6476_s29 = scalar_lea.hbm %s7660_s2, 768 }
  0x41   : > { %s7698_s12 = scalar_select %p6864_p2, 1, 0 }
  0x42   : > { %p6474_p5 = pnand %p6864_p2, %p6472_p0  ;;  %p6477_p9 = scmp.lt.s32.totalorder %s6854_s22, %s7660_s2 }
  0x43   : > { %p6478_p10 = scmp.lt.s32.totalorder %s6476_s29, %s6471_s6 }
  0x44   : > { %p6475_p8 = pneg %p6474_p5 }
  0x45   : > { %p6479_p12 = por %p6478_p10, %p6477_p9 }
  0x47   : > { %p6480_p3 = pnand %p6479_p12, %p6475_p8 }
  0x49   : > { %6483 = shalt.err (!%p6480_p3)
}
  0x4a   : > { %s6484_s30 = scalar_lea.vmem %s383_s23, 128  ;;  %s6689_s25 = smov [#allocation5]  }
  0x4b   : > { %p6485_p1 = scmp.ne.s32.totalorder %s383_s23, %s6484_s30  ;;  %s6489_s11 = sshll.u32 %s6689_s25, 4  ;;  %s6490_s11 = int_to_ptr.vmem [resolvable:$false] %s6489_s11 }
  0x4c   : > { %s6491_s13 = scalar_lea.vmem %s6490_s11, 256  ;;  %p6492_p0 = scmp.lt.s32.totalorder %s383_s23, %s6490_s11 }
  0x4d   : > { %p6487_p11 = pnand %p6485_p1, %p6864_p2  ;;  %p6493_p5 = scmp.lt.s32.totalorder %s6491_s13, %s6484_s30 }
  0x4f   : > { %p6488_p4 = pneg %p6487_p11  ;;  %p6494_p6 = por %p6493_p5, %p6492_p0 }
  0x51   : > { %p6495_p7 = pnand %p6494_p6, %p6488_p4 }
  0x53   : > { %6498 = shalt.err (!%p6495_p7)
}
  0x54   : > { %6277 = dma.hbm_to_vmem [thread:$0]  (!%p6842_p13), %s6854_s22, 128, %s383_s23, %s6858_s4  }
  0x55   : > { %s7699_s6 = sshll.u32 %s6820_s17, 7  ;;  %s6690_s25 = smov [#allocation10]  }
  0x56   : > { %s6888_s21 = scalar_lea.hbm %s7661_s3, %s7699_s6  ;;  %s299_s24 = sshll.u32 %s6690_s25, 4  ;;  %s300_s24 = int_to_ptr.vmem [resolvable:$true] %s299_s24 }
  0x57   : > { %s6691_s11 = smov [#allocation13]   ;;  %s6510_s14 = scalar_lea.vmem %s300_s24, 16 }
  0x58   : > { %s320_s13 = sshll.u32 %s6691_s11, 4  ;;  %p6511_p1 = scmp.ne.s32.totalorder %s300_s24, %s6510_s14  ;;  %s321_s13 = int_to_ptr.vmem [resolvable:$true] %s320_s13 }
  0x59   : > { %p7700_p3 = scmp.ne.s32.totalorder %s7691_s20, 0  ;;  %s6517_s30 = scalar_lea.vmem %s300_s24, 32 }
  0x5a   : > { %p6518_p7 = scmp.lt.s32.totalorder %s300_s24, %s300_s24  ;;  %p6519_p11 = scmp.lt.s32.totalorder %s6517_s30, %s6510_s14 }
  0x5b   : > { %p6513_p4 = pnand %p6511_p1, %p7700_p3 }
  0x5c   : > { %p6520_p8 = por %p6519_p11, %p6518_p7 }
  0x5d   : > { %p6514_p6 = pneg %p6513_p4 }
  0x5f   : > { %p6521_p9 = pnand %p6520_p8, %p6514_p6 }
  0x61   : > { %6524 = shalt.err (!%p6521_p9)
}
  0x62   : > { %p7701_p10 = scmp.ne.s32.totalorder %s7690_s19, 0  ;;  %s6536_s6 = scalar_lea.vmem %s321_s13, 1024 }
  0x63   : > { %p6537_p12 = scmp.ne.s32.totalorder %s321_s13, %s6536_s6  ;;  %p6544_p1 = scmp.lt.s32.totalorder %s321_s13, %s321_s13 }
  0x64   : > { %6261 = dma.hbm_to_vmem [thread:$0]  (!%p7701_p10), %s7663_s5, 16, %s300_s24, [#allocation9]  }
  0x65   : > { %p6539_p0 = pnand %p6537_p12, %p7700_p3  ;;  %p6545_p4 = scmp.lt.s32.totalorder %s6536_s6, %s6536_s6 }
  0x67   : > { %p6540_p5 = pneg %p6539_p0  ;;  %p6546_p13 = por %p6545_p4, %p6544_p1 }
  0x69   : > { %p6547_p2 = pnand %p6546_p13, %p6540_p5 }
  0x6b   : > { %6550 = shalt.err (!%p6547_p2)
}
  0x6c   : > { %s7702_s28 = smov 4   ;;  %s7703_s29 = smov 64  }
  0x6d   : > { %6267 = dma.hbm_to_vmem [thread:$0]  (!%p7701_p10), %s7665_s7, 1024, %s321_s13, [#allocation12], %s7703_s29, %s7703_s29, %s7702_s28  }
  0x6e   : > { %s6692_s24 = smov [#allocation14]   ;;  %s5461_s30 = sshll.u32 %s6840_s26, 12 }
  0x6f   : > { %s334_s14 = sshll.u32 %s6692_s24, 4  ;;  %s335_s14 = int_to_ptr.vmem [resolvable:$true] %s334_s14 }
  0x70   : > { %s6562_s22 = scalar_lea.vmem %s335_s14, 16  ;;  %s6569_s23 = scalar_lea.vmem %s335_s14, 32 }
  0x71   : > { %p6563_p6 = scmp.ne.s32.totalorder %s335_s14, %s6562_s22  ;;  %p6570_p7 = scmp.lt.s32.totalorder %s335_s14, %s335_s14 }
  0x72   : > { %p6571_p11 = scmp.lt.s32.totalorder %s6569_s23, %s6562_s22 }
  0x73   : > { %p6565_p13 = pnand %p6563_p6, %p7700_p3 }
  0x74   : > { %p6572_p8 = por %p6571_p11, %p6570_p7 }
  0x75   : > { %p6566_p2 = pneg %p6565_p13 }
  0x77   : > { %p6573_p9 = pnand %p6572_p8, %p6566_p2 }
  0x79   : > { %6576 = shalt.err (!%p6573_p9)
}
  0x7a   : > { %6270 = dma.hbm_to_vmem [thread:$0]  (!%p7701_p10), %s7666_s8, 16, %s335_s14, [#allocation15]  }
  0x7b   : > { %s6080_s13 = sshll.u32 %s6820_s17, 16  ;;  %s349_s11 = scalar_lea.vmem [#allocation3], %s5461_s30 }
  0x7c   : > { %s6919_s29 = scalar_lea.hbm %s7659_s1, %s6080_s13  ;;  %s358_s24 = sshll.u32 %s349_s11, 4  ;;  %s6921_s24 = int_to_ptr.vmem [resolvable:$true] %s358_s24 }
  0x7d   : > { %s7704_s19 = sshll.u32 %s6840_s26, 3  ;;  %s346_s6 = scalar_lea.sflag [#allocation4], %s6840_s26 }
  0x7e   : > { %s6925_s22 = scalar_lea.vmem [#allocation7], %s7704_s19  ;;  %s6577_s14 = scalar_lea.hbm %s6919_s29, 65536 }
  0x7f   : > { %s403_s23 = sshll.u32 %s6925_s22, 4  ;;  %p6578_p3 = scmp.ne.s32.totalorder %s6919_s29, %s6577_s14  ;;  %s404_s23 = int_to_ptr.vmem [resolvable:$true] %s403_s23 }
  0x80   : > { %p7705_p10 = scmp.ne.s32.totalorder %s7698_s12, 0  ;;  %s6582_s13 = scalar_lea.hbm %s7659_s1, 393216 }
  0x81   : > { %p6583_p5 = scmp.lt.s32.totalorder %s6919_s29, %s7659_s1  ;;  %p6584_p1 = scmp.lt.s32.totalorder %s6582_s13, %s6577_s14 }
  0x82   : > { %p6580_p12 = pnand %p6578_p3, %p7705_p10 }
  0x83   : > { %p6585_p4 = por %p6584_p1, %p6583_p5 }
  0x84   : > { %p6581_p0 = pneg %p6580_p12 }
  0x86   : > { %p6586_p6 = pnand %p6585_p4, %p6581_p0 }
  0x88   : > { %6589 = shalt.err (!%p6586_p6)
}
  0x89   : > { %s6590_s28 = scalar_lea.vmem %s6921_s24, 65536  ;;  %s6693_s11 = smov [#allocation3]  }
  0x8a   : > { %p6591_p13 = scmp.ne.s32.totalorder %s6921_s24, %s6590_s28  ;;  %s6595_s19 = sshll.u32 %s6693_s11, 4  ;;  %s6596_s19 = int_to_ptr.vmem [resolvable:$false] %s6595_s19 }
  0x8b   : > { %s6597_s17 = scalar_lea.vmem %s6596_s19, 131072  ;;  %p6598_p11 = scmp.lt.s32.totalorder %s6921_s24, %s6596_s19 }
  0x8c   : > { %p6593_p2 = pnand %p6591_p13, %p7705_p10  ;;  %p6599_p8 = scmp.lt.s32.totalorder %s6597_s17, %s6590_s28 }
  0x8e   : > { %p6594_p7 = pneg %p6593_p2  ;;  %p6600_p9 = por %p6599_p8, %p6598_p11 }
  0x90   : > { %p6601_p3 = pnand %p6600_p9, %p6594_p7 }
  0x92   : > { %6604 = shalt.err (!%p6601_p3)
}
  0x93   : > { %s6694_s14 = smov 512   ;;  %s6695_s25 = smov 32  }
  0x94   : > { %p7706_p12 = scmp.ne.s32.totalorder %s7697_s27, 0  ;;  %s6605_s13 = scalar_lea.hbm %s6888_s21, 128 }
  0x95   : > { %p6606_p0 = scmp.ne.s32.totalorder %s6888_s21, %s6605_s13  ;;  %s6610_s28 = scalar_lea.hbm %s7661_s3, 768 }
  0x96   : > { %6274 = dma.hbm_to_vmem [thread:$0]  (!%p7706_p12), %s6919_s29, 65536, %s6921_s24, %s346_s6, %s6694_s14, %s6694_s14, %s6695_s25  }
  0x97   : > { %p6608_p5 = pnand %p6606_p0, %p7705_p10  ;;  %p6611_p4 = scmp.lt.s32.totalorder %s6888_s21, %s7661_s3 }
  0x98   : > { %p6612_p6 = scmp.lt.s32.totalorder %s6610_s28, %s6605_s13 }
  0x99   : > { %p6609_p1 = pneg %p6608_p5 }
  0x9a   : > { %p6613_p13 = por %p6612_p6, %p6611_p4 }
  0x9c   : > { %p6614_p2 = pnand %p6613_p13, %p6609_p1 }
  0x9e   : > { %6617 = shalt.err (!%p6614_p2)
}
  0x9f   : > { %s6618_s26 = scalar_lea.vmem %s404_s23, 128  ;;  %s6696_s29 = smov [#allocation7]  }
  0xa0   : > { %p6619_p7 = scmp.ne.s32.totalorder %s404_s23, %s6618_s26  ;;  %s6623_s24 = sshll.u32 %s6696_s29, 4  ;;  %s6624_s24 = int_to_ptr.vmem [resolvable:$false] %s6623_s24 }
  0xa1   : > { %s6625_s22 = scalar_lea.vmem %s6624_s24, 256  ;;  %p6626_p9 = scmp.lt.s32.totalorder %s404_s23, %s6624_s24 }
  0xa2   : > { %p6621_p11 = pnand %p6619_p7, %p7705_p10  ;;  %p6627_p3 = scmp.lt.s32.totalorder %s6625_s22, %s6618_s26 }
  0xa4   : > { %p6622_p8 = pneg %p6621_p11  ;;  %p6628_p0 = por %p6627_p3, %p6626_p9 }
  0xa6   : > { %p6629_p5 = pnand %p6628_p0, %p6622_p8 }
  0xa8   : > { %6632 = shalt.err (!%p6629_p5)
}
  0xa9   : > { %6280 = dma.hbm_to_vmem [thread:$0]  (!%p7706_p12), %s6888_s21, 128, %s404_s23, %s6858_s4  }
  0xaa   : > { %p7707_p1 = scmp.ne.s32.totalorder %s7689_s16, 0 }
  0xab   : > { %s414_s12 = sand.u32 (!%p7707_p1), 1, %s6675_s10   ;;  %p7708_p10 = scmp.ne.s32.totalorder (!%p7707_p1), %s7695_s18, 0 }
  0xac   : > { %412 = sbr.rel (%p7707_p1) target bundleno = 1480 (0x5c8), region = 56  ;;  %s5471_s6 = sshll.u32 (!%p7707_p1), %s414_s12, 12 }
  0xad   : > { %s415_s17 = scalar_lea.sflag (!%p7707_p1), [#allocation4], %s414_s12  ;;  %s6973_s14 = scalar_lea.vmem (!%p7707_p1), [#allocation3], %s5471_s6 }
  0xb1   : > { %6650 = dma.done.wait (%p7708_p10), %s415_s17, 65536  }
  0xb2   : > { %6652 = vsyncadd (%p7708_p10), %s415_s17, 4294901760  ;;  %s423_s27 = sand.u32 1, %s6772_s15   ;;  %s5472_s25 = sshll.u32 %s414_s12, 3 }
  0xb3   : > { %s424_s4 = scalar_lea.sflag [#allocation6], %s423_s27  ;;  %s6980_s21 = scalar_lea.vmem [#allocation5], %s5472_s25 }
  0xb4   : > { %6654 = dma.done.wait (%p7708_p10), %s424_s4, 256  }
  0xb5   : > { %6656 = vsyncadd (%p7708_p10), %s424_s4, 4294967040  ;;  %s6986_s16 = scalar_lea.vmem [#allocation7], %s5472_s25  ;;  %p7709_p12 = scmp.eq.s32.totalorder %s6772_s15, 0 }
  0xb7   : > { %6658 = dma.done.wait (%p7709_p12), [#allocation9], 9232   ;;  %p7710_p4 = pmov %p7709_p12 }
  0xb9   : > { %6660 = vsyncadd (%p7710_p4), [#allocation9], 4294958064  ;;  %p7711_p6 = pmov %p7710_p4 }
  0xba   : > { %p7712_p13 = pmov %p7710_p4 }
  0xbb   : > { %6662 = dma.done.wait (%p7711_p6), [#allocation12], 1040  }
  0xbc   : > { %6664 = vsyncadd (%p7712_p13), [#allocation12], 4294966256  ;;  %p7713_p2 = pmov %p7710_p4 }
  0xbe   : > { %6666 = dma.done.wait (%p7713_p2), [#allocation15], 16   ;;  %p7714_p7 = pmov %p7713_p2 }
  0xbf   : > { %p7715_p11 = scmp.ne.s32.totalorder %s6772_s15, 0 }
  0xc0   : > { %6668 = vsyncadd (%p7714_p7), [#allocation15], 4294967280 }
  0xc1   : > { %506 = sbr.rel (%p7715_p11) target bundleno = 204 (0xcc), region = 92 }
  0xc6   : > { %v507_v0 = vld [vmem:[%s7658_s0] sm:$0xff]  ;;  %v508_v1 = vld [vmem:[%s7658_s0 + $0x8] sm:$0xff]  ;;  %v509_v2 = vld [vmem:[%s7658_s0 + $0x10] sm:$0xff] }
  0xc7   : > { %516 = vst [vmem:[#allocation2 + $0x30] sm:$0xff] %v507_v0  ;;  %517 = vst [vmem:[#allocation2] sm:$0xff] %v508_v1  ;;  %v510_v3 = vld [vmem:[%s7658_s0 + $0x18] sm:$0xff]  ;;  %v511_v4 = vld [vmem:[%s7658_s0 + $0x20] sm:$0xff] }
  0xc8   : > { %518 = vst [vmem:[#allocation2 + $0x18] sm:$0xff] %v509_v2  ;;  %v512_v5 = vld [vmem:[%s7658_s0 + $0x28] sm:$0xff]  ;;  %519 = vst [vmem:[#allocation2 + $0x10] sm:$0xff] %v510_v3  ;;  %v513_v6 = vld [vmem:[%s7658_s0 + $0x30] sm:$0xff] }
  0xc9   : > { %520 = vst [vmem:[#allocation2 + $0x20] sm:$0xff] %v511_v4  ;;  %521 = vst [vmem:[#allocation2 + $0x28] sm:$0xff] %v512_v5  ;;  %v514_v7 = vld [vmem:[%s7658_s0 + $0x38] sm:$0xff]  ;;  %v515_v8 = vld [vmem:[%s7658_s0 + $0x40] sm:$0xff] }
  0xca   : > { %522 = vst [vmem:[#allocation2 + $0x40] sm:$0xff] %v513_v6  ;;  %523 = vst [vmem:[#allocation2 + $0x38] sm:$0xff] %v514_v7 }
  0xcb   : > { %524 = vst [vmem:[#allocation2 + $0x8] sm:$0xff] %v515_v8 }
  0xcc PF: > { %p5480_p8 = scmp.ge.s32.totalorder %s6772_s15, 6 }
  0xce   : > { %528 = sbr.rel (%p5480_p8) target bundleno = 934 (0x3a6), region = 96 }
  0xd3   : > { %v601_v9 = vld [vmem:[%s6973_s14 + $0x1c0] sm:$0xff]  ;;  %v530_v62 = vld [vmem:[#allocation2] sm:$0xff]  ;;  %v532_v63 = vld [vmem:[#allocation2 + $0x10] sm:$0xff] }
  0xd4   : > { %v605_v10 = vld [vmem:[%s6973_s14 + $0x1e0] sm:$0xff]  ;;  %v7060_v3 = vpack.c.bf16 %v530_v62, %v530_v62  ;;  %v7062_v4 = vpack.c.bf16 %v532_v63, %v532_v63 }
  0xd5   : > { %v729_v11 = vld [vmem:[%s6973_s14 + $0x5c0] sm:$0xff]  ;;  %v5538_v12 = vcombine.high %v601_v9, %v605_v10  ;;  %v5537_v14 = vcombine.low %v601_v9, %v605_v10 }
  0xd6   : > { %v733_v13 = vld [vmem:[%s6973_s14 + $0x5e0] sm:$0xff]  ;;  %3649 = vmatprep.mubr.bf16.mxu0 %v7060_v3  ;;  %3690 = vmatprep.mubr.bf16.mxu1 %v7062_v4 }
  0xd7   : > { %v593_v15 = vld [vmem:[%s6973_s14 + $0x180] sm:$0xff]  ;;  %v5666_v17 = vcombine.high %v729_v11, %v733_v13  ;;  %v5665_v18 = vcombine.low %v729_v11, %v733_v13  ;;  %3617 = vmatprep.subr.bf16.mxu0 %v5538_v12 }
  0xd8   : > { %v597_v16 = vld [vmem:[%s6973_s14 + $0x1a0] sm:$0xff]  ;;  %3618 = vmatpush1.bf16.msra.mxu0 %v5537_v14 }
  0xd9   : > { %v5530_v19 = vcombine.high %v593_v15, %v597_v16  ;;  %v721_v20 = vld [vmem:[%s6973_s14 + $0x580] sm:$0xff]  ;;  %3658 = vmatprep.subr.bf16.mxu1 %v5666_v17  ;;  %v5529_v27 = vcombine.low %v593_v15, %v597_v16 }
  0xda   : > { %v725_v21 = vld [vmem:[%s6973_s14 + $0x5a0] sm:$0xff]  ;;  %3659 = vmatpush1.bf16.msra.mxu1 %v5665_v18 }
  0xdb   : > { %v585_v22 = vld [vmem:[%s6973_s14 + $0x140] sm:$0xff]  ;;  %v5658_v23 = vcombine.high %v721_v20, %v725_v21  ;;  %3619 = vmatprep.subr.bf16.mxu0 %v5530_v19  ;;  %v5657_v28 = vcombine.low %v721_v20, %v725_v21 }
  0xdc   : > { %v589_v24 = vld [vmem:[%s6973_s14 + $0x160] sm:$0xff]  ;;  %3620 = vmatpush1.bf16.msra.mxu0 %v5529_v27 }
  0xdd   : > { %v713_v25 = vld [vmem:[%s6973_s14 + $0x540] sm:$0xff]  ;;  %v5522_v29 = vcombine.high %v585_v22, %v589_v24  ;;  %3660 = vmatprep.subr.bf16.mxu1 %v5658_v23  ;;  %v5521_v35 = vcombine.low %v585_v22, %v589_v24 }
  0xde   : > { %v717_v26 = vld [vmem:[%s6973_s14 + $0x560] sm:$0xff]  ;;  %3661 = vmatpush1.bf16.msra.mxu1 %v5657_v28 }
  0xdf   : > { %v5650_v30 = vcombine.high %v713_v25, %v717_v26  ;;  %v577_v31 = vld [vmem:[%s6973_s14 + $0x100] sm:$0xff]  ;;  %3621 = vmatprep.subr.bf16.mxu0 %v5522_v29  ;;  %v5649_v36 = vcombine.low %v713_v25, %v717_v26 }
  0xe0   : > { %v581_v32 = vld [vmem:[%s6973_s14 + $0x120] sm:$0xff]  ;;  %3622 = vmatpush1.bf16.msra.mxu0 %v5521_v35 }
  0xe1   : > { %v705_v33 = vld [vmem:[%s6973_s14 + $0x500] sm:$0xff]  ;;  %v5514_v37 = vcombine.high %v577_v31, %v581_v32  ;;  %3662 = vmatprep.subr.bf16.mxu1 %v5650_v30  ;;  %v5513_v43 = vcombine.low %v577_v31, %v581_v32 }
  0xe2   : > { %v709_v34 = vld [vmem:[%s6973_s14 + $0x520] sm:$0xff]  ;;  %3663 = vmatpush1.bf16.msra.mxu1 %v5649_v36 }
  0xe3   : > { %v5642_v38 = vcombine.high %v705_v33, %v709_v34  ;;  %v569_v39 = vld [vmem:[%s6973_s14 + $0xc0] sm:$0xff]  ;;  %3623 = vmatprep.subr.bf16.mxu0 %v5514_v37  ;;  %v5641_v44 = vcombine.low %v705_v33, %v709_v34 }
  0xe4   : > { %v573_v40 = vld [vmem:[%s6973_s14 + $0xe0] sm:$0xff]  ;;  %3624 = vmatpush1.bf16.msra.mxu0 %v5513_v43 }
  0xe5   : > { %v697_v41 = vld [vmem:[%s6973_s14 + $0x4c0] sm:$0xff]  ;;  %v5506_v45 = vcombine.high %v569_v39, %v573_v40  ;;  %3664 = vmatprep.subr.bf16.mxu1 %v5642_v38  ;;  %v5505_v51 = vcombine.low %v569_v39, %v573_v40 }
  0xe6   : > { %v701_v42 = vld [vmem:[%s6973_s14 + $0x4e0] sm:$0xff]  ;;  %3665 = vmatpush1.bf16.msra.mxu1 %v5641_v44 }
  0xe7   : > { %v5634_v46 = vcombine.high %v697_v41, %v701_v42  ;;  %v561_v47 = vld [vmem:[%s6973_s14 + $0x80] sm:$0xff]  ;;  %3625 = vmatprep.subr.bf16.mxu0 %v5506_v45  ;;  %v5633_v52 = vcombine.low %v697_v41, %v701_v42 }
  0xe8   : > { %v565_v48 = vld [vmem:[%s6973_s14 + $0xa0] sm:$0xff]  ;;  %3626 = vmatpush1.bf16.msra.mxu0 %v5505_v51 }
  0xe9   : > { %v689_v49 = vld [vmem:[%s6973_s14 + $0x480] sm:$0xff]  ;;  %v5498_v53 = vcombine.high %v561_v47, %v565_v48  ;;  %3666 = vmatprep.subr.bf16.mxu1 %v5634_v46  ;;  %v5497_v59 = vcombine.low %v561_v47, %v565_v48 }
  0xea   : > { %v693_v50 = vld [vmem:[%s6973_s14 + $0x4a0] sm:$0xff]  ;;  %3667 = vmatpush1.bf16.msra.mxu1 %v5633_v52 }
  0xeb   : > { %v5626_v54 = vcombine.high %v689_v49, %v693_v50  ;;  %v553_v55 = vld [vmem:[%s6973_s14 + $0x40] sm:$0xff]  ;;  %3627 = vmatprep.subr.bf16.mxu0 %v5498_v53  ;;  %v5625_v60 = vcombine.low %v689_v49, %v693_v50 }
  0xec   : > { %v557_v56 = vld [vmem:[%s6973_s14 + $0x60] sm:$0xff]  ;;  %3628 = vmatpush1.bf16.msra.mxu0 %v5497_v59 }
  0xed   : > { %v681_v57 = vld [vmem:[%s6973_s14 + $0x440] sm:$0xff]  ;;  %v5490_v61 = vcombine.high %v553_v55, %v557_v56  ;;  %3668 = vmatprep.subr.bf16.mxu1 %v5626_v54  ;;  %v5489_v7 = vcombine.low %v553_v55, %v557_v56 }
  0xee   : > { %v685_v58 = vld [vmem:[%s6973_s14 + $0x460] sm:$0xff]  ;;  %3669 = vmatpush1.bf16.msra.mxu1 %v5625_v60 }
  0xef   : > { %v5618_v0 = vcombine.high %v681_v57, %v685_v58  ;;  %v545_v1 = vld [vmem:[%s6973_s14] sm:$0xff]  ;;  %3629 = vmatprep.subr.bf16.mxu0 %v5490_v61  ;;  %v5617_v8 = vcombine.low %v681_v57, %v685_v58 }
  0xf0   : > { %v549_v2 = vld [vmem:[%s6973_s14 + $0x20] sm:$0xff]  ;;  %3630 = vmatpush1.bf16.msra.mxu0 %v5489_v7 }
  0xf1   : > { %v673_v5 = vld [vmem:[%s6973_s14 + $0x400] sm:$0xff]  ;;  %v5482_v9 = vcombine.high %v545_v1, %v549_v2  ;;  %3670 = vmatprep.subr.bf16.mxu1 %v5618_v0  ;;  %v5481_v15 = vcombine.low %v545_v1, %v549_v2 }
  0xf2   : > { %v677_v6 = vld [vmem:[%s6973_s14 + $0x420] sm:$0xff]  ;;  %3671 = vmatpush1.bf16.msra.mxu1 %v5617_v8 }
  0xf3   : > { %v5610_v10 = vcombine.high %v673_v5, %v677_v6  ;;  %v665_v11 = vld [vmem:[%s6973_s14 + $0x3c0] sm:$0xff]  ;;  %3631 = vmatprep.subr.bf16.mxu0 %v5482_v9  ;;  %v5609_v16 = vcombine.low %v673_v5, %v677_v6 }
  0xf4   : > { %v669_v12 = vld [vmem:[%s6973_s14 + $0x3e0] sm:$0xff]  ;;  %3632 = vmatpush1.bf16.msra.mxu0 %v5481_v15 }
  0xf5   : > { %v793_v13 = vld [vmem:[%s6973_s14 + $0x7c0] sm:$0xff]  ;;  %v5602_v17 = vcombine.high %v665_v11, %v669_v12  ;;  %3672 = vmatprep.subr.bf16.mxu1 %v5610_v10  ;;  %v5601_v23 = vcombine.low %v665_v11, %v669_v12 }
  0xf6   : > { %v797_v14 = vld [vmem:[%s6973_s14 + $0x7e0] sm:$0xff]  ;;  %3673 = vmatpush1.bf16.msra.mxu1 %v5609_v16 }
  0xf7   : > { %v5730_v18 = vcombine.high %v793_v13, %v797_v14  ;;  %v657_v19 = vld [vmem:[%s6973_s14 + $0x380] sm:$0xff]  ;;  %3633 = vmatprep.subr.bf16.mxu0 %v5602_v17  ;;  %v5729_v24 = vcombine.low %v793_v13, %v797_v14 }
  0xf8   : > { %v661_v20 = vld [vmem:[%s6973_s14 + $0x3a0] sm:$0xff]  ;;  %3634 = vmatpush2.bf16.msra.mxu0 %v5601_v23 }
  0xf9   : > { %v785_v21 = vld [vmem:[%s6973_s14 + $0x780] sm:$0xff]  ;;  %v5594_v25 = vcombine.high %v657_v19, %v661_v20  ;;  %3674 = vmatprep.subr.bf16.mxu1 %v5730_v18  ;;  %v5593_v31 = vcombine.low %v657_v19, %v661_v20  ;;  %v529_v18 = vld [vmem:[#allocation2 + $0x30] sm:$0xff]  ;;  %v531_v20 = vld [vmem:[#allocation2 + $0x18] sm:$0xff] }
  0xfa   : > { %v789_v22 = vld [vmem:[%s6973_s14 + $0x7a0] sm:$0xff]  ;;  %3675 = vmatpush2.bf16.msra.mxu1 %v5729_v24 }
  0xfb   : > { %v5722_v26 = vcombine.high %v785_v21, %v789_v22  ;;  %v649_v27 = vld [vmem:[%s6973_s14 + $0x340] sm:$0xff]  ;;  %3635 = vmatprep.subr.bf16.mxu0 %v5594_v25  ;;  %v5721_v32 = vcombine.low %v785_v21, %v789_v22  ;;  %v7106_v25 = vpack.c.bf16 %v529_v18, %v529_v18 }
  0xfc   : > { %v653_v28 = vld [vmem:[%s6973_s14 + $0x360] sm:$0xff]  ;;  %3636 = vmatpush2.bf16.msra.mxu0 %v5593_v31  ;;  %v536_v31 = vld [vmem:[#allocation2 + $0x38] sm:$0xff] }
  0xfd   : > { %v777_v29 = vld [vmem:[%s6973_s14 + $0x740] sm:$0xff]  ;;  %v5586_v33 = vcombine.high %v649_v27, %v653_v28  ;;  %3676 = vmatprep.subr.bf16.mxu1 %v5722_v26  ;;  %v5585_v39 = vcombine.low %v649_v27, %v653_v28 }
  0xfe   : > { %v781_v30 = vld [vmem:[%s6973_s14 + $0x760] sm:$0xff]  ;;  %3677 = vmatpush2.bf16.msra.mxu1 %v5721_v32 }
  0xff   : > { %v5714_v34 = vcombine.high %v777_v29, %v781_v30  ;;  %v641_v35 = vld [vmem:[%s6973_s14 + $0x300] sm:$0xff]  ;;  %3637 = vmatprep.subr.bf16.mxu0 %v5586_v33  ;;  %v5713_v40 = vcombine.low %v777_v29, %v781_v30  ;;  %v7110_v29 = vpack.c.bf16 %v531_v20, %v531_v20 }
 0x100   : > { %v645_v36 = vld [vmem:[%s6973_s14 + $0x320] sm:$0xff]  ;;  %3638 = vmatpush2.bf16.msra.mxu0 %v5585_v39 }
 0x101   : > { %v769_v37 = vld [vmem:[%s6973_s14 + $0x700] sm:$0xff]  ;;  %v5578_v41 = vcombine.high %v641_v35, %v645_v36  ;;  %3678 = vmatprep.subr.bf16.mxu1 %v5714_v34  ;;  %v5577_v47 = vcombine.low %v641_v35, %v645_v36 }
 0x102   : > { %v773_v38 = vld [vmem:[%s6973_s14 + $0x720] sm:$0xff]  ;;  %3679 = vmatpush2.bf16.msra.mxu1 %v5713_v40  ;;  %v7119_v40 = vpack.c.bf16 %v536_v31, %v536_v31 }
 0x103   : > { %v5706_v42 = vcombine.high %v769_v37, %v773_v38  ;;  %v633_v43 = vld [vmem:[%s6973_s14 + $0x2c0] sm:$0xff]  ;;  %3639 = vmatprep.subr.bf16.mxu0 %v5578_v41  ;;  %v5705_v48 = vcombine.low %v769_v37, %v773_v38 }
 0x104   : > { %v637_v44 = vld [vmem:[%s6973_s14 + $0x2e0] sm:$0xff]  ;;  %3640 = vmatpush2.bf16.msra.mxu0 %v5577_v47 }
 0x105   : > { %v761_v45 = vld [vmem:[%s6973_s14 + $0x6c0] sm:$0xff]  ;;  %v5570_v49 = vcombine.high %v633_v43, %v637_v44  ;;  %3680 = vmatprep.subr.bf16.mxu1 %v5706_v42  ;;  %v5569_v55 = vcombine.low %v633_v43, %v637_v44 }
 0x106   : > { %v765_v46 = vld [vmem:[%s6973_s14 + $0x6e0] sm:$0xff]  ;;  %3681 = vmatpush2.bf16.msra.mxu1 %v5705_v48 }
 0x107   : > { %v5698_v50 = vcombine.high %v761_v45, %v765_v46  ;;  %v625_v51 = vld [vmem:[%s6973_s14 + $0x280] sm:$0xff]  ;;  %3641 = vmatprep.subr.bf16.mxu0 %v5570_v49  ;;  %v5697_v56 = vcombine.low %v761_v45, %v765_v46 }
 0x108   : > { %v629_v52 = vld [vmem:[%s6973_s14 + $0x2a0] sm:$0xff]  ;;  %3642 = vmatpush2.bf16.msra.mxu0 %v5569_v55 }
 0x109   : > { %v753_v53 = vld [vmem:[%s6973_s14 + $0x680] sm:$0xff]  ;;  %v5562_v57 = vcombine.high %v625_v51, %v629_v52  ;;  %3682 = vmatprep.subr.bf16.mxu1 %v5698_v50  ;;  %v5561_v63 = vcombine.low %v625_v51, %v629_v52 }
 0x10a   : > { %v757_v54 = vld [vmem:[%s6973_s14 + $0x6a0] sm:$0xff]  ;;  %3683 = vmatpush2.bf16.msra.mxu1 %v5697_v56 }
 0x10b   : > { %v5690_v58 = vcombine.high %v753_v53, %v757_v54  ;;  %v617_v59 = vld [vmem:[%s6973_s14 + $0x240] sm:$0xff]  ;;  %3643 = vmatprep.subr.bf16.mxu0 %v5562_v57  ;;  %v5689_v0 = vcombine.low %v753_v53, %v757_v54 }
 0x10c   : > { %v621_v60 = vld [vmem:[%s6973_s14 + $0x260] sm:$0xff]  ;;  %3644 = vmatpush2.bf16.msra.mxu0 %v5561_v63 }
 0x10d   : > { %v745_v61 = vld [vmem:[%s6973_s14 + $0x640] sm:$0xff]  ;;  %v5554_v1 = vcombine.high %v617_v59, %v621_v60  ;;  %3684 = vmatprep.subr.bf16.mxu1 %v5690_v58  ;;  %v5553_v9 = vcombine.low %v617_v59, %v621_v60 }
 0x10e   : > { %v749_v62 = vld [vmem:[%s6973_s14 + $0x660] sm:$0xff]  ;;  %3685 = vmatpush2.bf16.msra.mxu1 %v5689_v0 }
 0x10f   : > { %v5682_v2 = vcombine.high %v745_v61, %v749_v62  ;;  %v609_v5 = vld [vmem:[%s6973_s14 + $0x200] sm:$0xff]  ;;  %3645 = vmatprep.subr.bf16.mxu0 %v5554_v1  ;;  %v5681_v10 = vcombine.low %v745_v61, %v749_v62 }
 0x110   : > { %v613_v6 = vld [vmem:[%s6973_s14 + $0x220] sm:$0xff]  ;;  %3646 = vmatpush2.bf16.msra.mxu0 %v5553_v9 }
 0x111   : > { %v737_v7 = vld [vmem:[%s6973_s14 + $0x600] sm:$0xff]  ;;  %v5546_v11 = vcombine.high %v609_v5, %v613_v6  ;;  %3686 = vmatprep.subr.bf16.mxu1 %v5682_v2  ;;  %v5545_v17 = vcombine.low %v609_v5, %v613_v6 }
 0x112   : > { %v741_v8 = vld [vmem:[%s6973_s14 + $0x620] sm:$0xff]  ;;  %3687 = vmatpush2.bf16.msra.mxu1 %v5681_v10 }
 0x113   : > { %v5674_v12 = vcombine.high %v737_v7, %v741_v8  ;;  %v857_v13 = vld [vmem:[%s6973_s14 + $0x9c0] sm:$0xff]  ;;  %3647 = vmatprep.subr.bf16.mxu0 %v5546_v11  ;;  %v5673_v19 = vcombine.low %v737_v7, %v741_v8 }
 0x114   : > { %v861_v14 = vld [vmem:[%s6973_s14 + $0x9e0] sm:$0xff]  ;;  %3648 = vmatpush2.bf16.msra.mxu0 %v5545_v17 }
 0x115   : > { %v985_v15 = vld [vmem:[%s6973_s14 + $0xdc0] sm:$0xff]  ;;  %v5794_v21 = vcombine.high %v857_v13, %v861_v14  ;;  %3688 = vmatprep.subr.bf16.mxu1 %v5674_v12  ;;  %v5793_v30 = vcombine.low %v857_v13, %v861_v14 }
 0x116   : > { %v989_v16 = vld [vmem:[%s6973_s14 + $0xde0] sm:$0xff]  ;;  %3689 = vmatpush2.bf16.msra.mxu1 %v5673_v19 }
 0x117   : > { %v5922_v22 = vcombine.high %v985_v15, %v989_v16  ;;  %v849_v23 = vld [vmem:[%s6973_s14 + $0x980] sm:$0xff]  ;;  %3699 = vmatprep.subr.bf16.mxu0 %v5794_v21  ;;  %v5921_v32 = vcombine.low %v985_v15, %v989_v16  ;;  %3650 = vmatmul.mubr.bf16.vlgmr.msra.gmra.mxu0 %v7106_v25 }
 0x118   : > { %v853_v24 = vld [vmem:[%s6973_s14 + $0x9a0] sm:$0xff]  ;;  %3700 = vmatpush1.bf16.msra.mxu0 %v5793_v30 }
 0x119   : > { %v977_v26 = vld [vmem:[%s6973_s14 + $0xd80] sm:$0xff]  ;;  %v5786_v33 = vcombine.high %v849_v23, %v853_v24  ;;  %3740 = vmatprep.subr.bf16.mxu1 %v5922_v22  ;;  %3691 = vmatmul.mubr.bf16.vlgmr.msra.gmra.mxu1 %v7110_v29  ;;  %v5785_v41 = vcombine.low %v849_v23, %v853_v24 }
 0x11a   : > { %v981_v27 = vld [vmem:[%s6973_s14 + $0xda0] sm:$0xff]  ;;  %3741 = vmatpush1.bf16.msra.mxu1 %v5921_v32  ;;  %3772 = vmatprep.mubr.bf16.mxu1 %v7119_v40 }
 0x11b   : > { %v534_v28 = vld [vmem:[#allocation2 + $0x28] sm:$0xff]  ;;  %v5914_v34 = vcombine.high %v977_v26, %v981_v27  ;;  %3701 = vmatprep.subr.bf16.mxu0 %v5786_v33  ;;  %v5913_v42 = vcombine.low %v977_v26, %v981_v27 }
 0x11c   : > { %v841_v35 = vld [vmem:[%s6973_s14 + $0x940] sm:$0xff]  ;;  %v7114_v37 = vpack.c.bf16 %v534_v28, %v534_v28  ;;  %3702 = vmatpush1.bf16.msra.mxu0 %v5785_v41 }
 0x11d   : > { %v845_v36 = vld [vmem:[%s6973_s14 + $0x960] sm:$0xff]  ;;  %3742 = vmatprep.subr.bf16.mxu1 %v5914_v34 }
 0x11e   : > { %v969_v38 = vld [vmem:[%s6973_s14 + $0xd40] sm:$0xff]  ;;  %v5778_v43 = vcombine.high %v841_v35, %v845_v36  ;;  %3731 = vmatprep.mubr.bf16.mxu0 %v7114_v37  ;;  %v5777_v49 = vcombine.low %v841_v35, %v845_v36  ;;  %3743 = vmatpush1.bf16.msra.mxu1 %v5913_v42 }
 0x11f   : > { %v973_v39 = vld [vmem:[%s6973_s14 + $0xd60] sm:$0xff] }
 0x120   : > { %v5906_v44 = vcombine.high %v969_v38, %v973_v39  ;;  %v833_v45 = vld [vmem:[%s6973_s14 + $0x900] sm:$0xff]  ;;  %3703 = vmatprep.subr.bf16.mxu0 %v5778_v43  ;;  %v5905_v50 = vcombine.low %v969_v38, %v973_v39 }
 0x121   : > { %v837_v46 = vld [vmem:[%s6973_s14 + $0x920] sm:$0xff]  ;;  %3704 = vmatpush1.bf16.msra.mxu0 %v5777_v49 }
 0x122   : > { %v961_v47 = vld [vmem:[%s6973_s14 + $0xd00] sm:$0xff]  ;;  %v5770_v51 = vcombine.high %v833_v45, %v837_v46  ;;  %3744 = vmatprep.subr.bf16.mxu1 %v5906_v44  ;;  %v5769_v57 = vcombine.low %v833_v45, %v837_v46 }
 0x123   : > { %v965_v48 = vld [vmem:[%s6973_s14 + $0xd20] sm:$0xff]  ;;  %3745 = vmatpush1.bf16.msra.mxu1 %v5905_v50 }
 0x124   : > { %v5898_v52 = vcombine.high %v961_v47, %v965_v48  ;;  %v825_v53 = vld [vmem:[%s6973_s14 + $0x8c0] sm:$0xff]  ;;  %3705 = vmatprep.subr.bf16.mxu0 %v5770_v51  ;;  %v5897_v58 = vcombine.low %v961_v47, %v965_v48 }
 0x125   : > { %v829_v54 = vld [vmem:[%s6973_s14 + $0x8e0] sm:$0xff]  ;;  %3706 = vmatpush1.bf16.msra.mxu0 %v5769_v57 }
 0x126   : > { %v953_v55 = vld [vmem:[%s6973_s14 + $0xcc0] sm:$0xff]  ;;  %v5762_v59 = vcombine.high %v825_v53, %v829_v54  ;;  %3746 = vmatprep.subr.bf16.mxu1 %v5898_v52  ;;  %v5761_v1 = vcombine.low %v825_v53, %v829_v54 }
 0x127   : > { %v957_v56 = vld [vmem:[%s6973_s14 + $0xce0] sm:$0xff]  ;;  %3747 = vmatpush1.bf16.msra.mxu1 %v5897_v58 }
 0x128   : > { %v5890_v60 = vcombine.high %v953_v55, %v957_v56  ;;  %v817_v61 = vld [vmem:[%s6973_s14 + $0x880] sm:$0xff]  ;;  %3707 = vmatprep.subr.bf16.mxu0 %v5762_v59  ;;  %v5889_v2 = vcombine.low %v953_v55, %v957_v56 }
 0x129   : > { %v821_v62 = vld [vmem:[%s6973_s14 + $0x8a0] sm:$0xff]  ;;  %3708 = vmatpush1.bf16.msra.mxu0 %v5761_v1 }
 0x12a   : > { %v945_v63 = vld [vmem:[%s6973_s14 + $0xc80] sm:$0xff]  ;;  %v5754_v5 = vcombine.high %v817_v61, %v821_v62  ;;  %3748 = vmatprep.subr.bf16.mxu1 %v5890_v60  ;;  %v5753_v11 = vcombine.low %v817_v61, %v821_v62 }
 0x12b   : > { %v949_v0 = vld [vmem:[%s6973_s14 + $0xca0] sm:$0xff]  ;;  %3749 = vmatpush1.bf16.msra.mxu1 %v5889_v2 }
 0x12c   : > { %v5882_v6 = vcombine.high %v945_v63, %v949_v0  ;;  %v809_v7 = vld [vmem:[%s6973_s14 + $0x840] sm:$0xff]  ;;  %3709 = vmatprep.subr.bf16.mxu0 %v5754_v5  ;;  %v5881_v12 = vcombine.low %v945_v63, %v949_v0 }
 0x12d   : > { %v813_v8 = vld [vmem:[%s6973_s14 + $0x860] sm:$0xff]  ;;  %3710 = vmatpush1.bf16.msra.mxu0 %v5753_v11 }
 0x12e   : > { %v937_v9 = vld [vmem:[%s6973_s14 + $0xc40] sm:$0xff]  ;;  %v5746_v13 = vcombine.high %v809_v7, %v813_v8  ;;  %3750 = vmatprep.subr.bf16.mxu1 %v5882_v6  ;;  %v5745_v19 = vcombine.low %v809_v7, %v813_v8 }
 0x12f   : > { %v941_v10 = vld [vmem:[%s6973_s14 + $0xc60] sm:$0xff]  ;;  %3751 = vmatpush1.bf16.msra.mxu1 %v5881_v12 }
 0x130   : > { %v5874_v14 = vcombine.high %v937_v9, %v941_v10  ;;  %v801_v15 = vld [vmem:[%s6973_s14 + $0x800] sm:$0xff]  ;;  %3711 = vmatprep.subr.bf16.mxu0 %v5746_v13  ;;  %v5873_v20 = vcombine.low %v937_v9, %v941_v10 }
 0x131   : > { %v805_v16 = vld [vmem:[%s6973_s14 + $0x820] sm:$0xff]  ;;  %3712 = vmatpush1.bf16.msra.mxu0 %v5745_v19 }
 0x132   : > { %v929_v17 = vld [vmem:[%s6973_s14 + $0xc00] sm:$0xff]  ;;  %v5738_v21 = vcombine.high %v801_v15, %v805_v16  ;;  %3752 = vmatprep.subr.bf16.mxu1 %v5874_v14  ;;  %v5737_v28 = vcombine.low %v801_v15, %v805_v16 }
 0x133   : > { %v933_v18 = vld [vmem:[%s6973_s14 + $0xc20] sm:$0xff]  ;;  %3753 = vmatpush1.bf16.msra.mxu1 %v5873_v20 }
 0x134   : > { %v5866_v22 = vcombine.high %v929_v17, %v933_v18  ;;  %v921_v23 = vld [vmem:[%s6973_s14 + $0xbc0] sm:$0xff]  ;;  %3713 = vmatprep.subr.bf16.mxu0 %v5738_v21  ;;  %v5865_v30 = vcombine.low %v929_v17, %v933_v18 }
 0x135   : > { %v925_v24 = vld [vmem:[%s6973_s14 + $0xbe0] sm:$0xff]  ;;  %3714 = vmatpush1.bf16.msra.mxu0 %v5737_v28 }
 0x136   : > { %v1049_v26 = vld [vmem:[%s6973_s14 + $0xfc0] sm:$0xff]  ;;  %v5858_v31 = vcombine.high %v921_v23, %v925_v24  ;;  %3754 = vmatprep.subr.bf16.mxu1 %v5866_v22  ;;  %v5857_v38 = vcombine.low %v921_v23, %v925_v24 }
 0x137   : > { %v1053_v27 = vld [vmem:[%s6973_s14 + $0xfe0] sm:$0xff]  ;;  %3755 = vmatpush1.bf16.msra.mxu1 %v5865_v30 }
 0x138   : > { %v5986_v32 = vcombine.high %v1049_v26, %v1053_v27  ;;  %v913_v33 = vld [vmem:[%s6973_s14 + $0xb80] sm:$0xff]  ;;  %3715 = vmatprep.subr.bf16.mxu0 %v5858_v31  ;;  %v5985_v39 = vcombine.low %v1049_v26, %v1053_v27  ;;  %v602_v31 = vld [vmem:[%s6973_s14 + $0x1c8] sm:$0xff] }
 0x139   : > { %v917_v34 = vld [vmem:[%s6973_s14 + $0xba0] sm:$0xff]  ;;  %3716 = vmatpush2.bf16.msra.mxu0 %v5857_v38 }
 0x13a   : > { %v1041_v35 = vld [vmem:[%s6973_s14 + $0xf80] sm:$0xff]  ;;  %v5850_v41 = vcombine.high %v913_v33, %v917_v34  ;;  %3756 = vmatprep.subr.bf16.mxu1 %v5986_v32  ;;  %v5849_v47 = vcombine.low %v913_v33, %v917_v34  ;;  %v606_v32 = vld [vmem:[%s6973_s14 + $0x1e8] sm:$0xff] }
 0x13b   : > { %v1045_v36 = vld [vmem:[%s6973_s14 + $0xfa0] sm:$0xff]  ;;  %3757 = vmatpush2.bf16.msra.mxu1 %v5985_v39  ;;  %v730_v33 = vld [vmem:[%s6973_s14 + $0x5c8] sm:$0xff]  ;;  %v535_v39 = vld [vmem:[#allocation2 + $0x40] sm:$0xff] }
 0x13c   : > { %v5978_v42 = vcombine.high %v1041_v35, %v1045_v36  ;;  %v905_v43 = vld [vmem:[%s6973_s14 + $0xb40] sm:$0xff]  ;;  %3717 = vmatprep.subr.bf16.mxu0 %v5850_v41  ;;  %v5977_v48 = vcombine.low %v1041_v35, %v1045_v36  ;;  %v734_v34 = vld [vmem:[%s6973_s14 + $0x5e8] sm:$0xff]  ;;  %v533_v36 = vld [vmem:[#allocation2 + $0x20] sm:$0xff]  ;;  %v5540_v41 = vcombine.high %v602_v31, %v606_v32 }
 0x13d   : > { %v909_v44 = vld [vmem:[%s6973_s14 + $0xb60] sm:$0xff]  ;;  %3718 = vmatpush2.bf16.msra.mxu0 %v5849_v47  ;;  %v726_v47 = vld [vmem:[%s6973_s14 + $0x5a8] sm:$0xff] }
 0x13e   : > { %v1033_v45 = vld [vmem:[%s6973_s14 + $0xf40] sm:$0xff]  ;;  %v5842_v49 = vcombine.high %v905_v43, %v909_v44  ;;  %3758 = vmatprep.subr.bf16.mxu1 %v5978_v42  ;;  %v5841_v55 = vcombine.low %v905_v43, %v909_v44  ;;  %v5668_v42 = vcombine.high %v730_v33, %v734_v34  ;;  %v594_v43 = vld [vmem:[%s6973_s14 + $0x188] sm:$0xff] }
 0x13f   : > { %v1037_v46 = vld [vmem:[%s6973_s14 + $0xf60] sm:$0xff]  ;;  %3759 = vmatpush2.bf16.msra.mxu1 %v5977_v48  ;;  %v598_v44 = vld [vmem:[%s6973_s14 + $0x1a8] sm:$0xff]  ;;  %v7186_v48 = vpack.c.bf16 %v535_v39, %v535_v39 }
 0x140   : > { %v5970_v50 = vcombine.high %v1033_v45, %v1037_v46  ;;  %v897_v51 = vld [vmem:[%s6973_s14 + $0xb00] sm:$0xff]  ;;  %3719 = vmatprep.subr.bf16.mxu0 %v5842_v49  ;;  %v5969_v56 = vcombine.low %v1033_v45, %v1037_v46  ;;  %v7182_v45 = vpack.c.bf16 %v533_v36, %v533_v36  ;;  %v722_v46 = vld [vmem:[%s6973_s14 + $0x588] sm:$0xff]  ;;  %v5539_v49 = vcombine.low %v602_v31, %v606_v32 }
 0x141   : > { %v901_v52 = vld [vmem:[%s6973_s14 + $0xb20] sm:$0xff]  ;;  %3720 = vmatpush2.bf16.msra.mxu0 %v5841_v55  ;;  %v714_v55 = vld [vmem:[%s6973_s14 + $0x548] sm:$0xff] }
 0x142   : > { %v1025_v53 = vld [vmem:[%s6973_s14 + $0xf00] sm:$0xff]  ;;  %v5834_v57 = vcombine.high %v897_v51, %v901_v52  ;;  %3760 = vmatprep.subr.bf16.mxu1 %v5970_v50  ;;  %v5833_v63 = vcombine.low %v897_v51, %v901_v52  ;;  %v5667_v50 = vcombine.low %v730_v33, %v734_v34  ;;  %v5532_v51 = vcombine.high %v594_v43, %v598_v44  ;;  %v546_v33 = vld [vmem:[%s6973_s14 + $0x8] sm:$0xff] }
 0x143   : > { %v1029_v54 = vld [vmem:[%s6973_s14 + $0xf20] sm:$0xff]  ;;  %3761 = vmatpush2.bf16.msra.mxu1 %v5969_v56  ;;  %v5660_v52 = vcombine.high %v722_v46, %v726_v47  ;;  %v718_v56 = vld [vmem:[%s6973_s14 + $0x568] sm:$0xff] }
 0x144   : > { %v5962_v58 = vcombine.high %v1025_v53, %v1029_v54  ;;  %v889_v59 = vld [vmem:[%s6973_s14 + $0xac0] sm:$0xff]  ;;  %3721 = vmatprep.subr.bf16.mxu0 %v5834_v57  ;;  %v5961_v0 = vcombine.low %v1025_v53, %v1029_v54  ;;  %v586_v53 = vld [vmem:[%s6973_s14 + $0x148] sm:$0xff]  ;;  %v5531_v57 = vcombine.low %v594_v43, %v598_v44 }
 0x145   : > { %v893_v60 = vld [vmem:[%s6973_s14 + $0xae0] sm:$0xff]  ;;  %3722 = vmatpush2.bf16.msra.mxu0 %v5833_v63  ;;  %v590_v54 = vld [vmem:[%s6973_s14 + $0x168] sm:$0xff] }
 0x146   : > { %v1017_v61 = vld [vmem:[%s6973_s14 + $0xec0] sm:$0xff]  ;;  %v5826_v1 = vcombine.high %v889_v59, %v893_v60  ;;  %3762 = vmatprep.subr.bf16.mxu1 %v5962_v58  ;;  %v5825_v9 = vcombine.low %v889_v59, %v893_v60  ;;  %v5659_v58 = vcombine.low %v722_v46, %v726_v47  ;;  %v5524_v59 = vcombine.high %v586_v53, %v590_v54  ;;  %v706_v63 = vld [vmem:[%s6973_s14 + $0x508] sm:$0xff] }
 0x147   : > { %v1021_v62 = vld [vmem:[%s6973_s14 + $0xee0] sm:$0xff]  ;;  %3763 = vmatpush2.bf16.msra.mxu1 %v5961_v0  ;;  %v5652_v60 = vcombine.high %v714_v55, %v718_v56  ;;  %v710_v0 = vld [vmem:[%s6973_s14 + $0x528] sm:$0xff] }
 0x148   : > { %v5954_v2 = vcombine.high %v1017_v61, %v1021_v62  ;;  %v881_v5 = vld [vmem:[%s6973_s14 + $0xa80] sm:$0xff]  ;;  %3723 = vmatprep.subr.bf16.mxu0 %v5826_v1  ;;  %v5953_v10 = vcombine.low %v1017_v61, %v1021_v62  ;;  %v578_v61 = vld [vmem:[%s6973_s14 + $0x108] sm:$0xff]  ;;  %v5523_v1 = vcombine.low %v586_v53, %v590_v54 }
 0x149   : > { %v885_v6 = vld [vmem:[%s6973_s14 + $0xaa0] sm:$0xff]  ;;  %3724 = vmatpush2.bf16.msra.mxu0 %v5825_v9  ;;  %v582_v62 = vld [vmem:[%s6973_s14 + $0x128] sm:$0xff] }
 0x14a   : > { %v1009_v7 = vld [vmem:[%s6973_s14 + $0xe80] sm:$0xff]  ;;  %v5818_v11 = vcombine.high %v881_v5, %v885_v6  ;;  %3764 = vmatprep.subr.bf16.mxu1 %v5954_v2  ;;  %v5817_v17 = vcombine.low %v881_v5, %v885_v6  ;;  %v5651_v2 = vcombine.low %v714_v55, %v718_v56  ;;  %v5516_v5 = vcombine.high %v578_v61, %v582_v62  ;;  %v698_v9 = vld [vmem:[%s6973_s14 + $0x4c8] sm:$0xff] }
 0x14b   : > { %v1013_v8 = vld [vmem:[%s6973_s14 + $0xea0] sm:$0xff]  ;;  %3765 = vmatpush2.bf16.msra.mxu1 %v5953_v10  ;;  %v5644_v6 = vcombine.high %v706_v63, %v710_v0  ;;  %v702_v10 = vld [vmem:[%s6973_s14 + $0x4e8] sm:$0xff] }
 0x14c   : > { %v5946_v12 = vcombine.high %v1009_v7, %v1013_v8  ;;  %v873_v13 = vld [vmem:[%s6973_s14 + $0xa40] sm:$0xff]  ;;  %3725 = vmatprep.subr.bf16.mxu0 %v5818_v11  ;;  %v5945_v18 = vcombine.low %v1009_v7, %v1013_v8  ;;  %v570_v7 = vld [vmem:[%s6973_s14 + $0xc8] sm:$0xff]  ;;  %v5515_v11 = vcombine.low %v578_v61, %v582_v62 }
 0x14d   : > { %v877_v14 = vld [vmem:[%s6973_s14 + $0xa60] sm:$0xff]  ;;  %3726 = vmatpush2.bf16.msra.mxu0 %v5817_v17  ;;  %v574_v8 = vld [vmem:[%s6973_s14 + $0xe8] sm:$0xff] }
 0x14e   : > { %v1001_v15 = vld [vmem:[%s6973_s14 + $0xe40] sm:$0xff]  ;;  %v5810_v19 = vcombine.high %v873_v13, %v877_v14  ;;  %3766 = vmatprep.subr.bf16.mxu1 %v5946_v12  ;;  %v5809_v26 = vcombine.low %v873_v13, %v877_v14  ;;  %v5643_v12 = vcombine.low %v706_v63, %v710_v0  ;;  %v5508_v13 = vcombine.high %v570_v7, %v574_v8  ;;  %v690_v17 = vld [vmem:[%s6973_s14 + $0x488] sm:$0xff] }
 0x14f   : > { %v1005_v16 = vld [vmem:[%s6973_s14 + $0xe60] sm:$0xff]  ;;  %3767 = vmatpush2.bf16.msra.mxu1 %v5945_v18  ;;  %v5636_v14 = vcombine.high %v698_v9, %v702_v10  ;;  %v694_v18 = vld [vmem:[%s6973_s14 + $0x4a8] sm:$0xff] }
 0x150   : > { %v5938_v20 = vcombine.high %v1001_v15, %v1005_v16  ;;  %v865_v21 = vld [vmem:[%s6973_s14 + $0xa00] sm:$0xff]  ;;  %3727 = vmatprep.subr.bf16.mxu0 %v5810_v19  ;;  %v5937_v27 = vcombine.low %v1001_v15, %v1005_v16  ;;  %v562_v15 = vld [vmem:[%s6973_s14 + $0x88] sm:$0xff]  ;;  %v5507_v19 = vcombine.low %v570_v7, %v574_v8 }
 0x151   : > { %v869_v22 = vld [vmem:[%s6973_s14 + $0xa20] sm:$0xff]  ;;  %3728 = vmatpush2.bf16.msra.mxu0 %v5809_v26  ;;  %v566_v16 = vld [vmem:[%s6973_s14 + $0xa8] sm:$0xff] }
 0x152   : > { %v993_v23 = vld [vmem:[%s6973_s14 + $0xe00] sm:$0xff]  ;;  %v5802_v28 = vcombine.high %v865_v21, %v869_v22  ;;  %3768 = vmatprep.subr.bf16.mxu1 %v5938_v20  ;;  %v5801_v35 = vcombine.low %v865_v21, %v869_v22  ;;  %v5635_v20 = vcombine.low %v698_v9, %v702_v10  ;;  %v5500_v21 = vcombine.high %v562_v15, %v566_v16  ;;  %v682_v26 = vld [vmem:[%s6973_s14 + $0x448] sm:$0xff] }
 0x153   : > { %v997_v24 = vld [vmem:[%s6973_s14 + $0xe20] sm:$0xff]  ;;  %3769 = vmatpush2.bf16.msra.mxu1 %v5937_v27  ;;  %v5628_v22 = vcombine.high %v690_v17, %v694_v18  ;;  %v686_v27 = vld [vmem:[%s6973_s14 + $0x468] sm:$0xff] }
 0x154   : > { %v5930_v30 = vcombine.high %v993_v23, %v997_v24  ;;  %3729 = vmatprep.subr.bf16.mxu0 %v5802_v28  ;;  %v5929_v38 = vcombine.low %v993_v23, %v997_v24  ;;  %v554_v23 = vld [vmem:[%s6973_s14 + $0x48] sm:$0xff]  ;;  %v5499_v28 = vcombine.low %v562_v15, %v566_v16  ;;  %v5620_v32 = vcombine.high %v682_v26, %v686_v27 }
 0x155   : > { %3730 = vmatpush2.bf16.msra.mxu0 %v5801_v35  ;;  %v558_v24 = vld [vmem:[%s6973_s14 + $0x68] sm:$0xff]  ;;  %v5619_v39 = vcombine.low %v682_v26, %v686_v27 }
 0x156   : > { %3770 = vmatprep.subr.bf16.mxu1 %v5930_v30  ;;  %3781 = vmatprep.subr.bf16.mxu0 %v5540_v41  ;;  %v5627_v30 = vcombine.low %v690_v17, %v694_v18  ;;  %v5492_v31 = vcombine.high %v554_v23, %v558_v24  ;;  %v550_v34 = vld [vmem:[%s6973_s14 + $0x28] sm:$0xff] }
 0x157   : > { %3771 = vmatpush2.bf16.msra.mxu1 %v5929_v38  ;;  %v674_v35 = vld [vmem:[%s6973_s14 + $0x408] sm:$0xff]  ;;  %v5491_v38 = vcombine.low %v554_v23, %v558_v24  ;;  %v5484_v41 = vcombine.high %v546_v33, %v550_v34 }
 0x158   : > { %3822 = vmatprep.subr.bf16.mxu1 %v5668_v42  ;;  %3732 = vmatmul.mubr.bf16.vlgmr.msra.gmra.mxu0 %v7182_v45  ;;  %v678_v36 = vld [vmem:[%s6973_s14 + $0x428] sm:$0xff] }
 0x159   : > { %3782 = vmatpush1.bf16.msra.mxu0 %v5539_v49  ;;  %3813 = vmatprep.mubr.bf16.mxu0 %v7060_v3  ;;  %v5612_v42 = vcombine.high %v674_v35, %v678_v36  ;;  %v666_v43 = vld [vmem:[%s6973_s14 + $0x3c8] sm:$0xff]  ;;  %v5483_v49 = vcombine.low %v546_v33, %v550_v34 }
 0x15a   : > { %3773 = vmatmul.mubr.bf16.vlgmr.msra.gmra.mxu1 %v7186_v48  ;;  %3783 = vmatprep.subr.bf16.mxu0 %v5532_v51  ;;  %v670_v44 = vld [vmem:[%s6973_s14 + $0x3e8] sm:$0xff] }
 0x15b   : > { %3823 = vmatpush1.bf16.msra.mxu1 %v5667_v50  ;;  %3854 = vmatprep.mubr.bf16.mxu1 %v7062_v4  ;;  %v794_v46 = vld [vmem:[%s6973_s14 + $0x7c8] sm:$0xff]  ;;  %v5611_v50 = vcombine.low %v674_v35, %v678_v36  ;;  %v5604_v51 = vcombine.high %v666_v43, %v670_v44 }
 0x15c   : > { %3824 = vmatprep.subr.bf16.mxu1 %v5660_v52  ;;  %v798_v47 = vld [vmem:[%s6973_s14 + $0x7e8] sm:$0xff] }
 0x15d   : > { %3784 = vmatpush1.bf16.msra.mxu0 %v5531_v57  ;;  %v5732_v52 = vcombine.high %v794_v46, %v798_v47  ;;  %v658_v53 = vld [vmem:[%s6973_s14 + $0x388] sm:$0xff]  ;;  %v5603_v57 = vcombine.low %v666_v43, %v670_v44 }
 0x15e   : > { %3785 = vmatprep.subr.bf16.mxu0 %v5524_v59  ;;  %v662_v54 = vld [vmem:[%s6973_s14 + $0x3a8] sm:$0xff] }
 0x15f   : > { %3825 = vmatpush1.bf16.msra.mxu1 %v5659_v58  ;;  %v786_v55 = vld [vmem:[%s6973_s14 + $0x788] sm:$0xff]  ;;  %v5731_v58 = vcombine.low %v794_v46, %v798_v47  ;;  %v5596_v59 = vcombine.high %v658_v53, %v662_v54 }
 0x160   : > { %3826 = vmatprep.subr.bf16.mxu1 %v5652_v60  ;;  %v790_v56 = vld [vmem:[%s6973_s14 + $0x7a8] sm:$0xff] }
 0x161   : > { %3786 = vmatpush1.bf16.msra.mxu0 %v5523_v1  ;;  %v5724_v60 = vcombine.high %v786_v55, %v790_v56  ;;  %v650_v61 = vld [vmem:[%s6973_s14 + $0x348] sm:$0xff]  ;;  %v5595_v1 = vcombine.low %v658_v53, %v662_v54 }
 0x162   : > { %3787 = vmatprep.subr.bf16.mxu0 %v5516_v5  ;;  %v654_v62 = vld [vmem:[%s6973_s14 + $0x368] sm:$0xff] }
 0x163   : > { %3827 = vmatpush1.bf16.msra.mxu1 %v5651_v2  ;;  %v778_v63 = vld [vmem:[%s6973_s14 + $0x748] sm:$0xff]  ;;  %v5723_v2 = vcombine.low %v786_v55, %v790_v56  ;;  %v5588_v5 = vcombine.high %v650_v61, %v654_v62 }
 0x164   : > { %3828 = vmatprep.subr.bf16.mxu1 %v5644_v6  ;;  %v782_v0 = vld [vmem:[%s6973_s14 + $0x768] sm:$0xff] }
 0x165   : > { %3788 = vmatpush1.bf16.msra.mxu0 %v5515_v11  ;;  %v5716_v6 = vcombine.high %v778_v63, %v782_v0  ;;  %v642_v7 = vld [vmem:[%s6973_s14 + $0x308] sm:$0xff]  ;;  %v5587_v11 = vcombine.low %v650_v61, %v654_v62 }
 0x166   : > { %3789 = vmatprep.subr.bf16.mxu0 %v5508_v13  ;;  %v646_v8 = vld [vmem:[%s6973_s14 + $0x328] sm:$0xff] }
 0x167   : > { %3829 = vmatpush1.bf16.msra.mxu1 %v5643_v12  ;;  %v770_v9 = vld [vmem:[%s6973_s14 + $0x708] sm:$0xff]  ;;  %v5715_v12 = vcombine.low %v778_v63, %v782_v0  ;;  %v5580_v13 = vcombine.high %v642_v7, %v646_v8 }
 0x168   : > { %3830 = vmatprep.subr.bf16.mxu1 %v5636_v14  ;;  %v774_v10 = vld [vmem:[%s6973_s14 + $0x728] sm:$0xff] }
 0x169   : > { %3790 = vmatpush1.bf16.msra.mxu0 %v5507_v19  ;;  %v5708_v14 = vcombine.high %v770_v9, %v774_v10  ;;  %v634_v15 = vld [vmem:[%s6973_s14 + $0x2c8] sm:$0xff]  ;;  %v5579_v19 = vcombine.low %v642_v7, %v646_v8 }
 0x16a   : > { %3791 = vmatprep.subr.bf16.mxu0 %v5500_v21  ;;  %v638_v16 = vld [vmem:[%s6973_s14 + $0x2e8] sm:$0xff] }
 0x16b   : > { %3831 = vmatpush1.bf16.msra.mxu1 %v5635_v20  ;;  %v762_v17 = vld [vmem:[%s6973_s14 + $0x6c8] sm:$0xff]  ;;  %v5707_v20 = vcombine.low %v770_v9, %v774_v10  ;;  %v5572_v21 = vcombine.high %v634_v15, %v638_v16 }
 0x16c   : > { %3832 = vmatprep.subr.bf16.mxu1 %v5628_v22  ;;  %v766_v18 = vld [vmem:[%s6973_s14 + $0x6e8] sm:$0xff] }
 0x16d   : > { %3792 = vmatpush1.bf16.msra.mxu0 %v5499_v28  ;;  %v5700_v22 = vcombine.high %v762_v17, %v766_v18  ;;  %v626_v23 = vld [vmem:[%s6973_s14 + $0x288] sm:$0xff]  ;;  %v5571_v28 = vcombine.low %v634_v15, %v638_v16 }
 0x16e   : > { %3793 = vmatprep.subr.bf16.mxu0 %v5492_v31  ;;  %v630_v24 = vld [vmem:[%s6973_s14 + $0x2a8] sm:$0xff] }
 0x16f   : > { %3833 = vmatpush1.bf16.msra.mxu1 %v5627_v30  ;;  %v754_v26 = vld [vmem:[%s6973_s14 + $0x688] sm:$0xff]  ;;  %v5699_v30 = vcombine.low %v762_v17, %v766_v18  ;;  %v5564_v31 = vcombine.high %v626_v23, %v630_v24 }
 0x170   : > { %3834 = vmatprep.subr.bf16.mxu1 %v5620_v32  ;;  %v758_v27 = vld [vmem:[%s6973_s14 + $0x6a8] sm:$0xff] }
 0x171   : > { %3794 = vmatpush1.bf16.msra.mxu0 %v5491_v38  ;;  %v5692_v32 = vcombine.high %v754_v26, %v758_v27  ;;  %v618_v33 = vld [vmem:[%s6973_s14 + $0x248] sm:$0xff]  ;;  %v5563_v38 = vcombine.low %v626_v23, %v630_v24 }
 0x172   : > { %3795 = vmatprep.subr.bf16.mxu0 %v5484_v41  ;;  %v622_v34 = vld [vmem:[%s6973_s14 + $0x268] sm:$0xff] }
 0x173   : > { %3835 = vmatpush1.bf16.msra.mxu1 %v5619_v39  ;;  %v746_v35 = vld [vmem:[%s6973_s14 + $0x648] sm:$0xff]  ;;  %v5691_v39 = vcombine.low %v754_v26, %v758_v27  ;;  %v5556_v41 = vcombine.high %v618_v33, %v622_v34 }
 0x174   : > { %3836 = vmatprep.subr.bf16.mxu1 %v5612_v42  ;;  %v750_v36 = vld [vmem:[%s6973_s14 + $0x668] sm:$0xff] }
 0x175   : > { %3796 = vmatpush1.bf16.msra.mxu0 %v5483_v49  ;;  %v5684_v42 = vcombine.high %v746_v35, %v750_v36  ;;  %v610_v43 = vld [vmem:[%s6973_s14 + $0x208] sm:$0xff]  ;;  %v5555_v49 = vcombine.low %v618_v33, %v622_v34 }
 0x176   : > { %3797 = vmatprep.subr.bf16.mxu0 %v5604_v51  ;;  %v614_v44 = vld [vmem:[%s6973_s14 + $0x228] sm:$0xff] }
 0x177   : > { %3837 = vmatpush1.bf16.msra.mxu1 %v5611_v50  ;;  %v738_v46 = vld [vmem:[%s6973_s14 + $0x608] sm:$0xff]  ;;  %v5683_v50 = vcombine.low %v746_v35, %v750_v36  ;;  %v5548_v51 = vcombine.high %v610_v43, %v614_v44 }
 0x178   : > { %3838 = vmatprep.subr.bf16.mxu1 %v5732_v52  ;;  %v742_v47 = vld [vmem:[%s6973_s14 + $0x628] sm:$0xff] }
 0x179   : > { %3798 = vmatpush2.bf16.msra.mxu0 %v5603_v57  ;;  %v5676_v52 = vcombine.high %v738_v46, %v742_v47  ;;  %v858_v53 = vld [vmem:[%s6973_s14 + $0x9c8] sm:$0xff]  ;;  %v5547_v57 = vcombine.low %v610_v43, %v614_v44 }
 0x17a   : > { %3799 = vmatprep.subr.bf16.mxu0 %v5596_v59  ;;  %v862_v54 = vld [vmem:[%s6973_s14 + $0x9e8] sm:$0xff] }
 0x17b   : > { %3839 = vmatpush2.bf16.msra.mxu1 %v5731_v58  ;;  %v986_v55 = vld [vmem:[%s6973_s14 + $0xdc8] sm:$0xff]  ;;  %v5675_v58 = vcombine.low %v738_v46, %v742_v47  ;;  %v5796_v59 = vcombine.high %v858_v53, %v862_v54 }
 0x17c   : > { %3840 = vmatprep.subr.bf16.mxu1 %v5724_v60  ;;  %v990_v56 = vld [vmem:[%s6973_s14 + $0xde8] sm:$0xff] }
 0x17d   : > { %3800 = vmatpush2.bf16.msra.mxu0 %v5595_v1  ;;  %v5924_v60 = vcombine.high %v986_v55, %v990_v56  ;;  %v850_v61 = vld [vmem:[%s6973_s14 + $0x988] sm:$0xff]  ;;  %v5795_v1 = vcombine.low %v858_v53, %v862_v54 }
 0x17e   : > { %3801 = vmatprep.subr.bf16.mxu0 %v5588_v5  ;;  %v854_v62 = vld [vmem:[%s6973_s14 + $0x9a8] sm:$0xff] }
 0x17f   : > { %3841 = vmatpush2.bf16.msra.mxu1 %v5723_v2  ;;  %v978_v63 = vld [vmem:[%s6973_s14 + $0xd88] sm:$0xff]  ;;  %v5923_v2 = vcombine.low %v986_v55, %v990_v56  ;;  %v5788_v5 = vcombine.high %v850_v61, %v854_v62 }
 0x180   : > { %3842 = vmatprep.subr.bf16.mxu1 %v5716_v6  ;;  %v982_v0 = vld [vmem:[%s6973_s14 + $0xda8] sm:$0xff] }
 0x181   : > { %3802 = vmatpush2.bf16.msra.mxu0 %v5587_v11  ;;  %v5916_v6 = vcombine.high %v978_v63, %v982_v0  ;;  %v842_v7 = vld [vmem:[%s6973_s14 + $0x948] sm:$0xff]  ;;  %v5787_v11 = vcombine.low %v850_v61, %v854_v62 }
 0x182   : > { %3803 = vmatprep.subr.bf16.mxu0 %v5580_v13  ;;  %v846_v8 = vld [vmem:[%s6973_s14 + $0x968] sm:$0xff] }
 0x183   : > { %3843 = vmatpush2.bf16.msra.mxu1 %v5715_v12  ;;  %v970_v9 = vld [vmem:[%s6973_s14 + $0xd48] sm:$0xff]  ;;  %v5915_v12 = vcombine.low %v978_v63, %v982_v0  ;;  %v5780_v13 = vcombine.high %v842_v7, %v846_v8 }
 0x184   : > { %3844 = vmatprep.subr.bf16.mxu1 %v5708_v14  ;;  %v974_v10 = vld [vmem:[%s6973_s14 + $0xd68] sm:$0xff] }
 0x185   : > { %3804 = vmatpush2.bf16.msra.mxu0 %v5579_v19  ;;  %v5908_v14 = vcombine.high %v970_v9, %v974_v10  ;;  %v834_v15 = vld [vmem:[%s6973_s14 + $0x908] sm:$0xff]  ;;  %v5779_v19 = vcombine.low %v842_v7, %v846_v8 }
 0x186   : > { %3805 = vmatprep.subr.bf16.mxu0 %v5572_v21  ;;  %v838_v16 = vld [vmem:[%s6973_s14 + $0x928] sm:$0xff] }
 0x187   : > { %3845 = vmatpush2.bf16.msra.mxu1 %v5707_v20  ;;  %v962_v17 = vld [vmem:[%s6973_s14 + $0xd08] sm:$0xff]  ;;  %v5907_v20 = vcombine.low %v970_v9, %v974_v10  ;;  %v5772_v21 = vcombine.high %v834_v15, %v838_v16 }
 0x188   : > { %3846 = vmatprep.subr.bf16.mxu1 %v5700_v22  ;;  %v966_v18 = vld [vmem:[%s6973_s14 + $0xd28] sm:$0xff] }
 0x189   : > { %3806 = vmatpush2.bf16.msra.mxu0 %v5571_v28  ;;  %v5900_v22 = vcombine.high %v962_v17, %v966_v18  ;;  %v826_v23 = vld [vmem:[%s6973_s14 + $0x8c8] sm:$0xff]  ;;  %v5771_v28 = vcombine.low %v834_v15, %v838_v16 }
 0x18a   : > { %3807 = vmatprep.subr.bf16.mxu0 %v5564_v31  ;;  %v830_v24 = vld [vmem:[%s6973_s14 + $0x8e8] sm:$0xff] }
 0x18b   : > { %3847 = vmatpush2.bf16.msra.mxu1 %v5699_v30  ;;  %v954_v26 = vld [vmem:[%s6973_s14 + $0xcc8] sm:$0xff]  ;;  %v5899_v30 = vcombine.low %v962_v17, %v966_v18  ;;  %v5764_v31 = vcombine.high %v826_v23, %v830_v24 }
 0x18c   : > { %3848 = vmatprep.subr.bf16.mxu1 %v5692_v32  ;;  %v958_v27 = vld [vmem:[%s6973_s14 + $0xce8] sm:$0xff] }
 0x18d   : > { %3808 = vmatpush2.bf16.msra.mxu0 %v5563_v38  ;;  %v5892_v32 = vcombine.high %v954_v26, %v958_v27  ;;  %v818_v33 = vld [vmem:[%s6973_s14 + $0x888] sm:$0xff]  ;;  %v5763_v38 = vcombine.low %v826_v23, %v830_v24 }
 0x18e   : > { %3809 = vmatprep.subr.bf16.mxu0 %v5556_v41  ;;  %v822_v34 = vld [vmem:[%s6973_s14 + $0x8a8] sm:$0xff] }
 0x18f   : > { %3849 = vmatpush2.bf16.msra.mxu1 %v5691_v39  ;;  %v946_v35 = vld [vmem:[%s6973_s14 + $0xc88] sm:$0xff]  ;;  %v5891_v39 = vcombine.low %v954_v26, %v958_v27  ;;  %v5756_v41 = vcombine.high %v818_v33, %v822_v34 }
 0x190   : > { %3850 = vmatprep.subr.bf16.mxu1 %v5684_v42  ;;  %v950_v36 = vld [vmem:[%s6973_s14 + $0xca8] sm:$0xff] }
 0x191   : > { %3810 = vmatpush2.bf16.msra.mxu0 %v5555_v49  ;;  %v5884_v42 = vcombine.high %v946_v35, %v950_v36  ;;  %v810_v43 = vld [vmem:[%s6973_s14 + $0x848] sm:$0xff]  ;;  %v5755_v49 = vcombine.low %v818_v33, %v822_v34 }
 0x192   : > { %3811 = vmatprep.subr.bf16.mxu0 %v5548_v51  ;;  %v814_v44 = vld [vmem:[%s6973_s14 + $0x868] sm:$0xff] }
 0x193   : > { %3851 = vmatpush2.bf16.msra.mxu1 %v5683_v50  ;;  %v938_v46 = vld [vmem:[%s6973_s14 + $0xc48] sm:$0xff]  ;;  %v5883_v50 = vcombine.low %v946_v35, %v950_v36  ;;  %v5748_v51 = vcombine.high %v810_v43, %v814_v44 }
 0x194   : > { %3852 = vmatprep.subr.bf16.mxu1 %v5676_v52  ;;  %v942_v47 = vld [vmem:[%s6973_s14 + $0xc68] sm:$0xff] }
 0x195   : > { %3812 = vmatpush2.bf16.msra.mxu0 %v5547_v57  ;;  %v5876_v52 = vcombine.high %v938_v46, %v942_v47  ;;  %v802_v53 = vld [vmem:[%s6973_s14 + $0x808] sm:$0xff]  ;;  %v5747_v57 = vcombine.low %v810_v43, %v814_v44 }
 0x196   : > { %3863 = vmatprep.subr.bf16.mxu0 %v5796_v59  ;;  %v806_v54 = vld [vmem:[%s6973_s14 + $0x828] sm:$0xff] }
 0x197   : > { %3853 = vmatpush2.bf16.msra.mxu1 %v5675_v58  ;;  %v930_v55 = vld [vmem:[%s6973_s14 + $0xc08] sm:$0xff]  ;;  %v5875_v58 = vcombine.low %v938_v46, %v942_v47  ;;  %v5740_v59 = vcombine.high %v802_v53, %v806_v54 }
 0x198   : > { %3904 = vmatprep.subr.bf16.mxu1 %v5924_v60  ;;  %3814 = vmatmul.mubr.bf16.vlgmr.msra.gmra.mxu0 %v7106_v25  ;;  %v934_v56 = vld [vmem:[%s6973_s14 + $0xc28] sm:$0xff] }
 0x199   : > { %3864 = vmatpush1.bf16.msra.mxu0 %v5795_v1  ;;  %3895 = vmatprep.mubr.bf16.mxu0 %v7114_v37  ;;  %v5868_v60 = vcombine.high %v930_v55, %v934_v56  ;;  %v922_v61 = vld [vmem:[%s6973_s14 + $0xbc8] sm:$0xff]  ;;  %v5739_v1 = vcombine.low %v802_v53, %v806_v54 }
 0x19a   : > { %3855 = vmatmul.mubr.bf16.vlgmr.msra.gmra.mxu1 %v7110_v29  ;;  %3865 = vmatprep.subr.bf16.mxu0 %v5788_v5  ;;  %v926_v62 = vld [vmem:[%s6973_s14 + $0xbe8] sm:$0xff] }
 0x19b   : > { %3905 = vmatpush1.bf16.msra.mxu1 %v5923_v2  ;;  %3936 = vmatprep.mubr.bf16.mxu1 %v7119_v40  ;;  %v1050_v63 = vld [vmem:[%s6973_s14 + $0xfc8] sm:$0xff]  ;;  %v5867_v2 = vcombine.low %v930_v55, %v934_v56  ;;  %v5860_v5 = vcombine.high %v922_v61, %v926_v62 }
 0x19c   : > { %3906 = vmatprep.subr.bf16.mxu1 %v5916_v6  ;;  %v1054_v0 = vld [vmem:[%s6973_s14 + $0xfe8] sm:$0xff] }
 0x19d   : > { %3866 = vmatpush1.bf16.msra.mxu0 %v5787_v11  ;;  %v5988_v6 = vcombine.high %v1050_v63, %v1054_v0  ;;  %v914_v7 = vld [vmem:[%s6973_s14 + $0xb88] sm:$0xff]  ;;  %v5859_v11 = vcombine.low %v922_v61, %v926_v62 }
 0x19e   : > { %3867 = vmatprep.subr.bf16.mxu0 %v5780_v13  ;;  %v918_v8 = vld [vmem:[%s6973_s14 + $0xba8] sm:$0xff] }
 0x19f   : > { %3907 = vmatpush1.bf16.msra.mxu1 %v5915_v12  ;;  %v1042_v9 = vld [vmem:[%s6973_s14 + $0xf88] sm:$0xff]  ;;  %v5987_v12 = vcombine.low %v1050_v63, %v1054_v0  ;;  %v5852_v13 = vcombine.high %v914_v7, %v918_v8 }
 0x1a0   : > { %3908 = vmatprep.subr.bf16.mxu1 %v5908_v14  ;;  %v1046_v10 = vld [vmem:[%s6973_s14 + $0xfa8] sm:$0xff] }
 0x1a1   : > { %3868 = vmatpush1.bf16.msra.mxu0 %v5779_v19  ;;  %v5980_v14 = vcombine.high %v1042_v9, %v1046_v10  ;;  %v906_v15 = vld [vmem:[%s6973_s14 + $0xb48] sm:$0xff]  ;;  %v5851_v19 = vcombine.low %v914_v7, %v918_v8  ;;  %v603_v7 = vld [vmem:[%s6973_s14 + $0x1d0] sm:$0xff] }
 0x1a2   : > { %3869 = vmatprep.subr.bf16.mxu0 %v5772_v21  ;;  %v910_v16 = vld [vmem:[%s6973_s14 + $0xb68] sm:$0xff]  ;;  %v607_v8 = vld [vmem:[%s6973_s14 + $0x1f0] sm:$0xff] }
 0x1a3   : > { %3909 = vmatpush1.bf16.msra.mxu1 %v5907_v20  ;;  %v1034_v17 = vld [vmem:[%s6973_s14 + $0xf48] sm:$0xff]  ;;  %v5979_v20 = vcombine.low %v1042_v9, %v1046_v10  ;;  %v5844_v21 = vcombine.high %v906_v15, %v910_v16  ;;  %v731_v9 = vld [vmem:[%s6973_s14 + $0x5d0] sm:$0xff] }
 0x1a4   : > { %3910 = vmatprep.subr.bf16.mxu1 %v5900_v22  ;;  %v1038_v18 = vld [vmem:[%s6973_s14 + $0xf68] sm:$0xff]  ;;  %v735_v10 = vld [vmem:[%s6973_s14 + $0x5f0] sm:$0xff] }
 0x1a5   : > { %3870 = vmatpush1.bf16.msra.mxu0 %v5771_v28  ;;  %v5972_v22 = vcombine.high %v1034_v17, %v1038_v18  ;;  %v898_v23 = vld [vmem:[%s6973_s14 + $0xb08] sm:$0xff]  ;;  %v5843_v28 = vcombine.low %v906_v15, %v910_v16  ;;  %v595_v15 = vld [vmem:[%s6973_s14 + $0x190] sm:$0xff] }
 0x1a6   : > { %3871 = vmatprep.subr.bf16.mxu0 %v5764_v31  ;;  %v902_v24 = vld [vmem:[%s6973_s14 + $0xb28] sm:$0xff]  ;;  %v599_v16 = vld [vmem:[%s6973_s14 + $0x1b0] sm:$0xff] }
 0x1a7   : > { %3911 = vmatpush1.bf16.msra.mxu1 %v5899_v30  ;;  %v1026_v26 = vld [vmem:[%s6973_s14 + $0xf08] sm:$0xff]  ;;  %v5971_v30 = vcombine.low %v1034_v17, %v1038_v18  ;;  %v5836_v31 = vcombine.high %v898_v23, %v902_v24  ;;  %v723_v17 = vld [vmem:[%s6973_s14 + $0x590] sm:$0xff] }
 0x1a8   : > { %3912 = vmatprep.subr.bf16.mxu1 %v5892_v32  ;;  %v1030_v27 = vld [vmem:[%s6973_s14 + $0xf28] sm:$0xff]  ;;  %v727_v18 = vld [vmem:[%s6973_s14 + $0x5b0] sm:$0xff] }
 0x1a9   : > { %3872 = vmatpush1.bf16.msra.mxu0 %v5763_v38  ;;  %v5964_v32 = vcombine.high %v1026_v26, %v1030_v27  ;;  %v890_v33 = vld [vmem:[%s6973_s14 + $0xac8] sm:$0xff]  ;;  %v5835_v38 = vcombine.low %v898_v23, %v902_v24  ;;  %v587_v23 = vld [vmem:[%s6973_s14 + $0x150] sm:$0xff] }
 0x1aa   : > { %3873 = vmatprep.subr.bf16.mxu0 %v5756_v41  ;;  %v894_v34 = vld [vmem:[%s6973_s14 + $0xae8] sm:$0xff]  ;;  %v591_v24 = vld [vmem:[%s6973_s14 + $0x170] sm:$0xff] }
 0x1ab   : > { %3913 = vmatpush1.bf16.msra.mxu1 %v5891_v39  ;;  %v1018_v35 = vld [vmem:[%s6973_s14 + $0xec8] sm:$0xff]  ;;  %v5963_v39 = vcombine.low %v1026_v26, %v1030_v27  ;;  %v5828_v41 = vcombine.high %v890_v33, %v894_v34  ;;  %v715_v27 = vld [vmem:[%s6973_s14 + $0x550] sm:$0xff] }
 0x1ac   : > { %3914 = vmatprep.subr.bf16.mxu1 %v5884_v42  ;;  %v1022_v36 = vld [vmem:[%s6973_s14 + $0xee8] sm:$0xff] }
 0x1ad   : > { %3874 = vmatpush1.bf16.msra.mxu0 %v5755_v49  ;;  %v5956_v42 = vcombine.high %v1018_v35, %v1022_v36  ;;  %v882_v43 = vld [vmem:[%s6973_s14 + $0xa88] sm:$0xff]  ;;  %v5827_v49 = vcombine.low %v890_v33, %v894_v34  ;;  %v5661_v33 = vcombine.low %v723_v17, %v727_v18  ;;  %v5526_v34 = vcombine.high %v587_v23, %v591_v24 }
 0x1ae   : > { %3875 = vmatprep.subr.bf16.mxu0 %v5748_v51  ;;  %v886_v44 = vld [vmem:[%s6973_s14 + $0xaa8] sm:$0xff] }
 0x1af   : > { %3915 = vmatpush1.bf16.msra.mxu1 %v5883_v50  ;;  %v1010_v46 = vld [vmem:[%s6973_s14 + $0xe88] sm:$0xff]  ;;  %v5955_v50 = vcombine.low %v1018_v35, %v1022_v36  ;;  %v5820_v51 = vcombine.high %v882_v43, %v886_v44 }
 0x1b0   : > { %3916 = vmatprep.subr.bf16.mxu1 %v5876_v52  ;;  %v1014_v47 = vld [vmem:[%s6973_s14 + $0xea8] sm:$0xff] }
 0x1b1   : > { %3876 = vmatpush1.bf16.msra.mxu0 %v5747_v57  ;;  %v5948_v52 = vcombine.high %v1010_v46, %v1014_v47  ;;  %v874_v53 = vld [vmem:[%s6973_s14 + $0xa48] sm:$0xff]  ;;  %v5819_v57 = vcombine.low %v882_v43, %v886_v44  ;;  %v711_v43 = vld [vmem:[%s6973_s14 + $0x530] sm:$0xff] }
 0x1b2   : > { %3877 = vmatprep.subr.bf16.mxu0 %v5740_v59  ;;  %v878_v54 = vld [vmem:[%s6973_s14 + $0xa68] sm:$0xff] }
 0x1b3   : > { %3917 = vmatpush1.bf16.msra.mxu1 %v5875_v58  ;;  %v1002_v55 = vld [vmem:[%s6973_s14 + $0xe48] sm:$0xff]  ;;  %v5947_v58 = vcombine.low %v1010_v46, %v1014_v47  ;;  %v5812_v59 = vcombine.high %v874_v53, %v878_v54  ;;  %v5525_v46 = vcombine.low %v587_v23, %v591_v24  ;;  %v667_v23 = vld [vmem:[%s6973_s14 + $0x3d0] sm:$0xff] }
 0x1b4   : > { %3918 = vmatprep.subr.bf16.mxu1 %v5868_v60  ;;  %v1006_v56 = vld [vmem:[%s6973_s14 + $0xe68] sm:$0xff]  ;;  %v671_v24 = vld [vmem:[%s6973_s14 + $0x3f0] sm:$0xff] }
 0x1b5   : > { %3878 = vmatpush1.bf16.msra.mxu0 %v5739_v1  ;;  %v5940_v60 = vcombine.high %v1002_v55, %v1006_v56  ;;  %v866_v61 = vld [vmem:[%s6973_s14 + $0xa08] sm:$0xff]  ;;  %v5811_v1 = vcombine.low %v874_v53, %v878_v54  ;;  %v571_v53 = vld [vmem:[%s6973_s14 + $0xd0] sm:$0xff] }
 0x1b6   : > { %3879 = vmatprep.subr.bf16.mxu0 %v5860_v5  ;;  %v870_v62 = vld [vmem:[%s6973_s14 + $0xa28] sm:$0xff]  ;;  %v575_v54 = vld [vmem:[%s6973_s14 + $0xf0] sm:$0xff] }
 0x1b7   : > { %3919 = vmatpush1.bf16.msra.mxu1 %v5867_v2  ;;  %v994_v63 = vld [vmem:[%s6973_s14 + $0xe08] sm:$0xff]  ;;  %v5939_v2 = vcombine.low %v1002_v55, %v1006_v56  ;;  %v5804_v5 = vcombine.high %v866_v61, %v870_v62  ;;  %v699_v55 = vld [vmem:[%s6973_s14 + $0x4d0] sm:$0xff] }
 0x1b8   : > { %3920 = vmatprep.subr.bf16.mxu1 %v5988_v6  ;;  %v998_v0 = vld [vmem:[%s6973_s14 + $0xe28] sm:$0xff]  ;;  %v703_v56 = vld [vmem:[%s6973_s14 + $0x4f0] sm:$0xff] }
 0x1b9   : > { %3880 = vmatpush2.bf16.msra.mxu0 %v5859_v11  ;;  %v5932_v6 = vcombine.high %v994_v63, %v998_v0  ;;  %v5803_v11 = vcombine.low %v866_v61, %v870_v62  ;;  %v563_v61 = vld [vmem:[%s6973_s14 + $0x90] sm:$0xff] }
 0x1ba   : > { %3881 = vmatprep.subr.bf16.mxu0 %v5852_v13  ;;  %v5542_v13 = vcombine.high %v603_v7, %v607_v8  ;;  %v567_v62 = vld [vmem:[%s6973_s14 + $0xb0] sm:$0xff] }
 0x1bb   : > { %3921 = vmatpush2.bf16.msra.mxu1 %v5987_v12  ;;  %v5931_v12 = vcombine.low %v994_v63, %v998_v0  ;;  %v691_v63 = vld [vmem:[%s6973_s14 + $0x490] sm:$0xff] }
 0x1bc   : > { %3922 = vmatprep.subr.bf16.mxu1 %v5980_v14  ;;  %v5670_v14 = vcombine.high %v731_v9, %v735_v10  ;;  %v695_v0 = vld [vmem:[%s6973_s14 + $0x4b0] sm:$0xff] }
 0x1bd   : > { %3882 = vmatpush2.bf16.msra.mxu0 %v5851_v19  ;;  %v5541_v19 = vcombine.low %v603_v7, %v607_v8  ;;  %v555_v7 = vld [vmem:[%s6973_s14 + $0x50] sm:$0xff] }
 0x1be   : > { %3883 = vmatprep.subr.bf16.mxu0 %v5844_v21  ;;  %v5534_v21 = vcombine.high %v595_v15, %v599_v16  ;;  %v559_v8 = vld [vmem:[%s6973_s14 + $0x70] sm:$0xff] }
 0x1bf   : > { %3923 = vmatpush2.bf16.msra.mxu1 %v5979_v20  ;;  %v5669_v20 = vcombine.low %v731_v9, %v735_v10  ;;  %v683_v9 = vld [vmem:[%s6973_s14 + $0x450] sm:$0xff] }
 0x1c0   : > { %3924 = vmatprep.subr.bf16.mxu1 %v5972_v22  ;;  %v5662_v22 = vcombine.high %v723_v17, %v727_v18  ;;  %v687_v10 = vld [vmem:[%s6973_s14 + $0x470] sm:$0xff] }
 0x1c1   : > { %3884 = vmatpush2.bf16.msra.mxu0 %v5843_v28  ;;  %v719_v28 = vld [vmem:[%s6973_s14 + $0x570] sm:$0xff] }
 0x1c2   : > { %3885 = vmatprep.subr.bf16.mxu0 %v5836_v31  ;;  %v5533_v31 = vcombine.low %v595_v15, %v599_v16  ;;  %v5654_v36 = vcombine.high %v715_v27, %v719_v28  ;;  %v547_v15 = vld [vmem:[%s6973_s14 + $0x10] sm:$0xff] }
 0x1c3   : > { %3925 = vmatpush2.bf16.msra.mxu1 %v5971_v30  ;;  %v551_v16 = vld [vmem:[%s6973_s14 + $0x30] sm:$0xff] }
 0x1c4   : > { %3926 = vmatprep.subr.bf16.mxu1 %v5964_v32  ;;  %v675_v17 = vld [vmem:[%s6973_s14 + $0x410] sm:$0xff] }
 0x1c5   : > { %3886 = vmatpush2.bf16.msra.mxu0 %v5835_v38  ;;  %v579_v38 = vld [vmem:[%s6973_s14 + $0x110] sm:$0xff] }
 0x1c6   : > { %3887 = vmatprep.subr.bf16.mxu0 %v5828_v41  ;;  %v679_v18 = vld [vmem:[%s6973_s14 + $0x430] sm:$0xff] }
 0x1c7   : > { %3927 = vmatpush2.bf16.msra.mxu1 %v5963_v39  ;;  %v583_v39 = vld [vmem:[%s6973_s14 + $0x130] sm:$0xff] }
 0x1c8   : > { %3928 = vmatprep.subr.bf16.mxu1 %v5956_v42  ;;  %v707_v42 = vld [vmem:[%s6973_s14 + $0x510] sm:$0xff] }
 0x1c9   : > { %3888 = vmatpush2.bf16.msra.mxu0 %v5827_v49  ;;  %v5653_v49 = vcombine.low %v715_v27, %v719_v28  ;;  %v795_v27 = vld [vmem:[%s6973_s14 + $0x7d0] sm:$0xff] }
 0x1ca   : > { %3889 = vmatprep.subr.bf16.mxu0 %v5820_v51  ;;  %v799_v28 = vld [vmem:[%s6973_s14 + $0x7f0] sm:$0xff] }
 0x1cb   : > { %3929 = vmatpush2.bf16.msra.mxu1 %v5955_v50  ;;  %v5518_v50 = vcombine.high %v579_v38, %v583_v39 }
 0x1cc   : > { %3930 = vmatprep.subr.bf16.mxu1 %v5948_v52  ;;  %v5646_v52 = vcombine.high %v707_v42, %v711_v43 }
 0x1cd   : > { %3890 = vmatpush2.bf16.msra.mxu0 %v5819_v57  ;;  %v5517_v57 = vcombine.low %v579_v38, %v583_v39  ;;  %v659_v38 = vld [vmem:[%s6973_s14 + $0x390] sm:$0xff] }
 0x1ce   : > { %3891 = vmatprep.subr.bf16.mxu0 %v5812_v59  ;;  %v5510_v59 = vcombine.high %v571_v53, %v575_v54  ;;  %v663_v39 = vld [vmem:[%s6973_s14 + $0x3b0] sm:$0xff] }
 0x1cf   : > { %3931 = vmatpush2.bf16.msra.mxu1 %v5947_v58  ;;  %v5645_v58 = vcombine.low %v707_v42, %v711_v43  ;;  %v791_v42 = vld [vmem:[%s6973_s14 + $0x7b0] sm:$0xff]  ;;  %v5605_v43 = vcombine.low %v667_v23, %v671_v24 }
 0x1d0   : > { %3932 = vmatprep.subr.bf16.mxu1 %v5940_v60  ;;  %v5638_v60 = vcombine.high %v699_v55, %v703_v56 }
 0x1d1   : > { %3892 = vmatpush2.bf16.msra.mxu0 %v5811_v1  ;;  %v5509_v1 = vcombine.low %v571_v53, %v575_v54  ;;  %v5597_v53 = vcombine.low %v659_v38, %v663_v39 }
 0x1d2   : > { %3893 = vmatprep.subr.bf16.mxu0 %v5804_v5  ;;  %v5502_v5 = vcombine.high %v563_v61, %v567_v62 }
 0x1d3   : > { %3933 = vmatpush2.bf16.msra.mxu1 %v5939_v2  ;;  %v5637_v2 = vcombine.low %v699_v55, %v703_v56 }
 0x1d4   : > { %3934 = vmatprep.subr.bf16.mxu1 %v5932_v6  ;;  %v5630_v6 = vcombine.high %v691_v63, %v695_v0 }
 0x1d5   : > { %3894 = vmatpush2.bf16.msra.mxu0 %v5803_v11  ;;  %v5501_v11 = vcombine.low %v563_v61, %v567_v62 }
 0x1d6   : > { %3945 = vmatprep.subr.bf16.mxu0 %v5542_v13  ;;  %v5494_v13 = vcombine.high %v555_v7, %v559_v8 }
 0x1d7   : > { %3935 = vmatpush2.bf16.msra.mxu1 %v5931_v12  ;;  %v7326_v26 = vpop.f32.mrf.mxu0  ;;  %v5629_v12 = vcombine.low %v691_v63, %v695_v0 }
 0x1d8   : > { %3986 = vmatprep.subr.bf16.mxu1 %v5670_v14  ;;  %3896 = vmatmul.mubr.bf16.vlgmr.msra.gmra.mxu0 %v7182_v45  ;;  %v5622_v14 = vcombine.high %v683_v9, %v687_v10 }
 0x1d9   : > { %v7331_v30 = vpop.f32.mrf.mxu1  ;;  %3946 = vmatpush1.bf16.msra.mxu0 %v5541_v19  ;;  %v7334_v32 = vpop.f32.mrf.mxu0  ;;  %3977 = vmatprep.mubr.bf16.mxu0 %v7060_v3  ;;  %v5493_v19 = vcombine.low %v555_v7, %v559_v8 }
 0x1da   : > { %3937 = vmatmul.mubr.bf16.vlgmr.msra.gmra.mxu1 %v7186_v48  ;;  %3947 = vmatprep.subr.bf16.mxu0 %v5534_v21  ;;  %v5486_v21 = vcombine.high %v547_v15, %v551_v16 }
 0x1db   : > { %3987 = vmatpush1.bf16.msra.mxu1 %v5669_v20  ;;  %v7336_v35 = vpop.f32.mrf.mxu1  ;;  %v3655_v41 = vpop.f32.mrf.mxu0  ;;  %4018 = vmatprep.mubr.bf16.mxu1 %v7062_v4  ;;  %v5621_v20 = vcombine.low %v683_v9, %v687_v10 }
 0x1dc   : > { %3988 = vmatprep.subr.bf16.mxu1 %v5662_v22  ;;  %v5614_v22 = vcombine.high %v675_v17, %v679_v18  ;;  %v787_v41 = vld [vmem:[%s6973_s14 + $0x790] sm:$0xff] }
 0x1dd   : > { %v3696_v44 = vpop.f32.mrf.mxu1  ;;  %3948 = vmatpush1.bf16.msra.mxu0 %v5533_v31  ;;  %v3656_v47 = vpop.f32.mrf.mxu0  ;;  %v5485_v31 = vcombine.low %v547_v15, %v551_v16  ;;  %v5725_v54 = vcombine.low %v787_v41, %v791_v42 }
 0x1de   : > { %3949 = vmatprep.subr.bf16.mxu0 %v5526_v34  ;;  %v5606_v34 = vcombine.high %v667_v23, %v671_v24  ;;  %v5733_v44 = vcombine.low %v795_v27, %v799_v28  ;;  %v5726_v47 = vcombine.high %v787_v41, %v791_v42 }
 0x1df   : > { %3989 = vmatpush1.bf16.msra.mxu1 %v5661_v33  ;;  %v3697_v51 = vpop.f32.mrf.mxu1  ;;  %v5613_v33 = vcombine.low %v675_v17, %v679_v18 }
 0x1e0   : > { %3990 = vmatprep.subr.bf16.mxu1 %v5654_v36  ;;  %v5734_v36 = vcombine.high %v795_v27, %v799_v28  ;;  %v779_v51 = vld [vmem:[%s6973_s14 + $0x750] sm:$0xff] }
 0x1e1   : > { %3950 = vmatpush1.bf16.msra.mxu0 %v5525_v46  ;;  %v5598_v46 = vcombine.high %v659_v38, %v663_v39  ;;  %v4275_v38 = vlaneseq }
 0x1e2   : > { %3951 = vmatprep.subr.bf16.mxu0 %v5518_v50  ;;  %v655_v50 = vld [vmem:[%s6973_s14 + $0x370] sm:$0xff] }
 0x1e3   : > { %3991 = vmatpush1.bf16.msra.mxu1 %v5653_v49  ;;  %v651_v49 = vld [vmem:[%s6973_s14 + $0x350] sm:$0xff] }
 0x1e4   : > { %3992 = vmatprep.subr.bf16.mxu1 %v5646_v52  ;;  %v783_v52 = vld [vmem:[%s6973_s14 + $0x770] sm:$0xff]  ;;  %v5590_v55 = vcombine.high %v651_v49, %v655_v50  ;;  %v5589_v61 = vcombine.low %v651_v49, %v655_v50 }
 0x1e5   : > { %3952 = vmatpush1.bf16.msra.mxu0 %v5517_v57  ;;  %v5718_v56 = vcombine.high %v779_v51, %v783_v52  ;;  %v643_v57 = vld [vmem:[%s6973_s14 + $0x310] sm:$0xff]  ;;  %v5717_v62 = vcombine.low %v779_v51, %v783_v52 }
 0x1e6   : > { %3953 = vmatprep.subr.bf16.mxu0 %v5510_v59  ;;  %v771_v59 = vld [vmem:[%s6973_s14 + $0x710] sm:$0xff] }
 0x1e7   : > { %3993 = vmatpush1.bf16.msra.mxu1 %v5645_v58  ;;  %v647_v58 = vld [vmem:[%s6973_s14 + $0x330] sm:$0xff] }
 0x1e8   : > { %3994 = vmatprep.subr.bf16.mxu1 %v5638_v60  ;;  %v775_v60 = vld [vmem:[%s6973_s14 + $0x730] sm:$0xff]  ;;  %v5582_v63 = vcombine.high %v643_v57, %v647_v58  ;;  %v5581_v7 = vcombine.low %v643_v57, %v647_v58 }
 0x1e9   : > { %3954 = vmatpush1.bf16.msra.mxu0 %v5509_v1  ;;  %v5710_v0 = vcombine.high %v771_v59, %v775_v60  ;;  %v635_v1 = vld [vmem:[%s6973_s14 + $0x2d0] sm:$0xff]  ;;  %v5709_v8 = vcombine.low %v771_v59, %v775_v60  ;;  %v7404_v60 = vld [vmem:[%s6980_s21] sm:$0xff] }
 0x1ea   : > { %3955 = vmatprep.subr.bf16.mxu0 %v5502_v5  ;;  %v763_v5 = vld [vmem:[%s6973_s14 + $0x6d0] sm:$0xff] }
 0x1eb   : > { %3995 = vmatpush1.bf16.msra.mxu1 %v5637_v2  ;;  %v639_v2 = vld [vmem:[%s6973_s14 + $0x2f0] sm:$0xff] }
 0x1ec   : > { %3996 = vmatprep.subr.bf16.mxu1 %v5630_v6  ;;  %v767_v6 = vld [vmem:[%s6973_s14 + $0x6f0] sm:$0xff]  ;;  %v5574_v9 = vcombine.high %v635_v1, %v639_v2  ;;  %v5573_v15 = vcombine.low %v635_v1, %v639_v2  ;;  %v3693_v1 = vadd.f32 %v7331_v30, %v7326_v26 }
 0x1ed   : > { %3956 = vmatpush1.bf16.msra.mxu0 %v5501_v11  ;;  %v5702_v10 = vcombine.high %v763_v5, %v767_v6  ;;  %v627_v11 = vld [vmem:[%s6973_s14 + $0x290] sm:$0xff]  ;;  %v5701_v16 = vcombine.low %v763_v5, %v767_v6 }
 0x1ee   : > { %3957 = vmatprep.subr.bf16.mxu0 %v5494_v13  ;;  %v755_v13 = vld [vmem:[%s6973_s14 + $0x690] sm:$0xff] }
 0x1ef   : > { %3997 = vmatpush1.bf16.msra.mxu1 %v5629_v12  ;;  %v631_v12 = vld [vmem:[%s6973_s14 + $0x2b0] sm:$0xff] }
 0x1f0   : > { %3998 = vmatprep.subr.bf16.mxu1 %v5622_v14  ;;  %v759_v14 = vld [vmem:[%s6973_s14 + $0x6b0] sm:$0xff]  ;;  %v5566_v17 = vcombine.high %v627_v11, %v631_v12  ;;  %v5565_v23 = vcombine.low %v627_v11, %v631_v12 }
 0x1f1   : > { %3958 = vmatpush1.bf16.msra.mxu0 %v5493_v19  ;;  %v5694_v18 = vcombine.high %v755_v13, %v759_v14  ;;  %v619_v19 = vld [vmem:[%s6973_s14 + $0x250] sm:$0xff]  ;;  %v5693_v24 = vcombine.low %v755_v13, %v759_v14  ;;  %v3695_v13 = vadd.f32 %v7336_v35, %v7334_v32 }
 0x1f2   : > { %3959 = vmatprep.subr.bf16.mxu0 %v5486_v21  ;;  %v747_v21 = vld [vmem:[%s6973_s14 + $0x650] sm:$0xff] }
 0x1f3   : > { %3999 = vmatpush1.bf16.msra.mxu1 %v5621_v20  ;;  %v623_v20 = vld [vmem:[%s6973_s14 + $0x270] sm:$0xff] }
 0x1f4   : > { %4000 = vmatprep.subr.bf16.mxu1 %v5614_v22  ;;  %v751_v22 = vld [vmem:[%s6973_s14 + $0x670] sm:$0xff]  ;;  %v5558_v27 = vcombine.high %v619_v19, %v623_v20  ;;  %v5557_v39 = vcombine.low %v619_v19, %v623_v20 }
 0x1f5   : > { %3960 = vmatpush1.bf16.msra.mxu0 %v5485_v31  ;;  %v5686_v28 = vcombine.high %v747_v21, %v751_v22  ;;  %v611_v31 = vld [vmem:[%s6973_s14 + $0x210] sm:$0xff]  ;;  %v5685_v41 = vcombine.low %v747_v21, %v751_v22 }
 0x1f6   : > { %3961 = vmatprep.subr.bf16.mxu0 %v5606_v34  ;;  %v739_v34 = vld [vmem:[%s6973_s14 + $0x610] sm:$0xff] }
 0x1f7   : > { %4001 = vmatpush1.bf16.msra.mxu1 %v5613_v33  ;;  %v615_v33 = vld [vmem:[%s6973_s14 + $0x230] sm:$0xff] }
 0x1f8   : > { %4002 = vmatprep.subr.bf16.mxu1 %v5734_v36  ;;  %v743_v36 = vld [vmem:[%s6973_s14 + $0x630] sm:$0xff]  ;;  %v5550_v42 = vcombine.high %v611_v31, %v615_v33  ;;  %v5549_v51 = vcombine.low %v611_v31, %v615_v33 }
 0x1f9   : > { %3962 = vmatpush2.bf16.msra.mxu0 %v5605_v43  ;;  %v5678_v43 = vcombine.high %v739_v34, %v743_v36  ;;  %v987_v49 = vld [vmem:[%s6973_s14 + $0xdd0] sm:$0xff]  ;;  %v5677_v52 = vcombine.low %v739_v34, %v743_v36 }
 0x1fa   : > { %3963 = vmatprep.subr.bf16.mxu0 %v5598_v46  ;;  %v863_v46 = vld [vmem:[%s6973_s14 + $0x9f0] sm:$0xff] }
 0x1fb   : > { %4003 = vmatpush2.bf16.msra.mxu1 %v5733_v44  ;;  %v859_v44 = vld [vmem:[%s6973_s14 + $0x9d0] sm:$0xff] }
 0x1fc   : > { %4004 = vmatprep.subr.bf16.mxu1 %v5726_v47  ;;  %v7394_v47 = vshrl.u32 %v4275_v38, 7  ;;  %v991_v50 = vld [vmem:[%s6973_s14 + $0xdf0] sm:$0xff] }
 0x1fd   : > { %3964 = vmatpush2.bf16.msra.mxu0 %v5597_v53  ;;  %v5798_v53 = vcombine.high %v859_v44, %v863_v46  ;;  %v979_v58 = vld [vmem:[%s6973_s14 + $0xd90] sm:$0xff] }
 0x1fe   : > { %3965 = vmatprep.subr.bf16.mxu0 %v5590_v55  ;;  %v851_v55 = vld [vmem:[%s6973_s14 + $0x990] sm:$0xff]  ;;  %v4277_v57 = vsub.s32 0, %v7394_v47 }
 0x1ff   : > { %4005 = vmatpush2.bf16.msra.mxu1 %v5725_v54  ;;  %v5926_v54 = vcombine.high %v987_v49, %v991_v50  ;;  %v983_v59 = vld [vmem:[%s6973_s14 + $0xdb0] sm:$0xff] }
 0x200   : > { %4006 = vmatprep.subr.bf16.mxu1 %v5718_v56  ;;  %v855_v56 = vld [vmem:[%s6973_s14 + $0x9b0] sm:$0xff]  ;;  %v5918_v5 = vcombine.high %v979_v58, %v983_v59  ;;  %v5917_v30 = vcombine.low %v979_v58, %v983_v59 }
 0x201   : > { %3966 = vmatpush2.bf16.msra.mxu0 %v5589_v61  ;;  %v5797_v61 = vcombine.low %v859_v44, %v863_v46  ;;  %v7410_v2 = vld [vmem:[%s6986_s16] sm:$0xff] }
 0x202   : > { %3967 = vmatprep.subr.bf16.mxu0 %v5582_v63  ;;  %v4281_v63 = vsub.s32 1, %v7394_v47  ;;  %v843_v6 = vld [vmem:[%s6973_s14 + $0x950] sm:$0xff] }
 0x203   : > { %4007 = vmatpush2.bf16.msra.mxu1 %v5717_v62  ;;  %v5925_v62 = vcombine.low %v987_v49, %v991_v50  ;;  %v971_v11 = vld [vmem:[%s6973_s14 + $0xd50] sm:$0xff] }
 0x204   : > { %4008 = vmatprep.subr.bf16.mxu1 %v5710_v0  ;;  %v5790_v0 = vcombine.high %v851_v55, %v855_v56  ;;  %v975_v12 = vld [vmem:[%s6973_s14 + $0xd70] sm:$0xff]  ;;  %v4332_v33 = vrot.slane %v7410_v2, %v4281_v63 }
 0x205   : > { %3968 = vmatpush2.bf16.msra.mxu0 %v5581_v7  ;;  %v847_v7 = vld [vmem:[%s6973_s14 + $0x970] sm:$0xff]  ;;  %v5910_v20 = vcombine.high %v971_v11, %v975_v12 }
 0x206   : > { %3969 = vmatprep.subr.bf16.mxu0 %v5574_v9  ;;  %v4278_v9 = vrot.slane %v7404_v60, %v4277_v57  ;;  %v835_v21 = vld [vmem:[%s6973_s14 + $0x910] sm:$0xff]  ;;  %v5781_v36 = vcombine.low %v843_v6, %v847_v7 }
 0x207   : > { %4009 = vmatpush2.bf16.msra.mxu1 %v5709_v8  ;;  %v839_v22 = vld [vmem:[%s6973_s14 + $0x930] sm:$0xff] }
 0x208   : > { %4010 = vmatprep.subr.bf16.mxu1 %v5702_v10  ;;  %v5789_v10 = vcombine.low %v851_v55, %v855_v56  ;;  %v827_v49 = vld [vmem:[%s6973_s14 + $0x8d0] sm:$0xff]  ;;  %v5773_v55 = vcombine.low %v835_v21, %v839_v22 }
 0x209   : > { %3970 = vmatpush2.bf16.msra.mxu0 %v5573_v15  ;;  %v4328_v15 = vrot.slane %v7410_v2, %v4277_v57  ;;  %v831_v50 = vld [vmem:[%s6973_s14 + $0x8f0] sm:$0xff] }
 0x20a   : > { %3971 = vmatprep.subr.bf16.mxu0 %v5566_v17  ;;  %v4282_v17 = vrot.slane %v7404_v60, %v4281_v63  ;;  %v5766_v57 = vcombine.high %v827_v49, %v831_v50  ;;  %v947_v63 = vld [vmem:[%s6973_s14 + $0xc90] sm:$0xff] }
 0x20b   : > { %4011 = vmatpush2.bf16.msra.mxu1 %v5701_v16 }
 0x20c   : > { %4012 = vmatprep.subr.bf16.mxu1 %v5694_v18  ;;  %v5782_v18 = vcombine.high %v843_v6, %v847_v7 }
 0x20d   : > { %3972 = vmatpush2.bf16.msra.mxu0 %v5565_v23 }
 0x20e   : > { %3973 = vmatprep.subr.bf16.mxu0 %v5558_v27  ;;  %v967_v27 = vld [vmem:[%s6973_s14 + $0xd30] sm:$0xff] }
 0x20f   : > { %4013 = vmatpush2.bf16.msra.mxu1 %v5693_v24  ;;  %v963_v24 = vld [vmem:[%s6973_s14 + $0xd10] sm:$0xff] }
 0x210   : > { %4014 = vmatprep.subr.bf16.mxu1 %v5686_v28  ;;  %v5902_v46 = vcombine.high %v963_v24, %v967_v27  ;;  %v5901_v56 = vcombine.low %v963_v24, %v967_v27 }
 0x211   : > { %3974 = vmatpush2.bf16.msra.mxu0 %v5557_v39  ;;  %v5909_v39 = vcombine.low %v971_v11, %v975_v12  ;;  %v943_v11 = vld [vmem:[%s6973_s14 + $0xc70] sm:$0xff] }
 0x212   : > { %3975 = vmatprep.subr.bf16.mxu0 %v5550_v42 }
 0x213   : > { %4015 = vmatpush2.bf16.msra.mxu1 %v5685_v41  ;;  %v5774_v41 = vcombine.high %v835_v21, %v839_v22  ;;  %v927_v21 = vld [vmem:[%s6973_s14 + $0xbf0] sm:$0xff] }
 0x214   : > { %4016 = vmatprep.subr.bf16.mxu1 %v5678_v43  ;;  %v1051_v22 = vld [vmem:[%s6973_s14 + $0xfd0] sm:$0xff] }
 0x215   : > { %3976 = vmatpush2.bf16.msra.mxu0 %v5549_v51  ;;  %v955_v51 = vld [vmem:[%s6973_s14 + $0xcd0] sm:$0xff] }
 0x216   : > { %4027 = vmatprep.subr.bf16.mxu0 %v5798_v53 }
 0x217   : > { %4017 = vmatpush2.bf16.msra.mxu1 %v5677_v52  ;;  %v959_v52 = vld [vmem:[%s6973_s14 + $0xcf0] sm:$0xff] }
 0x218   : > { %4068 = vmatprep.subr.bf16.mxu1 %v5926_v54  ;;  %v3733_v8 = vpop.f32.mrf.mxu0  ;;  %3978 = vmatmul.mubr.bf16.vlgmr.msra.gmra.mxu0 %v7106_v25  ;;  %v5894_v59 = vcombine.high %v955_v51, %v959_v52 }
 0x219   : > { %v3734_v14 = vadd.f32 %v3733_v8, %v3693_v1  ;;  %4028 = vmatpush1.bf16.msra.mxu0 %v5797_v61  ;;  %4059 = vmatprep.mubr.bf16.mxu0 %v7114_v37  ;;  %v819_v61 = vld [vmem:[%s6973_s14 + $0x890] sm:$0xff]  ;;  %v5765_v1 = vcombine.low %v827_v49, %v831_v50 }
 0x21a   : > { %v3774_v26 = vpop.f32.mrf.mxu1  ;;  %4019 = vmatmul.mubr.bf16.vlgmr.msra.gmra.mxu1 %v7110_v29  ;;  %v3735_v16 = vpop.f32.mrf.mxu0  ;;  %4029 = vmatprep.subr.bf16.mxu0 %v5790_v0  ;;  %v951_v0 = vld [vmem:[%s6973_s14 + $0xcb0] sm:$0xff] }
 0x21b   : > { %4069 = vmatpush1.bf16.msra.mxu1 %v5925_v62  ;;  %v3775_v19 = vadd.f32 %v3774_v26, %v3734_v14  ;;  %v3736_v32 = vadd.f32 %v3735_v16, %v3695_v13  ;;  %4100 = vmatprep.mubr.bf16.mxu1 %v7119_v40  ;;  %v823_v62 = vld [vmem:[%s6973_s14 + $0x8b0] sm:$0xff]  ;;  %v5886_v7 = vcombine.high %v947_v63, %v951_v0 }
 0x21c   : > { %v3776_v35 = vpop.f32.mrf.mxu1  ;;  %4070 = vmatprep.subr.bf16.mxu1 %v5918_v5  ;;  %v3737_v23 = vpop.f32.mrf.mxu0  ;;  %v5893_v5 = vcombine.low %v955_v51, %v959_v52  ;;  %v5758_v6 = vcombine.high %v819_v61, %v823_v62  ;;  %v811_v8 = vld [vmem:[%s6973_s14 + $0x850] sm:$0xff]  ;;  %v5757_v12 = vcombine.low %v819_v61, %v823_v62  ;;  %v5885_v13 = vcombine.low %v947_v63, %v951_v0 }
 0x21d   : > { %v4315_v28 = vmul.f32 %v4278_v9, %v3775_v19  ;;  %v3777_v31 = vadd.f32 %v3776_v35, %v3736_v32  ;;  %4030 = vmatpush1.bf16.msra.mxu0 %v5789_v10  ;;  %v815_v9 = vld [vmem:[%s6973_s14 + $0x870] sm:$0xff] }
 0x21e   : > { %v3778_v34 = vpop.f32.mrf.mxu1  ;;  %v3738_v38 = vpop.f32.mrf.mxu0  ;;  %4031 = vmatprep.subr.bf16.mxu0 %v5782_v18  ;;  %v939_v10 = vld [vmem:[%s6973_s14 + $0xc50] sm:$0xff]  ;;  %v5750_v14 = vcombine.high %v811_v8, %v815_v9  ;;  %v5749_v18 = vcombine.low %v811_v8, %v815_v9 }
 0x21f   : > { %4071 = vmatpush1.bf16.msra.mxu1 %v5917_v30  ;;  %v4365_v42 = vadd.f32 %v4328_v15, %v4315_v28  ;;  %v4316_v43 = vmul.f32 %v4282_v17, %v3777_v31  ;;  %v5878_v26 = vcombine.high %v939_v10, %v943_v11  ;;  %v803_v30 = vld [vmem:[%s6973_s14 + $0x810] sm:$0xff]  ;;  %v5877_v19 = vcombine.low %v939_v10, %v943_v11 }
 0x220   : > { %v3779_v44 = vpop.f32.mrf.mxu1  ;;  %4072 = vmatprep.subr.bf16.mxu1 %v5910_v20  ;;  %v807_v15 = vld [vmem:[%s6973_s14 + $0x830] sm:$0xff] }
 0x221   : > { %v4373_v53 = vmax.f32 %v4365_v42, 0.0  ;;  %v4366_v54 = vadd.f32 %v4332_v33, %v4316_v43  ;;  %4032 = vmatpush1.bf16.msra.mxu0 %v5781_v36  ;;  %v931_v16 = vld [vmem:[%s6973_s14 + $0xc10] sm:$0xff]  ;;  %v5742_v32 = vcombine.high %v803_v30, %v807_v15  ;;  %v5741_v24 = vcombine.low %v803_v30, %v807_v15 }
 0x222   : > { %4033 = vmatprep.subr.bf16.mxu0 %v5774_v41  ;;  %v935_v17 = vld [vmem:[%s6973_s14 + $0xc30] sm:$0xff] }
 0x223   : > { %4073 = vmatpush1.bf16.msra.mxu1 %v5909_v39  ;;  %4381 = vst [vmem:[#allocation2 + $0x30] sm:$0xff] %v4373_v53  ;;  %v4374_v58 = vmax.f32 %v4366_v54, 0.0  ;;  %v5870_v35 = vcombine.high %v931_v16, %v935_v17  ;;  %v923_v20 = vld [vmem:[%s6973_s14 + $0xbd0] sm:$0xff]  ;;  %v5869_v27 = vcombine.low %v931_v16, %v935_v17 }
 0x224   : > { %4074 = vmatprep.subr.bf16.mxu1 %v5902_v46  ;;  %v1055_v23 = vld [vmem:[%s6973_s14 + $0xff0] sm:$0xff]  ;;  %v5862_v28 = vcombine.high %v923_v20, %v927_v21  ;;  %v5861_v39 = vcombine.low %v923_v20, %v927_v21 }
 0x225   : > { %4382 = vst [vmem:[#allocation2] sm:$0xff] %v4374_v58  ;;  %4034 = vmatpush1.bf16.msra.mxu0 %v5773_v55  ;;  %v5990_v31 = vcombine.high %v1051_v22, %v1055_v23  ;;  %v915_v33 = vld [vmem:[%s6973_s14 + $0xb90] sm:$0xff]  ;;  %v5989_v41 = vcombine.low %v1051_v22, %v1055_v23 }
 0x226   : > { %4035 = vmatprep.subr.bf16.mxu0 %v5766_v57  ;;  %v919_v34 = vld [vmem:[%s6973_s14 + $0xbb0] sm:$0xff] }
 0x227   : > { %4075 = vmatpush1.bf16.msra.mxu1 %v5901_v56  ;;  %v1043_v36 = vld [vmem:[%s6973_s14 + $0xf90] sm:$0xff]  ;;  %v5854_v42 = vcombine.high %v915_v33, %v919_v34  ;;  %v5853_v51 = vcombine.low %v915_v33, %v919_v34 }
 0x228   : > { %4076 = vmatprep.subr.bf16.mxu1 %v5894_v59  ;;  %v1047_v38 = vld [vmem:[%s6973_s14 + $0xfb0] sm:$0xff] }
 0x229   : > { %4036 = vmatpush1.bf16.msra.mxu0 %v5765_v1  ;;  %v5982_v43 = vcombine.high %v1043_v36, %v1047_v38  ;;  %v907_v44 = vld [vmem:[%s6973_s14 + $0xb50] sm:$0xff]  ;;  %v5981_v52 = vcombine.low %v1043_v36, %v1047_v38  ;;  %v604_v38 = vld [vmem:[%s6973_s14 + $0x1d8] sm:$0xff] }
 0x22a   : > { %4037 = vmatprep.subr.bf16.mxu0 %v5758_v6  ;;  %v911_v46 = vld [vmem:[%s6973_s14 + $0xb70] sm:$0xff] }
 0x22b   : > { %4077 = vmatpush1.bf16.msra.mxu1 %v5893_v5  ;;  %v1035_v49 = vld [vmem:[%s6973_s14 + $0xf50] sm:$0xff]  ;;  %v5846_v53 = vcombine.high %v907_v44, %v911_v46  ;;  %v5845_v59 = vcombine.low %v907_v44, %v911_v46 }
 0x22c   : > { %4078 = vmatprep.subr.bf16.mxu1 %v5886_v7  ;;  %v1039_v50 = vld [vmem:[%s6973_s14 + $0xf70] sm:$0xff] }
 0x22d   : > { %4038 = vmatpush1.bf16.msra.mxu0 %v5757_v12  ;;  %v5974_v54 = vcombine.high %v1035_v49, %v1039_v50  ;;  %v899_v55 = vld [vmem:[%s6973_s14 + $0xb10] sm:$0xff]  ;;  %v5973_v61 = vcombine.low %v1035_v49, %v1039_v50  ;;  %v596_v50 = vld [vmem:[%s6973_s14 + $0x198] sm:$0xff] }
 0x22e   : > { %4039 = vmatprep.subr.bf16.mxu0 %v5750_v14  ;;  %v903_v56 = vld [vmem:[%s6973_s14 + $0xb30] sm:$0xff] }
 0x22f   : > { %4079 = vmatpush1.bf16.msra.mxu1 %v5885_v13  ;;  %v1027_v57 = vld [vmem:[%s6973_s14 + $0xf10] sm:$0xff]  ;;  %v5838_v62 = vcombine.high %v899_v55, %v903_v56  ;;  %v5837_v7 = vcombine.low %v899_v55, %v903_v56 }
 0x230   : > { %4080 = vmatprep.subr.bf16.mxu1 %v5878_v26  ;;  %v1031_v58 = vld [vmem:[%s6973_s14 + $0xf30] sm:$0xff] }
 0x231   : > { %4040 = vmatpush1.bf16.msra.mxu0 %v5749_v18  ;;  %v5966_v63 = vcombine.high %v1027_v57, %v1031_v58  ;;  %v891_v0 = vld [vmem:[%s6973_s14 + $0xad0] sm:$0xff]  ;;  %v5965_v8 = vcombine.low %v1027_v57, %v1031_v58  ;;  %v588_v58 = vld [vmem:[%s6973_s14 + $0x158] sm:$0xff] }
 0x232   : > { %4041 = vmatprep.subr.bf16.mxu0 %v5742_v32  ;;  %v895_v1 = vld [vmem:[%s6973_s14 + $0xaf0] sm:$0xff] }
 0x233   : > { %4081 = vmatpush1.bf16.msra.mxu1 %v5877_v19  ;;  %v1019_v5 = vld [vmem:[%s6973_s14 + $0xed0] sm:$0xff]  ;;  %v5830_v9 = vcombine.high %v891_v0, %v895_v1  ;;  %v5829_v26 = vcombine.low %v891_v0, %v895_v1 }
 0x234   : > { %4082 = vmatprep.subr.bf16.mxu1 %v5870_v35  ;;  %v1023_v6 = vld [vmem:[%s6973_s14 + $0xef0] sm:$0xff] }
 0x235   : > { %4042 = vmatpush1.bf16.msra.mxu0 %v5741_v24  ;;  %v5958_v10 = vcombine.high %v1019_v5, %v1023_v6  ;;  %v883_v11 = vld [vmem:[%s6973_s14 + $0xa90] sm:$0xff]  ;;  %v5957_v30 = vcombine.low %v1019_v5, %v1023_v6 }
 0x236   : > { %4043 = vmatprep.subr.bf16.mxu0 %v5862_v28  ;;  %v887_v12 = vld [vmem:[%s6973_s14 + $0xab0] sm:$0xff] }
 0x237   : > { %4083 = vmatpush1.bf16.msra.mxu1 %v5869_v27  ;;  %v1011_v13 = vld [vmem:[%s6973_s14 + $0xe90] sm:$0xff]  ;;  %v5822_v15 = vcombine.high %v883_v11, %v887_v12  ;;  %v5821_v35 = vcombine.low %v883_v11, %v887_v12  ;;  %v584_v11 = vld [vmem:[%s6973_s14 + $0x138] sm:$0xff] }
 0x238   : > { %4084 = vmatprep.subr.bf16.mxu1 %v5990_v31  ;;  %v1015_v14 = vld [vmem:[%s6973_s14 + $0xeb0] sm:$0xff] }
 0x239   : > { %4044 = vmatpush2.bf16.msra.mxu0 %v5861_v39  ;;  %v5950_v16 = vcombine.high %v1011_v13, %v1015_v14  ;;  %v875_v17 = vld [vmem:[%s6973_s14 + $0xa50] sm:$0xff]  ;;  %v5949_v20 = vcombine.low %v1011_v13, %v1015_v14  ;;  %v608_v39 = vld [vmem:[%s6973_s14 + $0x1f8] sm:$0xff] }
 0x23a   : > { %4045 = vmatprep.subr.bf16.mxu0 %v5854_v42  ;;  %v879_v18 = vld [vmem:[%s6973_s14 + $0xa70] sm:$0xff]  ;;  %v736_v42 = vld [vmem:[%s6973_s14 + $0x5f8] sm:$0xff]  ;;  %v5544_v46 = vcombine.high %v604_v38, %v608_v39 }
 0x23b   : > { %4085 = vmatpush2.bf16.msra.mxu1 %v5989_v41  ;;  %v1003_v19 = vld [vmem:[%s6973_s14 + $0xe50] sm:$0xff]  ;;  %v5814_v21 = vcombine.high %v875_v17, %v879_v18  ;;  %v5813_v31 = vcombine.low %v875_v17, %v879_v18  ;;  %v732_v41 = vld [vmem:[%s6973_s14 + $0x5d8] sm:$0xff] }
 0x23c   : > { %4086 = vmatprep.subr.bf16.mxu1 %v5982_v43  ;;  %v1007_v32 = vld [vmem:[%s6973_s14 + $0xe70] sm:$0xff]  ;;  %v5672_v49 = vcombine.high %v732_v41, %v736_v42  ;;  %v5671_v55 = vcombine.low %v732_v41, %v736_v42  ;;  %v708_v13 = vld [vmem:[%s6973_s14 + $0x518] sm:$0xff] }
 0x23d   : > { %4046 = vmatpush2.bf16.msra.mxu0 %v5853_v51  ;;  %v5942_v22 = vcombine.high %v1003_v19, %v1007_v32  ;;  %v867_v23 = vld [vmem:[%s6973_s14 + $0xa10] sm:$0xff]  ;;  %v5941_v33 = vcombine.low %v1003_v19, %v1007_v32  ;;  %v600_v51 = vld [vmem:[%s6973_s14 + $0x1b8] sm:$0xff] }
 0x23e   : > { %4047 = vmatprep.subr.bf16.mxu0 %v5846_v53  ;;  %v871_v24 = vld [vmem:[%s6973_s14 + $0xa30] sm:$0xff]  ;;  %v728_v53 = vld [vmem:[%s6973_s14 + $0x5b8] sm:$0xff]  ;;  %v5536_v56 = vcombine.high %v596_v50, %v600_v51  ;;  %v5535_v1 = vcombine.low %v596_v50, %v600_v51 }
 0x23f   : > { %4087 = vmatpush2.bf16.msra.mxu1 %v5981_v52  ;;  %v995_v27 = vld [vmem:[%s6973_s14 + $0xe10] sm:$0xff]  ;;  %v5806_v34 = vcombine.high %v867_v23, %v871_v24  ;;  %v5805_v43 = vcombine.low %v867_v23, %v871_v24  ;;  %v724_v52 = vld [vmem:[%s6973_s14 + $0x598] sm:$0xff] }
 0x240   : > { %4088 = vmatprep.subr.bf16.mxu1 %v5974_v54  ;;  %v999_v28 = vld [vmem:[%s6973_s14 + $0xe30] sm:$0xff]  ;;  %v5543_v54 = vcombine.low %v604_v38, %v608_v39  ;;  %v5664_v57 = vcombine.high %v724_v52, %v728_v53  ;;  %v5663_v6 = vcombine.low %v724_v52, %v728_v53  ;;  %v712_v14 = vld [vmem:[%s6973_s14 + $0x538] sm:$0xff] }
 0x241   : > { %4048 = vmatpush2.bf16.msra.mxu0 %v5845_v59  ;;  %v5934_v36 = vcombine.high %v995_v27, %v999_v28  ;;  %v5933_v44 = vcombine.low %v995_v27, %v999_v28  ;;  %v592_v59 = vld [vmem:[%s6973_s14 + $0x178] sm:$0xff] }
 0x242   : > { %4049 = vmatprep.subr.bf16.mxu0 %v5838_v62  ;;  %v716_v62 = vld [vmem:[%s6973_s14 + $0x558] sm:$0xff] }
 0x243   : > { %4089 = vmatpush2.bf16.msra.mxu1 %v5973_v61  ;;  %v572_v19 = vld [vmem:[%s6973_s14 + $0xd8] sm:$0xff] }
 0x244   : > { %4090 = vmatprep.subr.bf16.mxu1 %v5966_v63  ;;  %v720_v63 = vld [vmem:[%s6973_s14 + $0x578] sm:$0xff] }
 0x245   : > { %4050 = vmatpush2.bf16.msra.mxu0 %v5837_v7  ;;  %v5528_v7 = vcombine.high %v588_v58, %v592_v59  ;;  %v576_v32 = vld [vmem:[%s6973_s14 + $0xf8] sm:$0xff] }
 0x246   : > { %4051 = vmatprep.subr.bf16.mxu0 %v5830_v9  ;;  %v5656_v9 = vcombine.high %v716_v62, %v720_v63  ;;  %v564_v24 = vld [vmem:[%s6973_s14 + $0x98] sm:$0xff] }
 0x247   : > { %4091 = vmatpush2.bf16.msra.mxu1 %v5965_v8  ;;  %v568_v27 = vld [vmem:[%s6973_s14 + $0xb8] sm:$0xff] }
 0x248   : > { %4092 = vmatprep.subr.bf16.mxu1 %v5958_v10  ;;  %v580_v10 = vld [vmem:[%s6973_s14 + $0x118] sm:$0xff] }
 0x249   : > { %4052 = vmatpush2.bf16.msra.mxu0 %v5829_v26  ;;  %v5520_v17 = vcombine.high %v580_v10, %v584_v11  ;;  %v692_v28 = vld [vmem:[%s6973_s14 + $0x498] sm:$0xff] }
 0x24a   : > { %4053 = vmatprep.subr.bf16.mxu0 %v5822_v15  ;;  %v556_v39 = vld [vmem:[%s6973_s14 + $0x58] sm:$0xff] }
 0x24b   : > { %4093 = vmatpush2.bf16.msra.mxu1 %v5957_v30  ;;  %v5527_v30 = vcombine.low %v588_v58, %v592_v59  ;;  %v560_v41 = vld [vmem:[%s6973_s14 + $0x78] sm:$0xff] }
 0x24c   : > { %4094 = vmatprep.subr.bf16.mxu1 %v5950_v16  ;;  %v5655_v16 = vcombine.low %v716_v62, %v720_v63  ;;  %v684_v42 = vld [vmem:[%s6973_s14 + $0x458] sm:$0xff] }
 0x24d   : > { %4054 = vmatpush2.bf16.msra.mxu0 %v5821_v35  ;;  %v700_v35 = vld [vmem:[%s6973_s14 + $0x4d8] sm:$0xff] }
 0x24e   : > { %4055 = vmatprep.subr.bf16.mxu0 %v5814_v21  ;;  %v5647_v21 = vcombine.low %v708_v13, %v712_v14  ;;  %v548_v51 = vld [vmem:[%s6973_s14 + $0x18] sm:$0xff] }
 0x24f   : > { %4095 = vmatpush2.bf16.msra.mxu1 %v5949_v20  ;;  %v704_v20 = vld [vmem:[%s6973_s14 + $0x4f8] sm:$0xff] }
 0x250   : > { %4096 = vmatprep.subr.bf16.mxu1 %v5942_v22  ;;  %v5512_v22 = vcombine.high %v572_v19, %v576_v32  ;;  %v5640_v23 = vcombine.high %v700_v35, %v704_v20  ;;  %v552_v52 = vld [vmem:[%s6973_s14 + $0x38] sm:$0xff] }
 0x251   : > { %4056 = vmatpush2.bf16.msra.mxu0 %v5813_v31  ;;  %v696_v31 = vld [vmem:[%s6973_s14 + $0x4b8] sm:$0xff] }
 0x252   : > { %4057 = vmatprep.subr.bf16.mxu0 %v5806_v34  ;;  %v5639_v34 = vcombine.low %v700_v35, %v704_v20  ;;  %v5632_v38 = vcombine.high %v692_v28, %v696_v31  ;;  %v676_v53 = vld [vmem:[%s6973_s14 + $0x418] sm:$0xff] }
 0x253   : > { %4097 = vmatpush2.bf16.msra.mxu1 %v5941_v33  ;;  %v5511_v33 = vcombine.low %v572_v19, %v576_v32  ;;  %v668_v59 = vld [vmem:[%s6973_s14 + $0x3d8] sm:$0xff] }
 0x254   : > { %4098 = vmatprep.subr.bf16.mxu1 %v5934_v36  ;;  %v5504_v36 = vcombine.high %v564_v24, %v568_v27  ;;  %v672_v62 = vld [vmem:[%s6973_s14 + $0x3f8] sm:$0xff] }
 0x255   : > { %4058 = vmatpush2.bf16.msra.mxu0 %v5805_v43  ;;  %v688_v43 = vld [vmem:[%s6973_s14 + $0x478] sm:$0xff] }
 0x256   : > { %4109 = vmatprep.subr.bf16.mxu0 %v5544_v46  ;;  %v5631_v46 = vcombine.low %v692_v28, %v696_v31  ;;  %v5624_v50 = vcombine.high %v684_v42, %v688_v43  ;;  %v796_v63 = vld [vmem:[%s6973_s14 + $0x7d8] sm:$0xff] }
 0x257   : > { %4099 = vmatpush2.bf16.msra.mxu1 %v5933_v44  ;;  %v5503_v44 = vcombine.low %v564_v24, %v568_v27  ;;  %v784_v19 = vld [vmem:[%s6973_s14 + $0x778] sm:$0xff] }
 0x258   : > { %4150 = vmatprep.subr.bf16.mxu1 %v5672_v49  ;;  %v7488_v61 = vpop.f32.mrf.mxu0  ;;  %4060 = vmatmul.mubr.bf16.vlgmr.msra.gmra.mxu0 %v7182_v45  ;;  %v5496_v49 = vcombine.high %v556_v39, %v560_v41  ;;  %v776_v24 = vld [vmem:[%s6973_s14 + $0x738] sm:$0xff] }
 0x259   : > { %4110 = vmatpush1.bf16.msra.mxu0 %v5543_v54  ;;  %4141 = vmatprep.mubr.bf16.mxu0 %v7060_v3  ;;  %v5648_v3 = vcombine.high %v708_v13, %v712_v14  ;;  %v680_v54 = vld [vmem:[%s6973_s14 + $0x438] sm:$0xff] }
 0x25a   : > { %v7493_v0 = vpop.f32.mrf.mxu1  ;;  %4101 = vmatmul.mubr.bf16.vlgmr.msra.gmra.mxu1 %v7186_v48  ;;  %v7496_v5 = vpop.f32.mrf.mxu0  ;;  %4111 = vmatprep.subr.bf16.mxu0 %v5536_v56  ;;  %v5623_v56 = vcombine.low %v684_v42, %v688_v43  ;;  %v5616_v58 = vcombine.high %v676_v53, %v680_v54  ;;  %v788_v13 = vld [vmem:[%s6973_s14 + $0x798] sm:$0xff] }
 0x25b   : > { %4151 = vmatpush1.bf16.msra.mxu1 %v5671_v55  ;;  %4182 = vmatprep.mubr.bf16.mxu1 %v7062_v4  ;;  %v5519_v4 = vcombine.low %v580_v10, %v584_v11  ;;  %v5495_v55 = vcombine.low %v556_v39, %v560_v41  ;;  %v660_v11 = vld [vmem:[%s6973_s14 + $0x398] sm:$0xff] }
 0x25c   : > { %v7498_v8 = vpop.f32.mrf.mxu1  ;;  %4152 = vmatprep.subr.bf16.mxu1 %v5664_v57  ;;  %v3819_v12 = vpop.f32.mrf.mxu0  ;;  %v5488_v57 = vcombine.high %v548_v51, %v552_v52  ;;  %v792_v14 = vld [vmem:[%s6973_s14 + $0x7b8] sm:$0xff] }
 0x25d   : > { %4112 = vmatpush1.bf16.msra.mxu0 %v5535_v1  ;;  %v800_v1 = vld [vmem:[%s6973_s14 + $0x7f8] sm:$0xff]  ;;  %v5727_v35 = vcombine.low %v788_v13, %v792_v14 }
 0x25e   : > { %v3860_v26 = vpop.f32.mrf.mxu1  ;;  %v3820_v15 = vpop.f32.mrf.mxu0  ;;  %4113 = vmatprep.subr.bf16.mxu0 %v5528_v7  ;;  %v5615_v7 = vcombine.low %v676_v53, %v680_v54  ;;  %v5736_v10 = vcombine.high %v796_v63, %v800_v1  ;;  %v664_v12 = vld [vmem:[%s6973_s14 + $0x3b8] sm:$0xff] }
 0x25f   : > { %4153 = vmatpush1.bf16.msra.mxu1 %v5663_v6  ;;  %v5487_v6 = vcombine.low %v548_v51, %v552_v52  ;;  %v5607_v26 = vcombine.low %v668_v59, %v672_v62  ;;  %v5600_v15 = vcombine.high %v660_v11, %v664_v12  ;;  %v5599_v32 = vcombine.low %v660_v11, %v664_v12  ;;  %v768_v39 = vld [vmem:[%s6973_s14 + $0x6f8] sm:$0xff] }
 0x260   : > { %v3861_v18 = vpop.f32.mrf.mxu1  ;;  %4154 = vmatprep.subr.bf16.mxu1 %v5656_v9  ;;  %v5608_v9 = vcombine.high %v668_v59, %v672_v62  ;;  %v760_v51 = vld [vmem:[%s6973_s14 + $0x6b8] sm:$0xff] }
 0x261   : > { %4114 = vmatpush1.bf16.msra.mxu0 %v5527_v30  ;;  %v5735_v30 = vcombine.low %v796_v63, %v800_v1  ;;  %v656_v18 = vld [vmem:[%s6973_s14 + $0x378] sm:$0xff] }
 0x262   : > { %4115 = vmatprep.subr.bf16.mxu0 %v5520_v17  ;;  %v652_v17 = vld [vmem:[%s6973_s14 + $0x358] sm:$0xff] }
 0x263   : > { %4155 = vmatpush1.bf16.msra.mxu1 %v5655_v16  ;;  %v5728_v16 = vcombine.high %v788_v13, %v792_v14  ;;  %v5592_v20 = vcombine.high %v652_v17, %v656_v18  ;;  %v5591_v27 = vcombine.low %v652_v17, %v656_v18  ;;  %v752_v59 = vld [vmem:[%s6973_s14 + $0x678] sm:$0xff] }
 0x264   : > { %4156 = vmatprep.subr.bf16.mxu1 %v5648_v3  ;;  %v780_v3 = vld [vmem:[%s6973_s14 + $0x758] sm:$0xff] }
 0x265   : > { %4116 = vmatpush1.bf16.msra.mxu0 %v5519_v4  ;;  %v5720_v4 = vcombine.high %v780_v3, %v784_v19  ;;  %v5719_v28 = vcombine.low %v780_v3, %v784_v19  ;;  %v744_v11 = vld [vmem:[%s6973_s14 + $0x638] sm:$0xff] }
 0x266   : > { %4117 = vmatprep.subr.bf16.mxu0 %v5512_v22  ;;  %v648_v22 = vld [vmem:[%s6973_s14 + $0x338] sm:$0xff] }
 0x267   : > { %4157 = vmatpush1.bf16.msra.mxu1 %v5647_v21  ;;  %v644_v21 = vld [vmem:[%s6973_s14 + $0x318] sm:$0xff] }
 0x268   : > { %4158 = vmatprep.subr.bf16.mxu1 %v5640_v23  ;;  %v772_v23 = vld [vmem:[%s6973_s14 + $0x718] sm:$0xff]  ;;  %v5584_v31 = vcombine.high %v644_v21, %v648_v22  ;;  %v5583_v41 = vcombine.low %v644_v21, %v648_v22 }
 0x269   : > { %4118 = vmatpush1.bf16.msra.mxu0 %v5511_v33  ;;  %v5712_v33 = vcombine.high %v772_v23, %v776_v24  ;;  %v5711_v42 = vcombine.low %v772_v23, %v776_v24  ;;  %v992_v17 = vld [vmem:[%s6973_s14 + $0xdf8] sm:$0xff] }
 0x26a   : > { %4119 = vmatprep.subr.bf16.mxu0 %v5504_v36  ;;  %v640_v36 = vld [vmem:[%s6973_s14 + $0x2f8] sm:$0xff] }
 0x26b   : > { %4159 = vmatpush1.bf16.msra.mxu1 %v5639_v34  ;;  %v636_v34 = vld [vmem:[%s6973_s14 + $0x2d8] sm:$0xff] }
 0x26c   : > { %4160 = vmatprep.subr.bf16.mxu1 %v5632_v38  ;;  %v764_v38 = vld [vmem:[%s6973_s14 + $0x6d8] sm:$0xff]  ;;  %v5576_v43 = vcombine.high %v636_v34, %v640_v36  ;;  %v5575_v52 = vcombine.low %v636_v34, %v640_v36 }
 0x26d   : > { %4120 = vmatpush1.bf16.msra.mxu0 %v5503_v44  ;;  %v5704_v44 = vcombine.high %v764_v38, %v768_v39  ;;  %v5703_v53 = vcombine.low %v764_v38, %v768_v39  ;;  %v980_v21 = vld [vmem:[%s6973_s14 + $0xd98] sm:$0xff] }
 0x26e   : > { %4121 = vmatprep.subr.bf16.mxu0 %v5496_v49  ;;  %v632_v49 = vld [vmem:[%s6973_s14 + $0x2b8] sm:$0xff] }
 0x26f   : > { %4161 = vmatpush1.bf16.msra.mxu1 %v5631_v46  ;;  %v628_v46 = vld [vmem:[%s6973_s14 + $0x298] sm:$0xff] }
 0x270   : > { %4162 = vmatprep.subr.bf16.mxu1 %v5624_v50  ;;  %v756_v50 = vld [vmem:[%s6973_s14 + $0x698] sm:$0xff]  ;;  %v5568_v54 = vcombine.high %v628_v46, %v632_v49  ;;  %v5567_v62 = vcombine.low %v628_v46, %v632_v49 }
 0x271   : > { %4122 = vmatpush1.bf16.msra.mxu0 %v5495_v55  ;;  %v5696_v55 = vcombine.high %v756_v50, %v760_v51  ;;  %v5695_v63 = vcombine.low %v756_v50, %v760_v51  ;;  %v984_v22 = vld [vmem:[%s6973_s14 + $0xdb8] sm:$0xff] }
 0x272   : > { %4123 = vmatprep.subr.bf16.mxu0 %v5488_v57  ;;  %v624_v57 = vld [vmem:[%s6973_s14 + $0x278] sm:$0xff] }
 0x273   : > { %4163 = vmatpush1.bf16.msra.mxu1 %v5623_v56  ;;  %v620_v56 = vld [vmem:[%s6973_s14 + $0x258] sm:$0xff] }
 0x274   : > { %4164 = vmatprep.subr.bf16.mxu1 %v5616_v58  ;;  %v748_v58 = vld [vmem:[%s6973_s14 + $0x658] sm:$0xff]  ;;  %v5560_v1 = vcombine.high %v620_v56, %v624_v57  ;;  %v5559_v12 = vcombine.low %v620_v56, %v624_v57 }
 0x275   : > { %4124 = vmatpush1.bf16.msra.mxu0 %v5487_v6  ;;  %v5688_v6 = vcombine.high %v748_v58, %v752_v59  ;;  %v5687_v13 = vcombine.low %v748_v58, %v752_v59  ;;  %v844_v34 = vld [vmem:[%s6973_s14 + $0x958] sm:$0xff] }
 0x276   : > { %4125 = vmatprep.subr.bf16.mxu0 %v5608_v9  ;;  %v616_v9 = vld [vmem:[%s6973_s14 + $0x238] sm:$0xff] }
 0x277   : > { %4165 = vmatpush1.bf16.msra.mxu1 %v5615_v7  ;;  %v612_v7 = vld [vmem:[%s6973_s14 + $0x218] sm:$0xff] }
 0x278   : > { %4166 = vmatprep.subr.bf16.mxu1 %v5736_v10  ;;  %v740_v10 = vld [vmem:[%s6973_s14 + $0x618] sm:$0xff]  ;;  %v5552_v14 = vcombine.high %v612_v7, %v616_v9  ;;  %v5551_v18 = vcombine.low %v612_v7, %v616_v9 }
 0x279   : > { %4126 = vmatpush2.bf16.msra.mxu0 %v5607_v26  ;;  %v5680_v26 = vcombine.high %v740_v10, %v744_v11  ;;  %v5679_v3 = vcombine.low %v740_v10, %v744_v11  ;;  %v848_v36 = vld [vmem:[%s6973_s14 + $0x978] sm:$0xff] }
 0x27a   : > { %4127 = vmatprep.subr.bf16.mxu0 %v5600_v15  ;;  %v864_v15 = vld [vmem:[%s6973_s14 + $0x9f8] sm:$0xff]  ;;  %v5784_v51 = vcombine.high %v844_v34, %v848_v36 }
 0x27b   : > { %4167 = vmatpush2.bf16.msra.mxu1 %v5735_v30  ;;  %v860_v30 = vld [vmem:[%s6973_s14 + $0x9d8] sm:$0xff] }
 0x27c   : > { %4168 = vmatprep.subr.bf16.mxu1 %v5728_v16  ;;  %v988_v16 = vld [vmem:[%s6973_s14 + $0xdd8] sm:$0xff]  ;;  %v5800_v19 = vcombine.high %v860_v30, %v864_v15  ;;  %v5799_v23 = vcombine.low %v860_v30, %v864_v15 }
 0x27d   : > { %4128 = vmatpush2.bf16.msra.mxu0 %v5599_v32  ;;  %v5928_v32 = vcombine.high %v988_v16, %v992_v17  ;;  %v5927_v24 = vcombine.low %v988_v16, %v992_v17  ;;  %v964_v56 = vld [vmem:[%s6973_s14 + $0xd18] sm:$0xff] }
 0x27e   : > { %4129 = vmatprep.subr.bf16.mxu0 %v5592_v20  ;;  %v856_v20 = vld [vmem:[%s6973_s14 + $0x9b8] sm:$0xff] }
 0x27f   : > { %4169 = vmatpush2.bf16.msra.mxu1 %v5727_v35  ;;  %v852_v35 = vld [vmem:[%s6973_s14 + $0x998] sm:$0xff] }
 0x280   : > { %4170 = vmatprep.subr.bf16.mxu1 %v5720_v4  ;;  %v4285_v4 = vsub.s32 2, %v7394_v47  ;;  %v968_v57 = vld [vmem:[%s6973_s14 + $0xd38] sm:$0xff] }
 0x281   : > { %4130 = vmatpush2.bf16.msra.mxu0 %v5591_v27  ;;  %v4289_v27 = vsub.s32 3, %v7394_v47  ;;  %v828_v11 = vld [vmem:[%s6973_s14 + $0x8d8] sm:$0xff]  ;;  %v5903_v15 = vcombine.low %v964_v56, %v968_v57 }
 0x282   : > { %4131 = vmatprep.subr.bf16.mxu0 %v5584_v31  ;;  %v3857_v31 = vadd.f32 %v7493_v0, %v7488_v61  ;;  %v4286_v39 = vrot.slane %v7404_v60, %v4285_v4  ;;  %v5919_v61 = vcombine.low %v980_v21, %v984_v22  ;;  %v4336_v0 = vrot.slane %v7410_v2, %v4285_v4 }
 0x283   : > { %4171 = vmatpush2.bf16.msra.mxu1 %v5719_v28  ;;  %v5792_v28 = vcombine.high %v852_v35, %v856_v20  ;;  %v4290_v50 = vrot.slane %v7404_v60, %v4289_v27  ;;  %v4340_v60 = vrot.slane %v7410_v2, %v4289_v27  ;;  %v956_v2 = vld [vmem:[%s6973_s14 + $0xcd8] sm:$0xff] }
 0x284   : > { %4172 = vmatprep.subr.bf16.mxu1 %v5712_v33  ;;  %v5920_v33 = vcombine.high %v980_v21, %v984_v22  ;;  %v940_v27 = vld [vmem:[%s6973_s14 + $0xc58] sm:$0xff] }
 0x285   : > { %4132 = vmatpush2.bf16.msra.mxu0 %v5583_v41  ;;  %v5791_v41 = vcombine.low %v852_v35, %v856_v20  ;;  %v952_v35 = vld [vmem:[%s6973_s14 + $0xcb8] sm:$0xff] }
 0x286   : > { %4133 = vmatprep.subr.bf16.mxu0 %v5576_v43  ;;  %v976_v43 = vld [vmem:[%s6973_s14 + $0xd78] sm:$0xff] }
 0x287   : > { %4173 = vmatpush2.bf16.msra.mxu1 %v5711_v42  ;;  %v972_v42 = vld [vmem:[%s6973_s14 + $0xd58] sm:$0xff] }
 0x288   : > { %4174 = vmatprep.subr.bf16.mxu1 %v5704_v44  ;;  %v3859_v44 = vadd.f32 %v7498_v8, %v7496_v5 }
 0x289   : > { %4134 = vmatpush2.bf16.msra.mxu0 %v5575_v52 }
 0x28a   : > { %4135 = vmatprep.subr.bf16.mxu0 %v5568_v54  ;;  %v836_v54 = vld [vmem:[%s6973_s14 + $0x918] sm:$0xff] }
 0x28b   : > { %4175 = vmatpush2.bf16.msra.mxu1 %v5703_v53  ;;  %v5912_v53 = vcombine.high %v972_v42, %v976_v43 }
 0x28c   : > { %4176 = vmatprep.subr.bf16.mxu1 %v5696_v55  ;;  %v840_v55 = vld [vmem:[%s6973_s14 + $0x938] sm:$0xff] }
 0x28d   : > { %4136 = vmatpush2.bf16.msra.mxu0 %v5567_v62  ;;  %v5775_v30 = vcombine.low %v836_v54, %v840_v55 }
 0x28e   : > { %4137 = vmatprep.subr.bf16.mxu0 %v5560_v1 }
 0x28f   : > { %4177 = vmatpush2.bf16.msra.mxu1 %v5695_v63  ;;  %v5783_v63 = vcombine.low %v844_v34, %v848_v36 }
 0x290   : > { %4178 = vmatprep.subr.bf16.mxu1 %v5688_v6  ;;  %v5776_v6 = vcombine.high %v836_v54, %v840_v55  ;;  %v920_v54 = vld [vmem:[%s6973_s14 + $0xbb8] sm:$0xff] }
 0x291   : > { %4138 = vmatpush2.bf16.msra.mxu0 %v5559_v12  ;;  %v832_v12 = vld [vmem:[%s6973_s14 + $0x8f8] sm:$0xff] }
 0x292   : > { %4139 = vmatprep.subr.bf16.mxu0 %v5552_v14  ;;  %v5768_v16 = vcombine.high %v828_v11, %v832_v12  ;;  %v5767_v20 = vcombine.low %v828_v11, %v832_v12  ;;  %v1044_v55 = vld [vmem:[%s6973_s14 + $0xf98] sm:$0xff] }
 0x293   : > { %4179 = vmatpush2.bf16.msra.mxu1 %v5687_v13  ;;  %v960_v13 = vld [vmem:[%s6973_s14 + $0xcf8] sm:$0xff] }
 0x294   : > { %4180 = vmatprep.subr.bf16.mxu1 %v5680_v26  ;;  %v5895_v4 = vcombine.low %v956_v2, %v960_v13  ;;  %v1028_v11 = vld [vmem:[%s6973_s14 + $0xf18] sm:$0xff] }
 0x295   : > { %4140 = vmatpush2.bf16.msra.mxu0 %v5551_v18  ;;  %v5896_v18 = vcombine.high %v956_v2, %v960_v13  ;;  %v1032_v12 = vld [vmem:[%s6973_s14 + $0xf38] sm:$0xff] }
 0x296   : > { %4191 = vmatprep.subr.bf16.mxu0 %v5800_v19  ;;  %v824_v19 = vld [vmem:[%s6973_s14 + $0x8b8] sm:$0xff] }
 0x297   : > { %4181 = vmatpush2.bf16.msra.mxu1 %v5679_v3  ;;  %v820_v3 = vld [vmem:[%s6973_s14 + $0x898] sm:$0xff] }
 0x298   : > { %4232 = vmatprep.subr.bf16.mxu1 %v5928_v32  ;;  %v3897_v38 = vpop.f32.mrf.mxu0  ;;  %4142 = vmatmul.mubr.bf16.vlgmr.msra.gmra.mxu0 %v7106_v25  ;;  %v948_v32 = vld [vmem:[%s6973_s14 + $0xc98] sm:$0xff]  ;;  %v5760_v21 = vcombine.high %v820_v3, %v824_v19 }
 0x299   : > { %v3898_v46 = vadd.f32 %v3897_v38, %v3857_v31  ;;  %4192 = vmatpush1.bf16.msra.mxu0 %v5799_v23  ;;  %4223 = vmatprep.mubr.bf16.mxu0 %v7114_v37  ;;  %v5911_v37 = vcombine.low %v972_v42, %v976_v43  ;;  %v5888_v22 = vcombine.high %v948_v32, %v952_v35  ;;  %v812_v23 = vld [vmem:[%s6973_s14 + $0x858] sm:$0xff] }
 0x29a   : > { %v3938_v49 = vpop.f32.mrf.mxu1  ;;  %4183 = vmatmul.mubr.bf16.vlgmr.msra.gmra.mxu1 %v7110_v29  ;;  %v3899_v25 = vpop.f32.mrf.mxu0  ;;  %4193 = vmatprep.subr.bf16.mxu0 %v5792_v28  ;;  %v944_v28 = vld [vmem:[%s6973_s14 + $0xc78] sm:$0xff]  ;;  %v5759_v31 = vcombine.low %v820_v3, %v824_v19  ;;  %v5967_v3 = vcombine.low %v1028_v11, %v1032_v12 }
 0x29b   : > { %4233 = vmatpush1.bf16.msra.mxu1 %v5927_v24  ;;  %v3939_v52 = vadd.f32 %v3938_v49, %v3898_v46  ;;  %v3900_v5 = vadd.f32 %v3899_v25, %v3859_v44  ;;  %4264 = vmatprep.mubr.bf16.mxu1 %v7119_v40  ;;  %v5904_v40 = vcombine.high %v964_v56, %v968_v57  ;;  %v816_v24 = vld [vmem:[%s6973_s14 + $0x878] sm:$0xff] }
 0x29c   : > { %v3940_v8 = vpop.f32.mrf.mxu1  ;;  %4234 = vmatprep.subr.bf16.mxu1 %v5920_v33  ;;  %v3901_v29 = vpop.f32.mrf.mxu0  ;;  %v5887_v33 = vcombine.low %v948_v32, %v952_v35  ;;  %v5752_v34 = vcombine.high %v812_v23, %v816_v24  ;;  %v5880_v36 = vcombine.high %v940_v27, %v944_v28  ;;  %v804_v38 = vld [vmem:[%s6973_s14 + $0x818] sm:$0xff]  ;;  %v5751_v43 = vcombine.low %v812_v23, %v816_v24 }
 0x29d   : > { %v4317_v58 = vmul.f32 %v4286_v39, %v3939_v52  ;;  %v3941_v59 = vadd.f32 %v3940_v8, %v3900_v5  ;;  %4194 = vmatpush1.bf16.msra.mxu0 %v5791_v41  ;;  %v808_v39 = vld [vmem:[%s6973_s14 + $0x838] sm:$0xff]  ;;  %v5879_v44 = vcombine.low %v940_v27, %v944_v28 }
 0x29e   : > { %v3942_v62 = vpop.f32.mrf.mxu1  ;;  %v3902_v1 = vpop.f32.mrf.mxu0  ;;  %4195 = vmatprep.subr.bf16.mxu0 %v5784_v51  ;;  %v932_v41 = vld [vmem:[%s6973_s14 + $0xc18] sm:$0xff]  ;;  %v5744_v46 = vcombine.high %v804_v38, %v808_v39  ;;  %v5743_v51 = vcombine.low %v804_v38, %v808_v39 }
 0x29f   : > { %4235 = vmatpush1.bf16.msra.mxu1 %v5919_v61  ;;  %v4367_v7 = vadd.f32 %v4336_v0, %v4317_v58  ;;  %v4318_v9 = vmul.f32 %v4290_v50, %v3941_v59  ;;  %v936_v42 = vld [vmem:[%s6973_s14 + $0xc38] sm:$0xff] }
 0x2a0   : > { %v3943_v10 = vpop.f32.mrf.mxu1  ;;  %4236 = vmatprep.subr.bf16.mxu1 %v5912_v53  ;;  %v5872_v49 = vcombine.high %v932_v41, %v936_v42  ;;  %v924_v61 = vld [vmem:[%s6973_s14 + $0xbd8] sm:$0xff]  ;;  %v5871_v52 = vcombine.low %v932_v41, %v936_v42 }
 0x2a1   : > { %v4375_v14 = vmax.f32 %v4367_v7, 0.0  ;;  %v4368_v26 = vadd.f32 %v4340_v60, %v4318_v9  ;;  %4196 = vmatpush1.bf16.msra.mxu0 %v5783_v63  ;;  %v928_v0 = vld [vmem:[%s6973_s14 + $0xbf8] sm:$0xff] }
 0x2a2   : > { %4197 = vmatprep.subr.bf16.mxu0 %v5776_v6  ;;  %v1052_v25 = vld [vmem:[%s6973_s14 + $0xfd8] sm:$0xff]  ;;  %v5864_v5 = vcombine.high %v924_v61, %v928_v0  ;;  %v5863_v56 = vcombine.low %v924_v61, %v928_v0 }
 0x2a3   : > { %4237 = vmatpush1.bf16.msra.mxu1 %v5911_v37  ;;  %4383 = vst [vmem:[#allocation2 + $0x18] sm:$0xff] %v4375_v14  ;;  %v4376_v17 = vmax.f32 %v4368_v26, 0.0  ;;  %v1056_v50 = vld [vmem:[%s6973_s14 + $0xff8] sm:$0xff]  ;;  %v5968_v26 = vcombine.high %v1028_v11, %v1032_v12 }
 0x2a4   : > { %4238 = vmatprep.subr.bf16.mxu1 %v5904_v40  ;;  %v5992_v8 = vcombine.high %v1052_v25, %v1056_v50  ;;  %v916_v53 = vld [vmem:[%s6973_s14 + $0xb98] sm:$0xff]  ;;  %v5991_v57 = vcombine.low %v1052_v25, %v1056_v50 }
 0x2a5   : > { %4384 = vst [vmem:[#allocation2 + $0x10] sm:$0xff] %v4376_v17  ;;  %4198 = vmatpush1.bf16.msra.mxu0 %v5775_v30  ;;  %v1048_v29 = vld [vmem:[%s6973_s14 + $0xfb8] sm:$0xff]  ;;  %v5856_v58 = vcombine.high %v916_v53, %v920_v54  ;;  %v5855_v37 = vcombine.low %v916_v53, %v920_v54 }
 0x2a6   : > { %4199 = vmatprep.subr.bf16.mxu0 %v5768_v16  ;;  %v5984_v59 = vcombine.high %v1044_v55, %v1048_v29  ;;  %v908_v60 = vld [vmem:[%s6973_s14 + $0xb58] sm:$0xff]  ;;  %v5983_v6 = vcombine.low %v1044_v55, %v1048_v29 }
 0x2a7   : > { %4239 = vmatpush1.bf16.msra.mxu1 %v5903_v15  ;;  %v912_v62 = vld [vmem:[%s6973_s14 + $0xb78] sm:$0xff] }
 0x2a8   : > { %4240 = vmatprep.subr.bf16.mxu1 %v5896_v18  ;;  %v1036_v63 = vld [vmem:[%s6973_s14 + $0xf58] sm:$0xff]  ;;  %v5848_v7 = vcombine.high %v908_v60, %v912_v62  ;;  %v5847_v2 = vcombine.low %v908_v60, %v912_v62 }
 0x2a9   : > { %4200 = vmatpush1.bf16.msra.mxu0 %v5767_v20  ;;  %v1040_v1 = vld [vmem:[%s6973_s14 + $0xf78] sm:$0xff] }
 0x2aa   : > { %4201 = vmatprep.subr.bf16.mxu0 %v5760_v21  ;;  %v5976_v9 = vcombine.high %v1036_v63, %v1040_v1  ;;  %v900_v10 = vld [vmem:[%s6973_s14 + $0xb18] sm:$0xff]  ;;  %v5975_v13 = vcombine.low %v1036_v63, %v1040_v1  ;;  %v6337_v1 = vld [vmem:[%s6980_s21] sm:$0xff] }
 0x2ab   : > { %4241 = vmatpush1.bf16.msra.mxu1 %v5895_v4  ;;  %v904_v40 = vld [vmem:[%s6973_s14 + $0xb38] sm:$0xff] }
 0x2ac   : > { %4242 = vmatprep.subr.bf16.mxu1 %v5888_v22  ;;  %v5840_v14 = vcombine.high %v900_v10, %v904_v40  ;;  %v892_v30 = vld [vmem:[%s6973_s14 + $0xad8] sm:$0xff]  ;;  %v5839_v18 = vcombine.low %v900_v10, %v904_v40 }
 0x2ad   : > { %4202 = vmatpush1.bf16.msra.mxu0 %v5759_v31  ;;  %v896_v15 = vld [vmem:[%s6973_s14 + $0xaf8] sm:$0xff] }
 0x2ae   : > { %4203 = vmatprep.subr.bf16.mxu0 %v5752_v34  ;;  %v1020_v16 = vld [vmem:[%s6973_s14 + $0xed8] sm:$0xff]  ;;  %v5832_v19 = vcombine.high %v892_v30, %v896_v15  ;;  %v5831_v22 = vcombine.low %v892_v30, %v896_v15 }
 0x2af   : > { %4243 = vmatpush1.bf16.msra.mxu1 %v5887_v33  ;;  %v1024_v17 = vld [vmem:[%s6973_s14 + $0xef8] sm:$0xff] }
 0x2b0   : > { %4244 = vmatprep.subr.bf16.mxu1 %v5880_v36  ;;  %v5960_v32 = vcombine.high %v1020_v16, %v1024_v17  ;;  %v884_v35 = vld [vmem:[%s6973_s14 + $0xa98] sm:$0xff]  ;;  %v5959_v23 = vcombine.low %v1020_v16, %v1024_v17 }
 0x2b1   : > { %4204 = vmatpush1.bf16.msra.mxu0 %v5751_v43  ;;  %v888_v20 = vld [vmem:[%s6973_s14 + $0xab8] sm:$0xff] }
 0x2b2   : > { %4205 = vmatprep.subr.bf16.mxu0 %v5744_v46  ;;  %v1012_v4 = vld [vmem:[%s6973_s14 + $0xe98] sm:$0xff]  ;;  %v5824_v24 = vcombine.high %v884_v35, %v888_v20  ;;  %v5823_v36 = vcombine.low %v884_v35, %v888_v20 }
 0x2b3   : > { %4245 = vmatpush1.bf16.msra.mxu1 %v5879_v44  ;;  %v1016_v21 = vld [vmem:[%s6973_s14 + $0xeb8] sm:$0xff] }
 0x2b4   : > { %4246 = vmatprep.subr.bf16.mxu1 %v5872_v49  ;;  %v5952_v27 = vcombine.high %v1012_v4, %v1016_v21  ;;  %v876_v28 = vld [vmem:[%s6973_s14 + $0xa58] sm:$0xff]  ;;  %v5951_v38 = vcombine.low %v1012_v4, %v1016_v21 }
 0x2b5   : > { %4206 = vmatpush1.bf16.msra.mxu0 %v5743_v51  ;;  %v880_v31 = vld [vmem:[%s6973_s14 + $0xa78] sm:$0xff] }
 0x2b6   : > { %4207 = vmatprep.subr.bf16.mxu0 %v5864_v5  ;;  %v1004_v33 = vld [vmem:[%s6973_s14 + $0xe58] sm:$0xff]  ;;  %v5816_v39 = vcombine.high %v876_v28, %v880_v31  ;;  %v5815_v49 = vcombine.low %v876_v28, %v880_v31  ;;  %v4305_v31 = vsub.s32 7, %v7394_v47 }
 0x2b7   : > { %4247 = vmatpush1.bf16.msra.mxu1 %v5871_v52  ;;  %v1008_v34 = vld [vmem:[%s6973_s14 + $0xe78] sm:$0xff] }
 0x2b8   : > { %4248 = vmatprep.subr.bf16.mxu1 %v5992_v8  ;;  %v5944_v41 = vcombine.high %v1004_v33, %v1008_v34  ;;  %v868_v42 = vld [vmem:[%s6973_s14 + $0xa18] sm:$0xff]  ;;  %v5943_v61 = vcombine.low %v1004_v33, %v1008_v34 }
 0x2b9   : > { %4208 = vmatpush2.bf16.msra.mxu0 %v5863_v56  ;;  %v872_v43 = vld [vmem:[%s6973_s14 + $0xa38] sm:$0xff] }
 0x2ba   : > { %4209 = vmatprep.subr.bf16.mxu0 %v5856_v58  ;;  %v996_v44 = vld [vmem:[%s6973_s14 + $0xe18] sm:$0xff]  ;;  %v5808_v0 = vcombine.high %v868_v42, %v872_v43  ;;  %v5807_v50 = vcombine.low %v868_v42, %v872_v43 }
 0x2bb   : > { %4249 = vmatpush2.bf16.msra.mxu1 %v5991_v57  ;;  %v1000_v46 = vld [vmem:[%s6973_s14 + $0xe38] sm:$0xff]  ;;  %v4293_v57 = vsub.s32 4, %v7394_v47 }
 0x2bc   : > { %4250 = vmatprep.subr.bf16.mxu1 %v5984_v59  ;;  %v5936_v25 = vcombine.high %v996_v44, %v1000_v46  ;;  %v5935_v51 = vcombine.low %v996_v44, %v1000_v46  ;;  %v4297_v59 = vsub.s32 5, %v7394_v47 }
 0x2bd   : > { %4210 = vmatpush2.bf16.msra.mxu0 %v5855_v37  ;;  %v4294_v37 = vrot.slane %v6337_v1, %v4293_v57 }
 0x2be   : > { %4211 = vmatprep.subr.bf16.mxu0 %v5848_v7  ;;  %v6338_v7 = vld [vmem:[%s6986_s16] sm:$0xff]  ;;  %v4298_v11 = vrot.slane %v6337_v1, %v4297_v59 }
 0x2bf   : > { %4251 = vmatpush2.bf16.msra.mxu1 %v5983_v6 }
 0x2c0   : > { %4252 = vmatprep.subr.bf16.mxu1 %v5976_v9  ;;  %v4344_v9 = vrot.slane %v6338_v7, %v4293_v57 }
 0x2c1   : > { %4212 = vmatpush2.bf16.msra.mxu0 %v5847_v2 }
 0x2c2   : > { %4213 = vmatprep.subr.bf16.mxu0 %v5840_v14  ;;  %v4348_v14 = vrot.slane %v6338_v7, %v4297_v59 }
 0x2c3   : > { %4253 = vmatpush2.bf16.msra.mxu1 %v5975_v13 }
 0x2c4   : > { %4254 = vmatprep.subr.bf16.mxu1 %v5968_v26 }
 0x2c5   : > { %4214 = vmatpush2.bf16.msra.mxu0 %v5839_v18 }
 0x2c6   : > { %4215 = vmatprep.subr.bf16.mxu0 %v5832_v19 }
 0x2c7   : > { %4255 = vmatpush2.bf16.msra.mxu1 %v5967_v3 }
 0x2c8   : > { %4256 = vmatprep.subr.bf16.mxu1 %v5960_v32 }
 0x2c9   : > { %4216 = vmatpush2.bf16.msra.mxu0 %v5831_v22 }
 0x2ca   : > { %4217 = vmatprep.subr.bf16.mxu0 %v5824_v24 }
 0x2cb   : > { %4257 = vmatpush2.bf16.msra.mxu1 %v5959_v23 }
 0x2cc   : > { %4258 = vmatprep.subr.bf16.mxu1 %v5952_v27  ;;  %v4301_v27 = vsub.s32 6, %v7394_v47 }
 0x2cd   : > { %4218 = vmatpush2.bf16.msra.mxu0 %v5823_v36 }
 0x2ce   : > { %4219 = vmatprep.subr.bf16.mxu0 %v5816_v39  ;;  %v4302_v39 = vrot.slane %v6337_v1, %v4301_v27  ;;  %v4352_v43 = vrot.slane %v6338_v7, %v4301_v27 }
 0x2cf   : > { %4259 = vmatpush2.bf16.msra.mxu1 %v5951_v38 }
 0x2d0   : > { %4260 = vmatprep.subr.bf16.mxu1 %v5944_v41 }
 0x2d1   : > { %4220 = vmatpush2.bf16.msra.mxu0 %v5815_v49  ;;  %v4306_v49 = vrot.slane %v6337_v1, %v4305_v31 }
 0x2d2   : > { %4221 = vmatprep.subr.bf16.mxu0 %v5808_v0 }
 0x2d3   : > { %4261 = vmatpush2.bf16.msra.mxu1 %v5943_v61 }
 0x2d4   : > { %4262 = vmatprep.subr.bf16.mxu1 %v5936_v25 }
 0x2d5   : > { %4222 = vmatpush2.bf16.msra.mxu0 %v5807_v50  ;;  %v4356_v50 = vrot.slane %v6338_v7, %v4305_v31 }
 0x2d7   : > { %4263 = vmatpush2.bf16.msra.mxu1 %v5935_v51 }
 0x2d8   : > { %v3979_v52 = vpop.f32.mrf.mxu0  ;;  %4224 = vmatmul.mubr.bf16.vlgmr.msra.gmra.mxu0 %v7182_v45 }
 0x2da   : > { %v4020_v5 = vpop.f32.mrf.mxu1  ;;  %4265 = vmatmul.mubr.bf16.vlgmr.msra.gmra.mxu1 %v7186_v48  ;;  %v3981_v8 = vpop.f32.mrf.mxu0 }
 0x2db   : > { %v4021_v58 = vadd.f32 %v4020_v5, %v3979_v52 }
 0x2dc   : > { %v4022_v53 = vpop.f32.mrf.mxu1  ;;  %v3983_v54 = vpop.f32.mrf.mxu0 }
 0x2dd   : > { %v4023_v62 = vadd.f32 %v4022_v53, %v3981_v8 }
 0x2de   : > { %v4024_v55 = vpop.f32.mrf.mxu1  ;;  %v3984_v29 = vpop.f32.mrf.mxu0 }
 0x2e0   : > { %v4025_v56 = vpop.f32.mrf.mxu1 }
 0x318   : > { %v4061_v60 = vpop.f32.mrf.mxu0 }
 0x319   : > { %v4062_v63 = vadd.f32 %v4061_v60, %v4021_v58 }
 0x31a   : > { %v4102_v45 = vpop.f32.mrf.mxu1  ;;  %v4063_v6 = vpop.f32.mrf.mxu0 }
 0x31b   : > { %v4103_v48 = vadd.f32 %v4102_v45, %v4062_v63  ;;  %v4064_v10 = vadd.f32 %v4063_v6, %v4023_v62 }
 0x31c   : > { %v4104_v40 = vpop.f32.mrf.mxu1  ;;  %v4065_v12 = vpop.f32.mrf.mxu0 }
 0x31d   : > { %v4319_v2 = vmul.f32 %v4294_v37, %v4103_v48  ;;  %v4105_v13 = vadd.f32 %v4104_v40, %v4064_v10 }
 0x31e   : > { %v4106_v26 = vpop.f32.mrf.mxu1  ;;  %v4066_v30 = vpop.f32.mrf.mxu0 }
 0x31f   : > { %v4369_v15 = vadd.f32 %v4344_v9, %v4319_v2  ;;  %v4320_v16 = vmul.f32 %v4298_v11, %v4105_v13 }
 0x320   : > { %v4107_v17 = vpop.f32.mrf.mxu1 }
 0x321   : > { %v4377_v18 = vmax.f32 %v4369_v15, 0.0  ;;  %v4370_v3 = vadd.f32 %v4348_v14, %v4320_v16 }
 0x323   : > { %4385 = vst [vmem:[#allocation2 + $0x20] sm:$0xff] %v4377_v18  ;;  %v4378_v19 = vmax.f32 %v4370_v3, 0.0 }
 0x325   : > { %4386 = vst [vmem:[#allocation2 + $0x28] sm:$0xff] %v4378_v19 }
 0x358   : > { %v4143_v32 = vpop.f32.mrf.mxu0 }
 0x35a   : > { %v4184_v35 = vpop.f32.mrf.mxu1  ;;  %v4145_v20 = vpop.f32.mrf.mxu0 }
 0x35b   : > { %v4185_v28 = vadd.f32 %v4184_v35, %v4143_v32 }
 0x35c   : > { %v4186_v4 = vpop.f32.mrf.mxu1  ;;  %v4147_v21 = vpop.f32.mrf.mxu0 }
 0x35d   : > { %v4187_v34 = vadd.f32 %v4186_v4, %v4145_v20 }
 0x35e   : > { %v4188_v22 = vpop.f32.mrf.mxu1  ;;  %v4148_v23 = vpop.f32.mrf.mxu0 }
 0x360   : > { %v4189_v24 = vpop.f32.mrf.mxu1 }
 0x398   : > { %v4225_v33 = vpop.f32.mrf.mxu0 }
 0x399   : > { %v4226_v36 = vadd.f32 %v4225_v33, %v4185_v28 }
 0x39a   : > { %v4266_v38 = vpop.f32.mrf.mxu1  ;;  %v4227_v41 = vpop.f32.mrf.mxu0 }
 0x39b   : > { %v4267_v42 = vadd.f32 %v4266_v38, %v4226_v36  ;;  %v4228_v44 = vadd.f32 %v4227_v41, %v4187_v34 }
 0x39c   : > { %v4268_v46 = vpop.f32.mrf.mxu1  ;;  %v4229_v61 = vpop.f32.mrf.mxu0 }
 0x39d   : > { %v4321_v0 = vmul.f32 %v4302_v39, %v4267_v42  ;;  %v4269_v25 = vadd.f32 %v4268_v46, %v4228_v44 }
 0x39e   : > { %v4270_v51 = vpop.f32.mrf.mxu1  ;;  %v4230_v52 = vpop.f32.mrf.mxu0 }
 0x39f   : > { %v4371_v5 = vadd.f32 %v4352_v43, %v4321_v0  ;;  %v4322_v8 = vmul.f32 %v4306_v49, %v4269_v25 }
 0x3a0   : > { %v4271_v47 = vpop.f32.mrf.mxu1 }
 0x3a1   : > { %v4379_v53 = vmax.f32 %v4371_v5, 0.0  ;;  %v4372_v54 = vadd.f32 %v4356_v50, %v4322_v8 }
 0x3a3   : > { %4387 = vst [vmem:[#allocation2 + $0x40] sm:$0xff] %v4379_v53  ;;  %v4380_v55 = vmax.f32 %v4372_v54, 0.0 }
 0x3a5   : > { %4388 = vst [vmem:[#allocation2 + $0x38] sm:$0xff] %v4380_v55 }
 0x3a6 PF: > { %p5993_p9 = scmp.ne.s32.totalorder %s6772_s15, 6 }
 0x3a8   : > { %4392 = sbr.rel (%p5993_p9) target bundleno = 1241 (0x4d9), region = 100 }
 0x3ad   : > { %v6339_v29 = vld [vmem:[#allocation8 + $0x78] sm:$0xff]   ;;  %v6343_v59 = vld [vmem:[#allocation8 + $0x70] sm:$0xff]   ;;  %v6347_v45 = vld [vmem:[#allocation8 + $0x68] sm:$0xff]   ;;  %vm6698_vm0 = vmmov 0  }
 0x3ae   : > { %v6340_v56 = vld [vmem:[#allocation8 + $0xf8] sm:$0xff]   ;;  %6083 = vmatprep.subr.bf16.mxu0 %v6339_v29  ;;  %v6344_v60 = vld [vmem:[#allocation8 + $0xf0] sm:$0xff]   ;;  %v6348_v1 = vld [vmem:[#allocation8 + $0xe8] sm:$0xff]  }
 0x3af   : > { %v6341_v57 = vld [vmem:[#allocation8 + $0x38] sm:$0xff]   ;;  %6105 = vmatprep.subr.bf16.mxu1 %v6340_v56  ;;  %v6345_v62 = vld [vmem:[#allocation8 + $0x30] sm:$0xff]   ;;  %v6349_v37 = vld [vmem:[#allocation8 + $0x28] sm:$0xff]  }
 0x3b0   : > { %v6342_v58 = vld [vmem:[#allocation8 + $0xb8] sm:$0xff]   ;;  %6084 = vmatpush3.bf16.msra.mxu0 %v6341_v57  ;;  %v6346_v63 = vld [vmem:[#allocation8 + $0xb0] sm:$0xff]   ;;  %v6350_v6 = vld [vmem:[#allocation8 + $0xa8] sm:$0xff]  }
 0x3b1   : > { %6106 = vmatpush3.bf16.msra.mxu1 %v6342_v58  ;;  %6085 = vmatprep.subr.bf16.mxu0 %v6343_v59  ;;  %v6351_v48 = vld [vmem:[#allocation8 + $0x60] sm:$0xff]   ;;  %v6355_v40 = vld [vmem:[#allocation8 + $0x58] sm:$0xff]   ;;  %v6359_v13 = vld [vmem:[#allocation8 + $0x50] sm:$0xff]  }
 0x3b2   : > { %6107 = vmatprep.subr.bf16.mxu1 %v6344_v60  ;;  %v6352_v7 = vld [vmem:[#allocation8 + $0xe0] sm:$0xff]   ;;  %v6356_v11 = vld [vmem:[#allocation8 + $0xd8] sm:$0xff]   ;;  %v6360_v14 = vld [vmem:[#allocation8 + $0xd0] sm:$0xff]  }
 0x3b3   : > { %v6353_v9 = vld [vmem:[#allocation8 + $0x20] sm:$0xff]   ;;  %v6357_v12 = vld [vmem:[#allocation8 + $0x18] sm:$0xff]   ;;  %v6361_v26 = vld [vmem:[#allocation8 + $0x10] sm:$0xff]  }
 0x3b4   : > { %6086 = vmatpush3.bf16.msra.mxu0 %v6345_v62  ;;  %v6354_v10 = vld [vmem:[#allocation8 + $0xa0] sm:$0xff]   ;;  %v6358_v2 = vld [vmem:[#allocation8 + $0x98] sm:$0xff]   ;;  %v6362_v30 = vld [vmem:[#allocation8 + $0x90] sm:$0xff]  }
 0x3b5   : > { %6108 = vmatpush3.bf16.msra.mxu1 %v6346_v63  ;;  %6087 = vmatprep.subr.bf16.mxu0 %v6347_v45  ;;  %v6363_v15 = vld [vmem:[#allocation8 + $0x48] sm:$0xff]   ;;  %v6367_v3 = vld [vmem:[#allocation8 + $0x40] sm:$0xff]   ;;  %v4394_v20 = vld [vmem:[#allocation2] sm:$0xff] }
 0x3b6   : > { %6109 = vmatprep.subr.bf16.mxu1 %v6348_v1  ;;  %v6364_v16 = vld [vmem:[#allocation8 + $0xc8] sm:$0xff]   ;;  %v6368_v19 = vld [vmem:[#allocation8 + $0xc0] sm:$0xff]   ;;  %v4403_v22 = vpack.c.bf16 %v4394_v20, %v4394_v20  ;;  %v4395_v27 = vld [vmem:[#allocation2 + $0x18] sm:$0xff] }
 0x3b7   : > { %v6365_v17 = vld [vmem:[#allocation8 + $0x8] sm:$0xff]   ;;  %v6369_v32 = vld [vmem:[#allocation8] sm:$0xff]   ;;  %v4404_v28 = vpack.c.bf16 %v4395_v27, %v4395_v27  ;;  %v6371_v31 = vld [vmem:[#allocation8 + $0x178] sm:$0xff]  }
 0x3b8   : > { %6088 = vmatpush3.bf16.msra.mxu0 %v6349_v37  ;;  %v6366_v18 = vld [vmem:[#allocation8 + $0x88] sm:$0xff]   ;;  %v6370_v35 = vld [vmem:[#allocation8 + $0x80] sm:$0xff]   ;;  %5019 = vmatprep.mubr.bf16.mxu0 %v4403_v22  ;;  %v6372_v33 = vld [vmem:[#allocation8 + $0x138] sm:$0xff]  }
 0x3b9   : > { %6110 = vmatpush3.bf16.msra.mxu1 %v6350_v6  ;;  %6089 = vmatprep.subr.bf16.mxu0 %v6351_v48  ;;  %v4396_v4 = vld [vmem:[#allocation2 + $0x10] sm:$0xff]  ;;  %v6373_v34 = vld [vmem:[#allocation8 + $0x1f8] sm:$0xff]   ;;  %v6375_v38 = vld [vmem:[#allocation8 + $0x170] sm:$0xff]  }
 0x3ba   : > { %6111 = vmatprep.subr.bf16.mxu1 %v6352_v7  ;;  %v4393_v21 = vld [vmem:[#allocation2 + $0x30] sm:$0xff]  ;;  %v4405_v23 = vpack.c.bf16 %v4396_v4, %v4396_v4  ;;  %v6374_v36 = vld [vmem:[#allocation8 + $0x1b8] sm:$0xff]   ;;  %v6376_v39 = vld [vmem:[#allocation8 + $0x130] sm:$0xff]  }
 0x3bb   : > { %v4402_v24 = vpack.c.bf16 %v4393_v21, %v4393_v21  ;;  %v6377_v41 = vld [vmem:[#allocation8 + $0x1f0] sm:$0xff]   ;;  %v6379_v43 = vld [vmem:[#allocation8 + $0x168] sm:$0xff]   ;;  %v6383_v61 = vld [vmem:[#allocation8 + $0x160] sm:$0xff]  }
 0x3bc   : > { %6090 = vmatpush3.bf16.msra.mxu0 %v6353_v9  ;;  %5059 = vmatprep.mubr.bf16.mxu1 %v4405_v23  ;;  %v6378_v42 = vld [vmem:[#allocation8 + $0x1b0] sm:$0xff]   ;;  %v6380_v44 = vld [vmem:[#allocation8 + $0x128] sm:$0xff]   ;;  %v6384_v0 = vld [vmem:[#allocation8 + $0x120] sm:$0xff]  }
 0x3bd   : > { %6112 = vmatpush3.bf16.msra.mxu1 %v6354_v10  ;;  %6091 = vmatprep.subr.bf16.mxu0 %v6355_v40  ;;  %v6381_v46 = vld [vmem:[#allocation8 + $0x1e8] sm:$0xff]   ;;  %v6385_v25 = vld [vmem:[#allocation8 + $0x1e0] sm:$0xff]   ;;  %v6387_v51 = vld [vmem:[#allocation8 + $0x158] sm:$0xff]   ;;  %v6697_v40 = vmov 0.0  }
 0x3be   : > { %6113 = vmatprep.subr.bf16.mxu1 %v6356_v11  ;;  %v6382_v49 = vld [vmem:[#allocation8 + $0x1a8] sm:$0xff]   ;;  %v6386_v50 = vld [vmem:[#allocation8 + $0x1a0] sm:$0xff]   ;;  %v6388_v52 = vld [vmem:[#allocation8 + $0x118] sm:$0xff]  }
 0x3bf   : > { %v6389_v5 = vld [vmem:[#allocation8 + $0x1d8] sm:$0xff]   ;;  %v6391_v47 = vld [vmem:[#allocation8 + $0x150] sm:$0xff]   ;;  %v6395_v29 = vld [vmem:[#allocation8 + $0x148] sm:$0xff]  }
 0x3c0   : > { %6092 = vmatpush3.bf16.msra.mxu0 %v6357_v12  ;;  %v6390_v8 = vld [vmem:[#allocation8 + $0x198] sm:$0xff]   ;;  %v6392_v53 = vld [vmem:[#allocation8 + $0x110] sm:$0xff]   ;;  %v6396_v56 = vld [vmem:[#allocation8 + $0x108] sm:$0xff]  }
 0x3c1   : > { %6114 = vmatpush3.bf16.msra.mxu1 %v6358_v2  ;;  %6093 = vmatprep.subr.bf16.mxu0 %v6359_v13  ;;  %v6393_v54 = vld [vmem:[#allocation8 + $0x1d0] sm:$0xff]   ;;  %v6397_v57 = vld [vmem:[#allocation8 + $0x1c8] sm:$0xff]   ;;  %v6399_v59 = vld [vmem:[#allocation8 + $0x140] sm:$0xff]  }
 0x3c2   : > { %6115 = vmatprep.subr.bf16.mxu1 %v6360_v14  ;;  %v6394_v55 = vld [vmem:[#allocation8 + $0x190] sm:$0xff]   ;;  %v6398_v58 = vld [vmem:[#allocation8 + $0x188] sm:$0xff]   ;;  %v6400_v60 = vld [vmem:[#allocation8 + $0x100] sm:$0xff]  }
 0x3c3   : > { %v6401_v62 = vld [vmem:[#allocation8 + $0x1c0] sm:$0xff]   ;;  %v4397_v37 = vld [vmem:[#allocation2 + $0x20] sm:$0xff]  ;;  %v4400_v48 = vld [vmem:[#allocation2 + $0x38] sm:$0xff] }
 0x3c4   : > { %6094 = vmatpush3.bf16.msra.mxu0 %v6361_v26  ;;  %v4398_v63 = vld [vmem:[#allocation2 + $0x28] sm:$0xff]  ;;  %v4406_v6 = vpack.c.bf16 %v4397_v37, %v4397_v37  ;;  %v4409_v7 = vpack.c.bf16 %v4400_v48, %v4400_v48  ;;  %v6403_v9 = vld [vmem:[#allocation8 + $0x238] sm:$0xff]   ;;  %v6404_v12 = vld [vmem:[#allocation8 + $0x230] sm:$0xff]  }
 0x3c5   : > { %6116 = vmatpush3.bf16.msra.mxu1 %v6362_v30  ;;  %6095 = vmatprep.subr.bf16.mxu0 %v6363_v15  ;;  %v4407_v45 = vpack.c.bf16 %v4398_v63, %v4398_v63  ;;  %v6402_v1 = vld [vmem:[#allocation8 + $0x180] sm:$0xff]   ;;  %v4399_v10 = vld [vmem:[#allocation2 + $0x40] sm:$0xff]  ;;  %v6405_v2 = vld [vmem:[#allocation8 + $0x228] sm:$0xff]  }
 0x3c6   : > { %6117 = vmatprep.subr.bf16.mxu1 %v6364_v16  ;;  %v4408_v11 = vpack.c.bf16 %v4399_v10, %v4399_v10  ;;  %v6406_v13 = vld [vmem:[#allocation8 + $0x220] sm:$0xff]   ;;  %v6407_v14 = vld [vmem:[#allocation8 + $0x218] sm:$0xff]   ;;  %v6408_v26 = vld [vmem:[#allocation8 + $0x210] sm:$0xff]  }
 0x3c7   : > { %v6409_v30 = vld [vmem:[#allocation8 + $0x208] sm:$0xff]   ;;  %v6410_v15 = vld [vmem:[#allocation8 + $0x200] sm:$0xff]  }
 0x3c8   : > { %6096 = vmatpush3.bf16.msra.mxu0 %v6365_v17  ;;  %v4401_v16 = vld [vmem:[#allocation2 + $0x8] sm:$0xff] }
 0x3c9   : > { %6118 = vmatpush3.bf16.msra.mxu1 %v6366_v18  ;;  %6097 = vmatprep.subr.bf16.mxu0 %v6367_v3  ;;  %v4410_v17 = vpack.c.bf16 %v4401_v16, %v4401_v16 }
 0x3ca   : > { %6119 = vmatprep.subr.bf16.mxu1 %v6368_v19 }
 0x3cc   : > { %6098 = vmatpush3.bf16.msra.mxu0 %v6369_v32 }
 0x3cd   : > { %6120 = vmatpush3.bf16.msra.mxu1 %v6370_v35  ;;  %6127 = vmatprep.subr.bf16.mxu0 %v6371_v31 }
 0x3ce   : > { %6149 = vmatprep.subr.bf16.mxu1 %v6373_v34 }
 0x3cf   : > { %5020 = vmatmul.mubr.bf16.vlgmr.msra.gmra.mxu0 %v4402_v24 }
 0x3d0   : > { %5060 = vmatmul.mubr.bf16.vlgmr.msra.gmra.mxu1 %v4404_v28  ;;  %6128 = vmatpush3.bf16.msra.mxu0 %v6372_v33 }
 0x3d1   : > { %6150 = vmatpush3.bf16.msra.mxu1 %v6374_v36  ;;  %6129 = vmatprep.subr.bf16.mxu0 %v6375_v38 }
 0x3d2   : > { %6151 = vmatprep.subr.bf16.mxu1 %v6377_v41  ;;  %5099 = vmatprep.mubr.bf16.mxu0 %v4407_v45 }
 0x3d3   : > { %5139 = vmatprep.mubr.bf16.mxu1 %v4409_v7 }
 0x3d4   : > { %6130 = vmatpush3.bf16.msra.mxu0 %v6376_v39 }
 0x3d5   : > { %6152 = vmatpush3.bf16.msra.mxu1 %v6378_v42  ;;  %6131 = vmatprep.subr.bf16.mxu0 %v6379_v43 }
 0x3d6   : > { %6153 = vmatprep.subr.bf16.mxu1 %v6381_v46 }
 0x3d8   : > { %6132 = vmatpush3.bf16.msra.mxu0 %v6380_v44 }
 0x3d9   : > { %6154 = vmatpush3.bf16.msra.mxu1 %v6382_v49  ;;  %6133 = vmatprep.subr.bf16.mxu0 %v6383_v61  ;;  %v6066_v49 = vld [vmem:[#allocation10] ss:$0 sm:$0xff] }
 0x3da   : > { %6155 = vmatprep.subr.bf16.mxu1 %v6385_v25 }
 0x3dc   : > { %6134 = vmatpush3.bf16.msra.mxu0 %v6384_v0  ;;  %v6067_v0 = vld [vmem:[#allocation11] ss:$0 sm:$0xff] }
 0x3dd   : > { %6156 = vmatpush3.bf16.msra.mxu1 %v6386_v50  ;;  %6135 = vmatprep.subr.bf16.mxu0 %v6387_v51 }
 0x3de   : > { %6157 = vmatprep.subr.bf16.mxu1 %v6389_v5 }
 0x3e0   : > { %6136 = vmatpush3.bf16.msra.mxu0 %v6388_v52 }
 0x3e1   : > { %6158 = vmatpush3.bf16.msra.mxu1 %v6390_v8  ;;  %6137 = vmatprep.subr.bf16.mxu0 %v6391_v47 }
 0x3e2   : > { %6159 = vmatprep.subr.bf16.mxu1 %v6393_v54 }
 0x3e4   : > { %6138 = vmatpush3.bf16.msra.mxu0 %v6392_v53 }
 0x3e5   : > { %6160 = vmatpush3.bf16.msra.mxu1 %v6394_v55  ;;  %6139 = vmatprep.subr.bf16.mxu0 %v6395_v29 }
 0x3e6   : > { %6161 = vmatprep.subr.bf16.mxu1 %v6397_v57 }
 0x3e8   : > { %6140 = vmatpush3.bf16.msra.mxu0 %v6396_v56 }
 0x3e9   : > { %6162 = vmatpush3.bf16.msra.mxu1 %v6398_v58  ;;  %6141 = vmatprep.subr.bf16.mxu0 %v6399_v59 }
 0x3ea   : > { %6163 = vmatprep.subr.bf16.mxu1 %v6401_v62 }
 0x3ec   : > { %6142 = vmatpush3.bf16.msra.mxu0 %v6400_v60 }
 0x3ed   : > { %6164 = vmatpush3.bf16.msra.mxu1 %v6402_v1  ;;  %6189 = vmatprep.subr.bf16.mxu0 %v6697_v40 }
 0x3ef   : > { %5100 = vmatmul.mubr.bf16.vlgmr.msra.gmra.mxu0 %v4406_v6 }
 0x3f0   : > { %6190 = vmatpush3.bf16.msra.mxu0 %v6403_v9  ;;  %5140 = vmatmul.mubr.bf16.vlgmr.msra.gmra.mxu1 %v4408_v11 }
 0x3f1   : > { %6191 = vmatprep.subr.bf16.mxu0 %v6697_v40  ;;  %6205 = vmatprep.mubr.msk.bf16.mxu0 %vm6698_vm0, %v6697_v40 }
 0x3f4   : > { %6192 = vmatpush3.bf16.msra.mxu0 %v6404_v12 }
 0x3f5   : > { %6193 = vmatprep.subr.bf16.mxu0 %v6697_v40 }
 0x3f8   : > { %6194 = vmatpush3.bf16.msra.mxu0 %v6405_v2 }
 0x3f9   : > { %6195 = vmatprep.subr.bf16.mxu0 %v6697_v40 }
 0x3fc   : > { %6196 = vmatpush3.bf16.msra.mxu0 %v6406_v13 }
 0x3fd   : > { %6197 = vmatprep.subr.bf16.mxu0 %v6697_v40 }
 0x400   : > { %6198 = vmatpush3.bf16.msra.mxu0 %v6407_v14 }
 0x401   : > { %6199 = vmatprep.subr.bf16.mxu0 %v6697_v40 }
 0x404   : > { %6200 = vmatpush3.bf16.msra.mxu0 %v6408_v26 }
 0x405   : > { %6201 = vmatprep.subr.bf16.mxu0 %v6697_v40 }
 0x408   : > { %6202 = vmatpush3.bf16.msra.mxu0 %v6409_v30 }
 0x409   : > { %6203 = vmatprep.subr.bf16.mxu0 %v6697_v40 }
 0x40c   : > { %6204 = vmatpush3.bf16.msra.mxu0 %v6410_v15 }
 0x40f   : > { %6206 = vmatmul.mubr.bf16.vlgmr.msra.gmra.mxu0 %v4410_v17 }
 0x48f   : > { %v6099_v18 = vpop.f32.mrf.mxu0 }
 0x490   : > { %v6121_v3 = vpop.f32.mrf.mxu1 }
 0x491   : > { %v6100_v19 = vpop.f32.mrf.mxu0 }
 0x492   : > { %v6122_v32 = vpop.f32.mrf.mxu1  ;;  %v6101_v36 = vadd.f32 %v6100_v19, %v6099_v18 }
 0x493   : > { %v6102_v35 = vpop.f32.mrf.mxu0  ;;  %v6123_v38 = vadd.f32 %v6122_v32, %v6121_v3 }
 0x494   : > { %v6124_v20 = vpop.f32.mrf.mxu1 }
 0x495   : > { %v6103_v4 = vpop.f32.mrf.mxu0  ;;  %v5062_v41 = vadd.f32 %v6123_v38, %v6101_v36 }
 0x496   : > { %v6125_v21 = vpop.f32.mrf.mxu1 }
 0x4af   : > { %v6143_v22 = vpop.f32.mrf.mxu0 }
 0x4b0   : > { %v6165_v23 = vpop.f32.mrf.mxu1 }
 0x4b1   : > { %v6144_v24 = vpop.f32.mrf.mxu0 }
 0x4b2   : > { %v6166_v27 = vpop.f32.mrf.mxu1  ;;  %v6145_v39 = vadd.f32 %v6144_v24, %v6143_v22 }
 0x4b3   : > { %v6146_v28 = vpop.f32.mrf.mxu0  ;;  %v6167_v43 = vadd.f32 %v6166_v27, %v6165_v23 }
 0x4b4   : > { %v6168_v31 = vpop.f32.mrf.mxu1  ;;  %v5102_v42 = vadd.f32 %v6145_v39, %v5062_v41 }
 0x4b5   : > { %v6147_v33 = vpop.f32.mrf.mxu0 }
 0x4b6   : > { %v6169_v34 = vpop.f32.mrf.mxu1  ;;  %v5142_v44 = vadd.f32 %v6167_v43, %v5102_v42 }
 0x4cf   : > { %v5181_v46 = vpop.f32.mrf.mxu0 }
 0x4d0   : > { %v5182_v61 = vadd.f32 %v5181_v46, %v5142_v44 }
 0x4d1   : > { %v6207_v25 = vpop.f32.mrf.mxu0 }
 0x4d2   : > { %v5194_v50 = vmul.f32 %v6066_v49, %v5182_v61 }
 0x4d3   : > { %v5184_v51 = vpop.f32.mrf.mxu0 }
 0x4d4   : > { %v5202_v52 = vadd.f32 %v6067_v0, %v5194_v50 }
 0x4d5   : > { %v6208_v5 = vpop.f32.mrf.mxu0 }
 0x4d6   : > { %v5203_v8 = vmax.f32 %v5202_v52, 0.0 }
 0x4d8   : > { %5204 = vst [vmem:[#allocation2 + $0x30] sm:$0xff] %v5203_v8 }
 0x4d9 PF: > { %p6068_p3 = scmp.ne.s32.totalorder %s6772_s15, 7 }
 0x4db   : > { %5208 = sbr.rel (%p6068_p3) target bundleno = 1480 (0x5c8), region = 104 }
 0x4e0   : > { %v6411_v47 = vld [vmem:[#allocation13 + $0x38] sm:$0xff]   ;;  %v6699_v53 = vmov 0.0   ;;  %v6412_v54 = vld [vmem:[#allocation13 + $0x30] sm:$0xff]   ;;  %vm6700_vm1 = vmmov 0   ;;  %v6413_v55 = vld [vmem:[#allocation13 + $0x28] sm:$0xff]  }
 0x4e1   : > { %6209 = vmatprep.subr.bf16.mxu0 %v6699_v53  ;;  %6225 = vmatprep.mubr.msk.bf16.mxu0 %vm6700_vm1, %v6699_v53  ;;  %v6414_v29 = vld [vmem:[#allocation13 + $0x20] sm:$0xff]   ;;  %v6415_v56 = vld [vmem:[#allocation13 + $0x18] sm:$0xff]   ;;  %v6416_v57 = vld [vmem:[#allocation13 + $0x10] sm:$0xff]  }
 0x4e2   : > { %6210 = vmatpush3.bf16.msra.mxu0 %v6411_v47  ;;  %v6417_v58 = vld [vmem:[#allocation13 + $0x8] sm:$0xff]   ;;  %v6418_v59 = vld [vmem:[#allocation13] sm:$0xff]  }
 0x4e3   : > { %6211 = vmatprep.subr.bf16.mxu0 %v6699_v53  ;;  %v5209_v60 = vld [vmem:[#allocation2 + $0x30] sm:$0xff]  ;;  %v6069_v63 = vld [vmem:[#allocation14] ss:$0 sm:$0xff] }
 0x4e4   : > { %v5210_v62 = vpack.c.bf16 %v5209_v60, %v5209_v60 }
 0x4e6   : > { %6212 = vmatpush3.bf16.msra.mxu0 %v6412_v54 }
 0x4e7   : > { %6213 = vmatprep.subr.bf16.mxu0 %v6699_v53 }
 0x4ea   : > { %6214 = vmatpush3.bf16.msra.mxu0 %v6413_v55 }
 0x4eb   : > { %6215 = vmatprep.subr.bf16.mxu0 %v6699_v53 }
 0x4ee   : > { %6216 = vmatpush3.bf16.msra.mxu0 %v6414_v29 }
 0x4ef   : > { %6217 = vmatprep.subr.bf16.mxu0 %v6699_v53 }
 0x4f2   : > { %6218 = vmatpush3.bf16.msra.mxu0 %v6415_v56 }
 0x4f3   : > { %6219 = vmatprep.subr.bf16.mxu0 %v6699_v53 }
 0x4f6   : > { %6220 = vmatpush3.bf16.msra.mxu0 %v6416_v57 }
 0x4f7   : > { %6221 = vmatprep.subr.bf16.mxu0 %v6699_v53 }
 0x4fa   : > { %6222 = vmatpush3.bf16.msra.mxu0 %v6417_v58 }
 0x4fb   : > { %6223 = vmatprep.subr.bf16.mxu0 %v6699_v53 }
 0x4fe   : > { %6224 = vmatpush3.bf16.msra.mxu0 %v6418_v59 }
 0x501   : > { %6226 = vmatmul.mubr.bf16.vlgmr.msra.gmra.mxu0 %v5210_v62 }
 0x5c1   : > { %v5316_v45 = vpop.f32.mrf.mxu0 }
 0x5c2   : > { %v5317_v1 = vadd.f32 %v6069_v63, %v5316_v45 }
 0x5c3   : > { %v6227_v37 = vpop.f32.mrf.mxu0 }
 0x5c4   : > { %5322 = vst [vmem:[%s7667_s9] sm:$0xff] %v5317_v1 }
 0x5c5   : > { %v5319_v6 = vpop.f32.mrf.mxu0 }
 0x5c7   : > { %v6228_v48 = vpop.f32.mrf.mxu0 }
 0x5c8 PF: > { %s7716_s12 = sld [smem:[#allocation22_spill]]  ;;  %s7719_s30 = smov %s6675_s10 }
 0x5c9   : > { %s7717_s21 = sld [smem:[#allocation21_spill]] }
 0x5ca   : > { %s7718_s11 = sld [smem:[#allocation23_spill]] }
 0x5ce   : > { %p25_p0 = scmp.ge.s32.totalorder %s7716_s12, 10  }
 0x5cf   : > { %s7720_s10 = smov %s7717_s21 }
 0x5d0   :  { %27 = sbr.rel (!%p25_p0) target bundleno = 11 (0xb), region = 152 }
 0x5d5   :  { %5334 = vsyncpa [#allocation4], 1 }
 0x5d6   :  { %5336 = vsyncpa [#allocation4 + $0x1], 1 }
 0x5d7   :  { %5337 = vsyncpa [#allocation6], 1 }
 0x5d8   :  { %5339 = vsyncpa [#allocation6 + $0x1], 1 }
 0x5d9   :  { %5340 = vsyncpa [#allocation9], 1 }
 0x5da   :  { %5341 = vsyncpa [#allocation12], 1 }
 0x5db   :  { %5342 = vsyncpa [#allocation15], 1 }

</bundles_post_ra>
